<compile_context>
chip_gen: v6e
topology: v6e:2x2x1
jax: 0.10.0
libtpu: 0.0.40
codegen_flags: <defaults>
</compile_context>

<pallas_src>
import functools

import numpy as np

import jax
import jax.numpy as jnp
from jax import lax
from jax.experimental import pallas as pl
from jax.experimental.pallas import tpu as pltpu

VMEM_SPEC = pl.BlockSpec(memory_space=pltpu.MemorySpace.VMEM)


# ----------------------------------------------------------------------------
# The single fused forward kernel.
# ----------------------------------------------------------------------------
def fused_forward_kernel(first_ids_ref, last_ids_ref, fsuf_ref, lsuf_ref,
                         phon_ref, lstm_ref, attn_ref, head_ref, out_ref,
                         *, meta):
    H = meta['H']
    V = meta['V']
    Vs = meta['Vs']
    n_layers = meta['n_layers']
    lstm_offs = meta['lstm_offs']
    attn_offs = meta['attn_offs']
    head_offs = meta['head_offs']

    f32 = jnp.float32
    bf16 = jnp.bfloat16
    B, T = first_ids_ref.shape
    D = 2 * H          # per-name bidirectional feature width
    D4 = 4 * H         # packed state width (both names, both directions)
    D16 = 16 * H       # packed gate width

    def take(ref, offs, name):
        off, r = offs[name]
        return ref[off:off + r, :]

    # fwd/bwd lane masks (host-built constant row; avoids per-step lane math).
    fwd16 = take(lstm_ref, lstm_offs, 'fwd16') > 0.5            # (1, 16H) bool
    fwd4 = fwd16[:, :D4]                                         # (1, 4H)

    # ---- layer-0 gate pre-activations for all timesteps / names / directions.
    # char-embedding + eval-BatchNorm + layer-0 input projection are folded
    # host-side into one (2V, 16H) table -> a single one-hot matmul.
    first_ids = first_ids_ref[...]
    last_ids = last_ids_ref[...]
    lane2v = lax.broadcasted_iota(jnp.int32, (B, T, 2 * V), 2)
    onehot = ((lane2v == first_ids[:, :, None]) |
              (lane2v == (last_ids[:, :, None] + V))).astype(f32)
    gx = (jnp.einsum('btv,vg->btg', onehot,
                     take(lstm_ref, lstm_offs, 'M_emb'),
                     preferred_element_type=f32)
          + take(lstm_ref, lstm_offs, 'bias0')[None])            # (B, T, 16H)

    # ---- stacked BiLSTM: both names + both directions fused per step --------
    seq = None
    for layer in range(n_layers):
        if layer > 0:
            w_ih = take(lstm_ref, lstm_offs, f'w_ih_l{layer}')   # (4H, 16H)
            b_l = take(lstm_ref, lstm_offs, f'b_l{layer}')       # (1, 16H)
            gx = (jnp.einsum('btd,dg->btg', seq, w_ih,
                             preferred_element_type=f32) + b_l[None])
        whh = take(lstm_ref, lstm_offs, f'whh_l{layer}').astype(bf16)  # (4H,16H)
        h_all = jnp.zeros((B, D4), f32)
        c_all = jnp.zeros((B, D4), f32)
        h_steps = []
        for s in range(T):      # static unroll; fwd dirs walk s, bwd dirs T-1-s
            # ONE recurrent matmul per step (block-diag over dirs x names),
            # bf16 operands with f32 accumulation.
            gates = jnp.dot(h_all.astype(bf16), whh,
                            preferred_element_type=f32)          # (B, 16H)
            gates = gates + jnp.where(fwd16, gx[:, s, :], gx[:, T - 1 - s, :])
            sig = jax.nn.sigmoid(gates[:, 0:3 * D4])             # [i|f|o] contiguous
            g = jnp.tanh(gates[:, 3 * D4:4 * D4])                # cell gate
            c_all = sig[:, D4:2 * D4] * c_all + sig[:, 0:D4] * g
            h_all = sig[:, 2 * D4:3 * D4] * jnp.tanh(c_all)
            h_steps.append(h_all)
        # Time-aligned bidirectional outputs for both names, materialized once:
        # row t = fwd lanes from step t, bwd lanes from step T-1-t ->
        # layout [first fwd|bwd (2H) | last fwd|bwd (2H)].
        seq = jnp.stack([jnp.where(fwd4, h_steps[t], h_steps[T - 1 - t])
                         for t in range(T)], axis=1)             # (B, T, 4H)
        # inter-layer dropout: identity in eval mode

    first_seq = seq[:, :, 0:D]
    last_seq = seq[:, :, D:2 * D]

    # ---- shared lstm_norm (LayerNorm) + multi-head additive attention -------
    ln_g = take(attn_ref, attn_offs, 'ln_g')[None]               # (1,1,2H)
    ln_b = take(attn_ref, attn_offs, 'ln_b')[None]
    expand = take(attn_ref, attn_offs, 'expand')                 # (2H, 2H) 0/1, host-built

    def attend(x, name):
        wp = take(attn_ref, attn_offs, f'Wp_{name}')             # (2H, 2H)
        bp = take(attn_ref, attn_offs, f'bp_{name}')[None]
        ws = take(attn_ref, attn_offs, f'Ws_{name}')             # (2H, 2H): cols>=nh zero
        bs = take(attn_ref, attn_offs, f'bs_{name}')[None]
        mean = jnp.mean(x, axis=-1, keepdims=True)
        var = jnp.mean((x - mean) ** 2, axis=-1, keepdims=True)
        xn = (x - mean) * lax.rsqrt(var + 1e-5) * ln_g + ln_b    # (B, T, 2H)
        proj = jnp.tanh(jnp.einsum('btd,de->bte', xn, wp,
                                   preferred_element_type=f32) + bp)
        scores = jnp.einsum('bte,eh->bth', proj, ws,
                            preferred_element_type=f32) + bs     # padded head cols
        scores = scores - jnp.max(scores, axis=1, keepdims=True)
        w = jnp.exp(scores)
        w = w * pl.reciprocal(jnp.sum(w, axis=1, keepdims=True), approx=True)
        # padded-head columns carry zero rows in `expand` -> no contribution.
        w_full = jnp.einsum('bth,hd->btd', w, expand,
                            preferred_element_type=f32)
        return jnp.sum(w_full * xn, axis=1)                      # (B, 2H)

    first_ctx = attend(first_seq, 'first')
    last_ctx = attend(last_seq, 'last')

    # ---- suffix one-hot (both names, 6 slots) -> single folded matmul -------
    fsuf = fsuf_ref[...]
    lsuf = lsuf_ref[...]
    lane6 = lax.broadcasted_iota(jnp.int32, (B, 6 * Vs), 1)
    oh = (lane6 == fsuf[:, 0:1])
    oh = oh | (lane6 == lsuf[:, 0:1] + 3 * Vs)
    for j in range(1, 3):
        oh = oh | (lane6 == fsuf[:, j:j + 1] + j * Vs)
        oh = oh | (lane6 == lsuf[:, j:j + 1] + (3 + j) * Vs)
    suf_x = oh.astype(f32)

    # ---- classifier head (bn1/bn2/phonetic/suffix folds done host-side) -----
    x1 = (jnp.dot(first_ctx, take(head_ref, head_offs, 'w1_fc'),
                  preferred_element_type=f32)
          + jnp.dot(last_ctx, take(head_ref, head_offs, 'w1_lc'),
                    preferred_element_type=f32)
          + jnp.dot(suf_x, take(head_ref, head_offs, 'M_suf'),
                    preferred_element_type=f32)
          + jnp.dot(phon_ref[...], take(head_ref, head_offs, 'M_ph'),
                    preferred_element_type=f32)
          + take(head_ref, head_offs, 'b1'))
    x1 = jnp.maximum(x1, 0.0)                                    # fc1+bn1+relu
    x2 = jnp.maximum(jnp.dot(x1, take(head_ref, head_offs, 'w2'),
                             preferred_element_type=f32)
                     + take(head_ref, head_offs, 'b2'), 0.0)     # fc2+bn2+relu
    logit = (jnp.sum(x1 * take(head_ref, head_offs, 'w3a'),
                     axis=-1, keepdims=True)
             + jnp.sum(x2 * take(head_ref, head_offs, 'w3b'),
                       axis=-1, keepdims=True)
             + take(head_ref, head_offs, 'b3')[:, 0:1])          # fc3(cat(x1,x2))
    out_ref[...] = logit


# ----------------------------------------------------------------------------
# Raw (PyTorch-like) parameter construction — deterministic synthetic init.
# ----------------------------------------------------------------------------
def make_params(key, V, Vs, E, H, n_layers, num_heads):
    keys = iter(jax.random.split(key, 256))

    def nrm(shape, s=0.1):
        return (s * jax.random.normal(next(keys), shape)).astype(jnp.float32)

    def bn(n):                       # (gamma, beta, running_mean, running_var)
        return (1.0 + nrm((n,)), nrm((n,)), nrm((n,)), 1.0 + jnp.abs(nrm((n,))))

    S = E // 2
    p = {}
    p['char_emb'] = nrm((V, E), 1.0).at[0].set(0.0)      # padding_idx=0
    p['suffix_emb'] = nrm((Vs, S), 1.0)
    p['emb_bn'] = bn(E)
    p['phonetic_w'] = nrm((4, E // 4))
    p['phonetic_b'] = nrm((E // 4,))

    def lstm():
        layers = []
        for layer in range(n_layers):
            din = E if layer == 0 else 2 * H
            # per direction: (w_ih (din,4H) cols [i|f|g|o], w_hh (H,4H), b_ih+b_hh (4H,))
            layers.append({d: (nrm((din, 4 * H)), nrm((H, 4 * H)), nrm((4 * H,)))
                           for d in ('fwd', 'bwd')})
        return layers

    p['lstm'] = {'first': lstm(), 'last': lstm()}
    p['ln_g'] = 1.0 + nrm((2 * H,))
    p['ln_b'] = nrm((2 * H,))
    p['attn'] = {n: (nrm((2 * H, 2 * H)), nrm((2 * H,)),
                     nrm((2 * H, num_heads)), nrm((num_heads,)))
                 for n in ('first', 'last')}

    feat = 4 * H + 3 * S * 2 + E // 4
    p['fc1_w'] = nrm((feat, H))
    p['fc1_b'] = nrm((H,))
    p['bn1'] = bn(H)
    p['fc2_w'] = nrm((H, H // 2))
    p['fc2_b'] = nrm((H // 2,))
    p['bn2'] = bn(H // 2)
    p['fc3_w'] = nrm((H + H // 2, 1))
    p['fc3_b'] = nrm((1,))
    return p


# ----------------------------------------------------------------------------
# Host-side folding + slab packing (all mathematically identical, eval mode).
# ----------------------------------------------------------------------------
def _pack(entries, width):
    """Stack 2D arrays (same width) with 8-row alignment; return slab + offsets."""
    offs, parts, cur = {}, [], 0
    for name, arr in entries:
        arr = np.asarray(arr, np.float32)
        assert arr.ndim == 2 and arr.shape[1] == width, (name, arr.shape, width)
        r = arr.shape[0]
        offs[name] = (cur, r)
        pad = (-r) % 8
        if pad:
            arr = np.concatenate([arr, np.zeros((pad, width), np.float32)], 0)
        parts.append(arr)
        cur += r + pad
    return jnp.asarray(np.concatenate(parts, axis=0)), offs


def _bn_affine(bn):
    gamma, beta, rmean, rvar = (np.asarray(x, np.float32) for x in bn)
    s = gamma / np.sqrt(rvar + 1e-5)
    return s, beta - rmean * s


def pack_params(p, *, H, E, V, Vs, n_layers, num_heads):
    f = lambda a: np.asarray(a, np.float32)
    S = E // 2
    D, H4, H16 = 2 * H, 4 * H, 16 * H
    # packed state / gate block order: 0=fwd_first, 1=bwd_first, 2=fwd_last, 3=bwd_last
    blocks = [('first', 'fwd'), ('first', 'bwd'), ('last', 'fwd'), ('last', 'bwd')]
    RAW_OF_FUSED = (0, 1, 3, 2)   # fused gate groups (i,f,o,g) <- raw cols (i,f,g,o)

    def scatter(dest, row0, w_raw, blk):
        r = w_raw.shape[0]
        for g in range(4):
            rg = RAW_OF_FUSED[g]
            dest[row0:row0 + r, g * H4 + blk * H: g * H4 + (blk + 1) * H] = \
                w_raw[:, rg * H:(rg + 1) * H]

    def pad_cols(a, w):
        a = f(a)
        return np.pad(a, ((0, 0), (0, w - a.shape[1])))

    # --- embedding BatchNorm (eval) folded to affine ---
    gamma, beta, rmean, rvar = (f(x) for x in p['emb_bn'])
    bn_scale = gamma / np.sqrt(rvar + 1e-5)
    bn_shift = beta - rmean * bn_scale

    # --- layer-0 folded table (char-emb * bn_scale @ w_ih) + total bias ---
    M_emb = np.zeros((2 * V, H16), np.float32)
    bias0 = np.zeros((1, H16), np.float32)
    char_scaled = f(p['char_emb']) * bn_scale[None, :]
    for blk, (name, d) in enumerate(blocks):
        w_ih, _, b = p['lstm'][name][0][d]
        w_ih = f(w_ih)
        row0 = 0 if name == 'first' else V
        scatter(M_emb, row0, char_scaled @ w_ih, blk)
        scatter(bias0, 0, bn_shift[None, :] @ w_ih + f(b)[None, :], blk)

    fwd_mask = np.zeros((1, H16), np.float32)
    lane = np.arange(H16)
    fwd_mask[0, ((lane // H) % 2) == 0] = 1.0

    lstm_entries = [('M_emb', M_emb), ('bias0', bias0), ('fwd16', fwd_mask)]
    for layer in range(n_layers):
        whh = np.zeros((H4, H16), np.float32)
        for blk, (name, d) in enumerate(blocks):
            _, w_hh, _ = p['lstm'][name][layer][d]
            scatter(whh, blk * H, f(w_hh), blk)
        lstm_entries.append((f'whh_l{layer}', whh))
        if layer > 0:
            w_ih_f = np.zeros((H4, H16), np.float32)
            b_f = np.zeros((1, H16), np.float32)
            for blk, (name, d) in enumerate(blocks):
                w_ih, _, b = p['lstm'][name][layer][d]
                row0 = 0 if name == 'first' else D
                scatter(w_ih_f, row0, f(w_ih), blk)
                scatter(b_f, 0, f(b)[None, :], blk)
            lstm_entries += [(f'w_ih_l{layer}', w_ih_f), (f'b_l{layer}', b_f)]
    lstm_slab, lstm_offs = _pack(lstm_entries, H16)

    # --- attention / LayerNorm slab (width 2H); heads padded to 2H columns ---
    K = D // num_heads
    expand = np.zeros((D, D), np.float32)
    for h in range(num_heads):
        expand[h, h * K:(h + 1) * K] = 1.0
    attn_entries = [('ln_g', f(p['ln_g'])[None, :]),
                    ('ln_b', f(p['ln_b'])[None, :]),
                    ('expand', expand)]
    for name in ('first', 'last'):
        Wp, bp, Ws, bs = p['attn'][name]
        attn_entries += [(f'Wp_{name}', f(Wp)),
                         (f'bp_{name}', f(bp)[None, :]),
                         (f'Ws_{name}', pad_cols(f(Ws), D)),
                         (f'bs_{name}', pad_cols(f(bs)[None, :], D))]
    attn_slab, attn_offs = _pack(attn_entries, D)

    # --- classifier head slab (width H); bn1/bn2/suffix/phonetic folded ---
    s1, t1 = _bn_affine(p['bn1'])
    s2, t2 = _bn_affine(p['bn2'])
    fc1_w = f(p['fc1_w'])
    o = 0
    w1_fc = fc1_w[o:o + D]; o += D
    w1_lc = fc1_w[o:o + D]; o += D
    w1_fs = fc1_w[o:o + 3 * S]; o += 3 * S
    w1_ls = fc1_w[o:o + 3 * S]; o += 3 * S
    w1_ph = fc1_w[o:o + E // 4]; o += E // 4

    suf = f(p['suffix_emb'])
    M_suf = np.concatenate([suf @ w1_fs[j * S:(j + 1) * S] for j in range(3)]
                           + [suf @ w1_ls[j * S:(j + 1) * S] for j in range(3)], 0)
    M_ph = f(p['phonetic_w']) @ w1_ph
    b1 = f(p['fc1_b'])[None, :] + f(p['phonetic_b'])[None, :] @ w1_ph
    # fold bn1 into fc1 blocks, bn2 into fc2
    w1_fc = w1_fc * s1[None, :]
    w1_lc = w1_lc * s1[None, :]
    M_suf = M_suf * s1[None, :]
    M_ph = M_ph * s1[None, :]
    b1 = b1 * s1[None, :] + t1[None, :]
    w2 = f(p['fc2_w']) * s2[None, :]
    b2 = f(p['fc2_b'])[None, :] * s2[None, :] + t2[None, :]
    fc3_w = f(p['fc3_w'])
    w3a = fc3_w[:H, 0][None, :]
    w3b = fc3_w[H:, 0][None, :]
    b3 = f(p['fc3_b'])[None, :]
    head_entries = [('w1_fc', w1_fc), ('w1_lc', w1_lc), ('M_suf', M_suf),
                    ('M_ph', M_ph), ('b1', b1),
                    ('w2', pad_cols(w2, H)), ('b2', pad_cols(b2, H)),
                    ('w3a', w3a), ('w3b', pad_cols(w3b, H)),
                    ('b3', pad_cols(b3, H))]
    head_slab, head_offs = _pack(head_entries, H)

    slabs = (lstm_slab, attn_slab, head_slab)
    meta = dict(H=H, V=V, Vs=Vs, n_layers=n_layers,
                lstm_offs=lstm_offs, attn_offs=attn_offs, head_offs=head_offs)
    return slabs, meta


# ----------------------------------------------------------------------------
# Forward pass: one fused pallas_call (8 input DMAs total).
# ----------------------------------------------------------------------------
def gender_predictor_v3_forward(meta, slabs, first_name, last_name,
                                first_suffix, last_suffix, phonetic):
    # TODO(synk): names with different lengths must be padded to a common T
    #             host-side; the fused recurrence processes both names jointly.
    assert first_name.shape == last_name.shape
    lstm_slab, attn_slab, head_slab = slabs
    B, _ = first_name.shape
    kern = functools.partial(fused_forward_kernel, meta=meta)
    logits = pl.pallas_call(
        kern,
        out_shape=jax.ShapeDtypeStruct((B, 1), jnp.float32),
        in_specs=[VMEM_SPEC] * 8,
        out_specs=VMEM_SPEC,
    )(first_name, last_name, first_suffix, last_suffix, phonetic,
      lstm_slab, attn_slab, head_slab)
    return logits[:, 0]                                       # .squeeze()


if __name__ == "__main__":
    V = 32            # vocab_size
    Vs = 16           # suffix_vocab_size
    E = 32            # embedding_dim
    H = 32            # hidden_size (small for the example)
    n_layers = 2
    num_heads = 4
    B, T = 2, 8

    key = jax.random.PRNGKey(0)
    kp, k1, k2, k3, k4, k5 = jax.random.split(key, 6)
    params = make_params(kp, V, Vs, E, H, n_layers, num_heads)
    slabs, meta = pack_params(params, H=H, E=E, V=V, Vs=Vs,
                              n_layers=n_layers, num_heads=num_heads)

    first_name = jax.random.randint(k1, (B, T), 0, V, dtype=jnp.int32)
    last_name = jax.random.randint(k2, (B, T), 0, V, dtype=jnp.int32)
    first_suffix = jax.random.randint(k3, (B, 3), 0, Vs, dtype=jnp.int32)
    last_suffix = jax.random.randint(k4, (B, 3), 0, Vs, dtype=jnp.int32)
    phonetic = jax.random.normal(k5, (B, 4), dtype=jnp.float32)

    fwd = jax.jit(functools.partial(gender_predictor_v3_forward, meta))
    logits = fwd(slabs, first_name, last_name, first_suffix, last_suffix,
                 phonetic)
    jax.block_until_ready(logits)
    assert logits.shape == (B,), logits.shape
    assert bool(jnp.all(jnp.isfinite(logits)))
    print("KERNEL_OK")
</pallas_src>

<mosaic_0001>
module attributes {stable_mosaic.version = 11 : i64} {
  func.func @fused_forward_kernel(%arg0: memref<2x8xi32, #tpu.memory_space<vmem>>, %arg1: memref<2x8xi32, #tpu.memory_space<vmem>>, %arg2: memref<2x3xi32, #tpu.memory_space<vmem>>, %arg3: memref<2x3xi32, #tpu.memory_space<vmem>>, %arg4: memref<2x4xf32, #tpu.memory_space<vmem>>, %arg5: memref<472x512xf32, #tpu.memory_space<vmem>>, %arg6: memref<368x64xf32, #tpu.memory_space<vmem>>, %arg7: memref<304x32xf32, #tpu.memory_space<vmem>>, %arg8: memref<2x1xf32, #tpu.memory_space<vmem>>) attributes {dimension_semantics = [], scalar_prefetch = 0 : i64, scratch_operands = 0 : i64, tpu.core_type = #tpu.core_type<tc>} {
    %c72 = arith.constant 72 : index
    %c0 = arith.constant 0 : index
    %0 = vector.load %arg5[%c72, %c0] : memref<472x512xf32, #tpu.memory_space<vmem>>, vector<1x512xf32>
    %cst = arith.constant 5.000000e-01 : f32
    %1 = vector.broadcast %cst : f32 to vector<1x512xf32>
    %2 = arith.cmpf ogt, %0, %1 : vector<1x512xf32>
    %3 = vector.extract_strided_slice %2 {offsets = [0, 0], sizes = [1, 128], strides = [1, 1]} : vector<1x512xi1> to vector<1x128xi1>
    %c0_0 = arith.constant 0 : index
    %c0_1 = arith.constant 0 : index
    %4 = vector.load %arg0[%c0_0, %c0_1] : memref<2x8xi32, #tpu.memory_space<vmem>>, vector<2x8xi32>
    %c0_2 = arith.constant 0 : index
    %c0_3 = arith.constant 0 : index
    %5 = vector.load %arg1[%c0_2, %c0_3] : memref<2x8xi32, #tpu.memory_space<vmem>>, vector<2x8xi32>
    %6 = tpu.iota {dimensions = array<i32: 2>} : vector<2x8x64xi32>
    %7 = vector.shape_cast %4 : vector<2x8xi32> to vector<2x8x1xi32>
    %8 = vector.broadcast %7 : vector<2x8x1xi32> to vector<2x8x64xi32>
    %9 = arith.cmpi eq, %6, %8 : vector<2x8x64xi32>
    %10 = vector.shape_cast %5 : vector<2x8xi32> to vector<2x8x1xi32>
    %c32_i32 = arith.constant 32 : i32
    %11 = vector.broadcast %c32_i32 : i32 to vector<2x8x1xi32>
    %12 = arith.addi %10, %11 : vector<2x8x1xi32>
    %13 = vector.broadcast %12 : vector<2x8x1xi32> to vector<2x8x64xi32>
    %14 = arith.cmpi eq, %6, %13 : vector<2x8x64xi32>
    %15 = arith.ori %9, %14 : vector<2x8x64xi1>
    %16 = arith.extui %15 : vector<2x8x64xi1> to vector<2x8x64xi32>
    %17 = arith.sitofp %16 : vector<2x8x64xi32> to vector<2x8x64xf32>
    %c0_4 = arith.constant 0 : index
    %c0_5 = arith.constant 0 : index
    %18 = vector.load %arg5[%c0_4, %c0_5] : memref<472x512xf32, #tpu.memory_space<vmem>>, vector<64x512xf32>
    "tpu.trace_start"() <{level = 10 : i32, message = "btv,vg->btg"}> : () -> ()
    %cst_6 = arith.constant dense<0.000000e+00> : vector<2x8x512xf32>
    %19 = tpu.matmul %17, %18, %cst_6 {dimension_numbers = #tpu.dot_dimension_numbers<[2], [0], [0, 1], [1], [0, 0, 0, 1, 1, 1], [], []>} : vector<2x8x64xf32>, vector<64x512xf32>, vector<2x8x512xf32> -> vector<2x8x512xf32>
    "tpu.trace_stop"() : () -> ()
    %c64 = arith.constant 64 : index
    %c0_7 = arith.constant 0 : index
    %20 = vector.load %arg5[%c64, %c0_7] : memref<472x512xf32, #tpu.memory_space<vmem>>, vector<1x512xf32>
    %21 = vector.shape_cast %20 : vector<1x512xf32> to vector<1x1x512xf32>
    %22 = vector.broadcast %21 : vector<1x1x512xf32> to vector<2x8x512xf32>
    %23 = arith.addf %19, %22 : vector<2x8x512xf32>
    %c80 = arith.constant 80 : index
    %c0_8 = arith.constant 0 : index
    %24 = vector.load %arg5[%c80, %c0_8] : memref<472x512xf32, #tpu.memory_space<vmem>>, vector<128x512xf32>
    %25 = arith.truncf %24 : vector<128x512xf32> to vector<128x512xbf16>
    %cst_9 = arith.constant 0.000000e+00 : f32
    %26 = vector.broadcast %cst_9 : f32 to vector<2x128xf32>
    %cst_10 = arith.constant 0.000000e+00 : f32
    %27 = vector.broadcast %cst_10 : f32 to vector<2x128xf32>
    %28 = arith.truncf %26 : vector<2x128xf32> to vector<2x128xbf16>
    %cst_11 = arith.constant dense<0.000000e+00> : vector<2x512xf32>
    %29 = tpu.matmul %28, %25, %cst_11 {dimension_numbers = #tpu.dot_dimension_numbers<[1], [0], [0], [1], [0, 0, 1, 1], [], []>} : vector<2x128xbf16>, vector<128x512xbf16>, vector<2x512xf32> -> vector<2x512xf32>
    %30 = vector.extract_strided_slice %23 {offsets = [0, 0, 0], sizes = [2, 1, 512], strides = [1, 1, 1]} : vector<2x8x512xf32> to vector<2x1x512xf32>
    %31 = vector.shape_cast %30 : vector<2x1x512xf32> to vector<2x512xf32>
    %32 = vector.extract_strided_slice %23 {offsets = [0, 7, 0], sizes = [2, 1, 512], strides = [1, 1, 1]} : vector<2x8x512xf32> to vector<2x1x512xf32>
    %33 = vector.shape_cast %32 : vector<2x1x512xf32> to vector<2x512xf32>
    %34 = vector.shape_cast %2 : vector<1x512xi1> to vector<1x512xi1>
    %35 = vector.broadcast %34 : vector<1x512xi1> to vector<2x512xi1>
    %36 = arith.select %35, %31, %33 : vector<2x512xi1>, vector<2x512xf32>
    %37 = arith.addf %29, %36 : vector<2x512xf32>
    %38 = vector.extract_strided_slice %37 {offsets = [0, 0], sizes = [2, 384], strides = [1, 1]} : vector<2x512xf32> to vector<2x384xf32>
    %39 = arith.negf %38 : vector<2x384xf32>
    %40 = math.exp %39 : vector<2x384xf32>
    %cst_12 = arith.constant 1.000000e+00 : f32
    %41 = vector.broadcast %cst_12 : f32 to vector<2x384xf32>
    %42 = arith.addf %41, %40 : vector<2x384xf32>
    %43 = arith.divf %41, %42 : vector<2x384xf32>
    %44 = vector.extract_strided_slice %37 {offsets = [0, 384], sizes = [2, 128], strides = [1, 1]} : vector<2x512xf32> to vector<2x128xf32>
    %45 = math.tanh %44 : vector<2x128xf32>
    %46 = vector.extract_strided_slice %43 {offsets = [0, 128], sizes = [2, 128], strides = [1, 1]} : vector<2x384xf32> to vector<2x128xf32>
    %47 = arith.mulf %46, %27 : vector<2x128xf32>
    %48 = vector.extract_strided_slice %43 {offsets = [0, 0], sizes = [2, 128], strides = [1, 1]} : vector<2x384xf32> to vector<2x128xf32>
    %49 = arith.mulf %48, %45 : vector<2x128xf32>
    %50 = arith.addf %47, %49 : vector<2x128xf32>
    %51 = vector.extract_strided_slice %43 {offsets = [0, 256], sizes = [2, 128], strides = [1, 1]} : vector<2x384xf32> to vector<2x128xf32>
    %52 = math.tanh %50 : vector<2x128xf32>
    %53 = arith.mulf %51, %52 : vector<2x128xf32>
    %54 = arith.truncf %53 : vector<2x128xf32> to vector<2x128xbf16>
    %cst_13 = arith.constant dense<0.000000e+00> : vector<2x512xf32>
    %55 = tpu.matmul %54, %25, %cst_13 {dimension_numbers = #tpu.dot_dimension_numbers<[1], [0], [0], [1], [0, 0, 1, 1], [], []>} : vector<2x128xbf16>, vector<128x512xbf16>, vector<2x512xf32> -> vector<2x512xf32>
    %56 = vector.extract_strided_slice %23 {offsets = [0, 1, 0], sizes = [2, 1, 512], strides = [1, 1, 1]} : vector<2x8x512xf32> to vector<2x1x512xf32>
    %57 = vector.shape_cast %56 : vector<2x1x512xf32> to vector<2x512xf32>
    %58 = vector.extract_strided_slice %23 {offsets = [0, 6, 0], sizes = [2, 1, 512], strides = [1, 1, 1]} : vector<2x8x512xf32> to vector<2x1x512xf32>
    %59 = vector.shape_cast %58 : vector<2x1x512xf32> to vector<2x512xf32>
    %60 = vector.shape_cast %2 : vector<1x512xi1> to vector<1x512xi1>
    %61 = vector.broadcast %60 : vector<1x512xi1> to vector<2x512xi1>
    %62 = arith.select %61, %57, %59 : vector<2x512xi1>, vector<2x512xf32>
    %63 = arith.addf %55, %62 : vector<2x512xf32>
    %64 = vector.extract_strided_slice %63 {offsets = [0, 0], sizes = [2, 384], strides = [1, 1]} : vector<2x512xf32> to vector<2x384xf32>
    %65 = arith.negf %64 : vector<2x384xf32>
    %66 = math.exp %65 : vector<2x384xf32>
    %cst_14 = arith.constant 1.000000e+00 : f32
    %67 = vector.broadcast %cst_14 : f32 to vector<2x384xf32>
    %68 = arith.addf %67, %66 : vector<2x384xf32>
    %69 = arith.divf %67, %68 : vector<2x384xf32>
    %70 = vector.extract_strided_slice %63 {offsets = [0, 384], sizes = [2, 128], strides = [1, 1]} : vector<2x512xf32> to vector<2x128xf32>
    %71 = math.tanh %70 : vector<2x128xf32>
    %72 = vector.extract_strided_slice %69 {offsets = [0, 128], sizes = [2, 128], strides = [1, 1]} : vector<2x384xf32> to vector<2x128xf32>
    %73 = arith.mulf %72, %50 : vector<2x128xf32>
    %74 = vector.extract_strided_slice %69 {offsets = [0, 0], sizes = [2, 128], strides = [1, 1]} : vector<2x384xf32> to vector<2x128xf32>
    %75 = arith.mulf %74, %71 : vector<2x128xf32>
    %76 = arith.addf %73, %75 : vector<2x128xf32>
    %77 = vector.extract_strided_slice %69 {offsets = [0, 256], sizes = [2, 128], strides = [1, 1]} : vector<2x384xf32> to vector<2x128xf32>
    %78 = math.tanh %76 : vector<2x128xf32>
    %79 = arith.mulf %77, %78 : vector<2x128xf32>
    %80 = arith.truncf %79 : vector<2x128xf32> to vector<2x128xbf16>
    %cst_15 = arith.constant dense<0.000000e+00> : vector<2x512xf32>
    %81 = tpu.matmul %80, %25, %cst_15 {dimension_numbers = #tpu.dot_dimension_numbers<[1], [0], [0], [1], [0, 0, 1, 1], [], []>} : vector<2x128xbf16>, vector<128x512xbf16>, vector<2x512xf32> -> vector<2x512xf32>
    %82 = vector.extract_strided_slice %23 {offsets = [0, 2, 0], sizes = [2, 1, 512], strides = [1, 1, 1]} : vector<2x8x512xf32> to vector<2x1x512xf32>
    %83 = vector.shape_cast %82 : vector<2x1x512xf32> to vector<2x512xf32>
    %84 = vector.extract_strided_slice %23 {offsets = [0, 5, 0], sizes = [2, 1, 512], strides = [1, 1, 1]} : vector<2x8x512xf32> to vector<2x1x512xf32>
    %85 = vector.shape_cast %84 : vector<2x1x512xf32> to vector<2x512xf32>
    %86 = vector.shape_cast %2 : vector<1x512xi1> to vector<1x512xi1>
    %87 = vector.broadcast %86 : vector<1x512xi1> to vector<2x512xi1>
    %88 = arith.select %87, %83, %85 : vector<2x512xi1>, vector<2x512xf32>
    %89 = arith.addf %81, %88 : vector<2x512xf32>
    %90 = vector.extract_strided_slice %89 {offsets = [0, 0], sizes = [2, 384], strides = [1, 1]} : vector<2x512xf32> to vector<2x384xf32>
    %91 = arith.negf %90 : vector<2x384xf32>
    %92 = math.exp %91 : vector<2x384xf32>
    %cst_16 = arith.constant 1.000000e+00 : f32
    %93 = vector.broadcast %cst_16 : f32 to vector<2x384xf32>
    %94 = arith.addf %93, %92 : vector<2x384xf32>
    %95 = arith.divf %93, %94 : vector<2x384xf32>
    %96 = vector.extract_strided_slice %89 {offsets = [0, 384], sizes = [2, 128], strides = [1, 1]} : vector<2x512xf32> to vector<2x128xf32>
    %97 = math.tanh %96 : vector<2x128xf32>
    %98 = vector.extract_strided_slice %95 {offsets = [0, 128], sizes = [2, 128], strides = [1, 1]} : vector<2x384xf32> to vector<2x128xf32>
    %99 = arith.mulf %98, %76 : vector<2x128xf32>
    %100 = vector.extract_strided_slice %95 {offsets = [0, 0], sizes = [2, 128], strides = [1, 1]} : vector<2x384xf32> to vector<2x128xf32>
    %101 = arith.mulf %100, %97 : vector<2x128xf32>
    %102 = arith.addf %99, %101 : vector<2x128xf32>
    %103 = vector.extract_strided_slice %95 {offsets = [0, 256], sizes = [2, 128], strides = [1, 1]} : vector<2x384xf32> to vector<2x128xf32>
    %104 = math.tanh %102 : vector<2x128xf32>
    %105 = arith.mulf %103, %104 : vector<2x128xf32>
    %106 = arith.truncf %105 : vector<2x128xf32> to vector<2x128xbf16>
    %cst_17 = arith.constant dense<0.000000e+00> : vector<2x512xf32>
    %107 = tpu.matmul %106, %25, %cst_17 {dimension_numbers = #tpu.dot_dimension_numbers<[1], [0], [0], [1], [0, 0, 1, 1], [], []>} : vector<2x128xbf16>, vector<128x512xbf16>, vector<2x512xf32> -> vector<2x512xf32>
    %108 = vector.extract_strided_slice %23 {offsets = [0, 3, 0], sizes = [2, 1, 512], strides = [1, 1, 1]} : vector<2x8x512xf32> to vector<2x1x512xf32>
    %109 = vector.shape_cast %108 : vector<2x1x512xf32> to vector<2x512xf32>
    %110 = vector.extract_strided_slice %23 {offsets = [0, 4, 0], sizes = [2, 1, 512], strides = [1, 1, 1]} : vector<2x8x512xf32> to vector<2x1x512xf32>
    %111 = vector.shape_cast %110 : vector<2x1x512xf32> to vector<2x512xf32>
    %112 = vector.shape_cast %2 : vector<1x512xi1> to vector<1x512xi1>
    %113 = vector.broadcast %112 : vector<1x512xi1> to vector<2x512xi1>
    %114 = arith.select %113, %109, %111 : vector<2x512xi1>, vector<2x512xf32>
    %115 = arith.addf %107, %114 : vector<2x512xf32>
    %116 = vector.extract_strided_slice %115 {offsets = [0, 0], sizes = [2, 384], strides = [1, 1]} : vector<2x512xf32> to vector<2x384xf32>
    %117 = arith.negf %116 : vector<2x384xf32>
    %118 = math.exp %117 : vector<2x384xf32>
    %cst_18 = arith.constant 1.000000e+00 : f32
    %119 = vector.broadcast %cst_18 : f32 to vector<2x384xf32>
    %120 = arith.addf %119, %118 : vector<2x384xf32>
    %121 = arith.divf %119, %120 : vector<2x384xf32>
    %122 = vector.extract_strided_slice %115 {offsets = [0, 384], sizes = [2, 128], strides = [1, 1]} : vector<2x512xf32> to vector<2x128xf32>
    %123 = math.tanh %122 : vector<2x128xf32>
    %124 = vector.extract_strided_slice %121 {offsets = [0, 128], sizes = [2, 128], strides = [1, 1]} : vector<2x384xf32> to vector<2x128xf32>
    %125 = arith.mulf %124, %102 : vector<2x128xf32>
    %126 = vector.extract_strided_slice %121 {offsets = [0, 0], sizes = [2, 128], strides = [1, 1]} : vector<2x384xf32> to vector<2x128xf32>
    %127 = arith.mulf %126, %123 : vector<2x128xf32>
    %128 = arith.addf %125, %127 : vector<2x128xf32>
    %129 = vector.extract_strided_slice %121 {offsets = [0, 256], sizes = [2, 128], strides = [1, 1]} : vector<2x384xf32> to vector<2x128xf32>
    %130 = math.tanh %128 : vector<2x128xf32>
    %131 = arith.mulf %129, %130 : vector<2x128xf32>
    %132 = arith.truncf %131 : vector<2x128xf32> to vector<2x128xbf16>
    %cst_19 = arith.constant dense<0.000000e+00> : vector<2x512xf32>
    %133 = tpu.matmul %132, %25, %cst_19 {dimension_numbers = #tpu.dot_dimension_numbers<[1], [0], [0], [1], [0, 0, 1, 1], [], []>} : vector<2x128xbf16>, vector<128x512xbf16>, vector<2x512xf32> -> vector<2x512xf32>
    %134 = vector.extract_strided_slice %23 {offsets = [0, 4, 0], sizes = [2, 1, 512], strides = [1, 1, 1]} : vector<2x8x512xf32> to vector<2x1x512xf32>
    %135 = vector.shape_cast %134 : vector<2x1x512xf32> to vector<2x512xf32>
    %136 = vector.extract_strided_slice %23 {offsets = [0, 3, 0], sizes = [2, 1, 512], strides = [1, 1, 1]} : vector<2x8x512xf32> to vector<2x1x512xf32>
    %137 = vector.shape_cast %136 : vector<2x1x512xf32> to vector<2x512xf32>
    %138 = vector.shape_cast %2 : vector<1x512xi1> to vector<1x512xi1>
    %139 = vector.broadcast %138 : vector<1x512xi1> to vector<2x512xi1>
    %140 = arith.select %139, %135, %137 : vector<2x512xi1>, vector<2x512xf32>
    %141 = arith.addf %133, %140 : vector<2x512xf32>
    %142 = vector.extract_strided_slice %141 {offsets = [0, 0], sizes = [2, 384], strides = [1, 1]} : vector<2x512xf32> to vector<2x384xf32>
    %143 = arith.negf %142 : vector<2x384xf32>
    %144 = math.exp %143 : vector<2x384xf32>
    %cst_20 = arith.constant 1.000000e+00 : f32
    %145 = vector.broadcast %cst_20 : f32 to vector<2x384xf32>
    %146 = arith.addf %145, %144 : vector<2x384xf32>
    %147 = arith.divf %145, %146 : vector<2x384xf32>
    %148 = vector.extract_strided_slice %141 {offsets = [0, 384], sizes = [2, 128], strides = [1, 1]} : vector<2x512xf32> to vector<2x128xf32>
    %149 = math.tanh %148 : vector<2x128xf32>
    %150 = vector.extract_strided_slice %147 {offsets = [0, 128], sizes = [2, 128], strides = [1, 1]} : vector<2x384xf32> to vector<2x128xf32>
    %151 = arith.mulf %150, %128 : vector<2x128xf32>
    %152 = vector.extract_strided_slice %147 {offsets = [0, 0], sizes = [2, 128], strides = [1, 1]} : vector<2x384xf32> to vector<2x128xf32>
    %153 = arith.mulf %152, %149 : vector<2x128xf32>
    %154 = arith.addf %151, %153 : vector<2x128xf32>
    %155 = vector.extract_strided_slice %147 {offsets = [0, 256], sizes = [2, 128], strides = [1, 1]} : vector<2x384xf32> to vector<2x128xf32>
    %156 = math.tanh %154 : vector<2x128xf32>
    %157 = arith.mulf %155, %156 : vector<2x128xf32>
    %158 = arith.truncf %157 : vector<2x128xf32> to vector<2x128xbf16>
    %cst_21 = arith.constant dense<0.000000e+00> : vector<2x512xf32>
    %159 = tpu.matmul %158, %25, %cst_21 {dimension_numbers = #tpu.dot_dimension_numbers<[1], [0], [0], [1], [0, 0, 1, 1], [], []>} : vector<2x128xbf16>, vector<128x512xbf16>, vector<2x512xf32> -> vector<2x512xf32>
    %160 = vector.extract_strided_slice %23 {offsets = [0, 5, 0], sizes = [2, 1, 512], strides = [1, 1, 1]} : vector<2x8x512xf32> to vector<2x1x512xf32>
    %161 = vector.shape_cast %160 : vector<2x1x512xf32> to vector<2x512xf32>
    %162 = vector.extract_strided_slice %23 {offsets = [0, 2, 0], sizes = [2, 1, 512], strides = [1, 1, 1]} : vector<2x8x512xf32> to vector<2x1x512xf32>
    %163 = vector.shape_cast %162 : vector<2x1x512xf32> to vector<2x512xf32>
    %164 = vector.shape_cast %2 : vector<1x512xi1> to vector<1x512xi1>
    %165 = vector.broadcast %164 : vector<1x512xi1> to vector<2x512xi1>
    %166 = arith.select %165, %161, %163 : vector<2x512xi1>, vector<2x512xf32>
    %167 = arith.addf %159, %166 : vector<2x512xf32>
    %168 = vector.extract_strided_slice %167 {offsets = [0, 0], sizes = [2, 384], strides = [1, 1]} : vector<2x512xf32> to vector<2x384xf32>
    %169 = arith.negf %168 : vector<2x384xf32>
    %170 = math.exp %169 : vector<2x384xf32>
    %cst_22 = arith.constant 1.000000e+00 : f32
    %171 = vector.broadcast %cst_22 : f32 to vector<2x384xf32>
    %172 = arith.addf %171, %170 : vector<2x384xf32>
    %173 = arith.divf %171, %172 : vector<2x384xf32>
    %174 = vector.extract_strided_slice %167 {offsets = [0, 384], sizes = [2, 128], strides = [1, 1]} : vector<2x512xf32> to vector<2x128xf32>
    %175 = math.tanh %174 : vector<2x128xf32>
    %176 = vector.extract_strided_slice %173 {offsets = [0, 128], sizes = [2, 128], strides = [1, 1]} : vector<2x384xf32> to vector<2x128xf32>
    %177 = arith.mulf %176, %154 : vector<2x128xf32>
    %178 = vector.extract_strided_slice %173 {offsets = [0, 0], sizes = [2, 128], strides = [1, 1]} : vector<2x384xf32> to vector<2x128xf32>
    %179 = arith.mulf %178, %175 : vector<2x128xf32>
    %180 = arith.addf %177, %179 : vector<2x128xf32>
    %181 = vector.extract_strided_slice %173 {offsets = [0, 256], sizes = [2, 128], strides = [1, 1]} : vector<2x384xf32> to vector<2x128xf32>
    %182 = math.tanh %180 : vector<2x128xf32>
    %183 = arith.mulf %181, %182 : vector<2x128xf32>
    %184 = arith.truncf %183 : vector<2x128xf32> to vector<2x128xbf16>
    %cst_23 = arith.constant dense<0.000000e+00> : vector<2x512xf32>
    %185 = tpu.matmul %184, %25, %cst_23 {dimension_numbers = #tpu.dot_dimension_numbers<[1], [0], [0], [1], [0, 0, 1, 1], [], []>} : vector<2x128xbf16>, vector<128x512xbf16>, vector<2x512xf32> -> vector<2x512xf32>
    %186 = vector.extract_strided_slice %23 {offsets = [0, 6, 0], sizes = [2, 1, 512], strides = [1, 1, 1]} : vector<2x8x512xf32> to vector<2x1x512xf32>
    %187 = vector.shape_cast %186 : vector<2x1x512xf32> to vector<2x512xf32>
    %188 = vector.extract_strided_slice %23 {offsets = [0, 1, 0], sizes = [2, 1, 512], strides = [1, 1, 1]} : vector<2x8x512xf32> to vector<2x1x512xf32>
    %189 = vector.shape_cast %188 : vector<2x1x512xf32> to vector<2x512xf32>
    %190 = vector.shape_cast %2 : vector<1x512xi1> to vector<1x512xi1>
    %191 = vector.broadcast %190 : vector<1x512xi1> to vector<2x512xi1>
    %192 = arith.select %191, %187, %189 : vector<2x512xi1>, vector<2x512xf32>
    %193 = arith.addf %185, %192 : vector<2x512xf32>
    %194 = vector.extract_strided_slice %193 {offsets = [0, 0], sizes = [2, 384], strides = [1, 1]} : vector<2x512xf32> to vector<2x384xf32>
    %195 = arith.negf %194 : vector<2x384xf32>
    %196 = math.exp %195 : vector<2x384xf32>
    %cst_24 = arith.constant 1.000000e+00 : f32
    %197 = vector.broadcast %cst_24 : f32 to vector<2x384xf32>
    %198 = arith.addf %197, %196 : vector<2x384xf32>
    %199 = arith.divf %197, %198 : vector<2x384xf32>
    %200 = vector.extract_strided_slice %193 {offsets = [0, 384], sizes = [2, 128], strides = [1, 1]} : vector<2x512xf32> to vector<2x128xf32>
    %201 = math.tanh %200 : vector<2x128xf32>
    %202 = vector.extract_strided_slice %199 {offsets = [0, 128], sizes = [2, 128], strides = [1, 1]} : vector<2x384xf32> to vector<2x128xf32>
    %203 = arith.mulf %202, %180 : vector<2x128xf32>
    %204 = vector.extract_strided_slice %199 {offsets = [0, 0], sizes = [2, 128], strides = [1, 1]} : vector<2x384xf32> to vector<2x128xf32>
    %205 = arith.mulf %204, %201 : vector<2x128xf32>
    %206 = arith.addf %203, %205 : vector<2x128xf32>
    %207 = vector.extract_strided_slice %199 {offsets = [0, 256], sizes = [2, 128], strides = [1, 1]} : vector<2x384xf32> to vector<2x128xf32>
    %208 = math.tanh %206 : vector<2x128xf32>
    %209 = arith.mulf %207, %208 : vector<2x128xf32>
    %210 = arith.truncf %209 : vector<2x128xf32> to vector<2x128xbf16>
    %cst_25 = arith.constant dense<0.000000e+00> : vector<2x512xf32>
    %211 = tpu.matmul %210, %25, %cst_25 {dimension_numbers = #tpu.dot_dimension_numbers<[1], [0], [0], [1], [0, 0, 1, 1], [], []>} : vector<2x128xbf16>, vector<128x512xbf16>, vector<2x512xf32> -> vector<2x512xf32>
    %212 = vector.extract_strided_slice %23 {offsets = [0, 7, 0], sizes = [2, 1, 512], strides = [1, 1, 1]} : vector<2x8x512xf32> to vector<2x1x512xf32>
    %213 = vector.shape_cast %212 : vector<2x1x512xf32> to vector<2x512xf32>
    %214 = vector.extract_strided_slice %23 {offsets = [0, 0, 0], sizes = [2, 1, 512], strides = [1, 1, 1]} : vector<2x8x512xf32> to vector<2x1x512xf32>
    %215 = vector.shape_cast %214 : vector<2x1x512xf32> to vector<2x512xf32>
    %216 = vector.shape_cast %2 : vector<1x512xi1> to vector<1x512xi1>
    %217 = vector.broadcast %216 : vector<1x512xi1> to vector<2x512xi1>
    %218 = arith.select %217, %213, %215 : vector<2x512xi1>, vector<2x512xf32>
    %219 = arith.addf %211, %218 : vector<2x512xf32>
    %220 = vector.extract_strided_slice %219 {offsets = [0, 0], sizes = [2, 384], strides = [1, 1]} : vector<2x512xf32> to vector<2x384xf32>
    %221 = arith.negf %220 : vector<2x384xf32>
    %222 = math.exp %221 : vector<2x384xf32>
    %cst_26 = arith.constant 1.000000e+00 : f32
    %223 = vector.broadcast %cst_26 : f32 to vector<2x384xf32>
    %224 = arith.addf %223, %222 : vector<2x384xf32>
    %225 = arith.divf %223, %224 : vector<2x384xf32>
    %226 = vector.extract_strided_slice %219 {offsets = [0, 384], sizes = [2, 128], strides = [1, 1]} : vector<2x512xf32> to vector<2x128xf32>
    %227 = math.tanh %226 : vector<2x128xf32>
    %228 = vector.extract_strided_slice %225 {offsets = [0, 128], sizes = [2, 128], strides = [1, 1]} : vector<2x384xf32> to vector<2x128xf32>
    %229 = arith.mulf %228, %206 : vector<2x128xf32>
    %230 = vector.extract_strided_slice %225 {offsets = [0, 0], sizes = [2, 128], strides = [1, 1]} : vector<2x384xf32> to vector<2x128xf32>
    %231 = arith.mulf %230, %227 : vector<2x128xf32>
    %232 = arith.addf %229, %231 : vector<2x128xf32>
    %233 = vector.extract_strided_slice %225 {offsets = [0, 256], sizes = [2, 128], strides = [1, 1]} : vector<2x384xf32> to vector<2x128xf32>
    %234 = math.tanh %232 : vector<2x128xf32>
    %235 = arith.mulf %233, %234 : vector<2x128xf32>
    %236 = vector.shape_cast %3 : vector<1x128xi1> to vector<1x128xi1>
    %237 = vector.broadcast %236 : vector<1x128xi1> to vector<2x128xi1>
    %238 = arith.select %237, %53, %235 : vector<2x128xi1>, vector<2x128xf32>
    %239 = vector.shape_cast %3 : vector<1x128xi1> to vector<1x128xi1>
    %240 = vector.broadcast %239 : vector<1x128xi1> to vector<2x128xi1>
    %241 = arith.select %240, %79, %209 : vector<2x128xi1>, vector<2x128xf32>
    %242 = vector.shape_cast %3 : vector<1x128xi1> to vector<1x128xi1>
    %243 = vector.broadcast %242 : vector<1x128xi1> to vector<2x128xi1>
    %244 = arith.select %243, %105, %183 : vector<2x128xi1>, vector<2x128xf32>
    %245 = vector.shape_cast %3 : vector<1x128xi1> to vector<1x128xi1>
    %246 = vector.broadcast %245 : vector<1x128xi1> to vector<2x128xi1>
    %247 = arith.select %246, %131, %157 : vector<2x128xi1>, vector<2x128xf32>
    %248 = vector.shape_cast %3 : vector<1x128xi1> to vector<1x128xi1>
    %249 = vector.broadcast %248 : vector<1x128xi1> to vector<2x128xi1>
    %250 = arith.select %249, %157, %131 : vector<2x128xi1>, vector<2x128xf32>
    %251 = vector.shape_cast %3 : vector<1x128xi1> to vector<1x128xi1>
    %252 = vector.broadcast %251 : vector<1x128xi1> to vector<2x128xi1>
    %253 = arith.select %252, %183, %105 : vector<2x128xi1>, vector<2x128xf32>
    %254 = vector.shape_cast %3 : vector<1x128xi1> to vector<1x128xi1>
    %255 = vector.broadcast %254 : vector<1x128xi1> to vector<2x128xi1>
    %256 = arith.select %255, %209, %79 : vector<2x128xi1>, vector<2x128xf32>
    %257 = vector.shape_cast %3 : vector<1x128xi1> to vector<1x128xi1>
    %258 = vector.broadcast %257 : vector<1x128xi1> to vector<2x128xi1>
    %259 = arith.select %258, %235, %53 : vector<2x128xi1>, vector<2x128xf32>
    %260 = vector.shape_cast %238 : vector<2x128xf32> to vector<2x1x128xf32>
    %261 = vector.shape_cast %241 : vector<2x128xf32> to vector<2x1x128xf32>
    %262 = vector.shape_cast %244 : vector<2x128xf32> to vector<2x1x128xf32>
    %263 = vector.shape_cast %247 : vector<2x128xf32> to vector<2x1x128xf32>
    %264 = vector.shape_cast %250 : vector<2x128xf32> to vector<2x1x128xf32>
    %265 = vector.shape_cast %253 : vector<2x128xf32> to vector<2x1x128xf32>
    %266 = vector.shape_cast %256 : vector<2x128xf32> to vector<2x1x128xf32>
    %267 = vector.shape_cast %259 : vector<2x128xf32> to vector<2x1x128xf32>
    %268 = tpu.concatenate %260, %261, %262, %263, %264, %265, %266, %267 in 1 : vector<2x1x128xf32>, vector<2x1x128xf32>, vector<2x1x128xf32>, vector<2x1x128xf32>, vector<2x1x128xf32>, vector<2x1x128xf32>, vector<2x1x128xf32>, vector<2x1x128xf32> -> vector<2x8x128xf32>
    %c336 = arith.constant 336 : index
    %c0_27 = arith.constant 0 : index
    %269 = vector.load %arg5[%c336, %c0_27] : memref<472x512xf32, #tpu.memory_space<vmem>>, vector<128x512xf32>
    %c464 = arith.constant 464 : index
    %c0_28 = arith.constant 0 : index
    %270 = vector.load %arg5[%c464, %c0_28] : memref<472x512xf32, #tpu.memory_space<vmem>>, vector<1x512xf32>
    "tpu.trace_start"() <{level = 10 : i32, message = "btd,dg->btg"}> : () -> ()
    %cst_29 = arith.constant dense<0.000000e+00> : vector<2x8x512xf32>
    %271 = tpu.matmul %268, %269, %cst_29 {dimension_numbers = #tpu.dot_dimension_numbers<[2], [0], [0, 1], [1], [0, 0, 0, 1, 1, 1], [], []>} : vector<2x8x128xf32>, vector<128x512xf32>, vector<2x8x512xf32> -> vector<2x8x512xf32>
    "tpu.trace_stop"() : () -> ()
    %272 = vector.shape_cast %270 : vector<1x512xf32> to vector<1x1x512xf32>
    %273 = vector.broadcast %272 : vector<1x1x512xf32> to vector<2x8x512xf32>
    %274 = arith.addf %271, %273 : vector<2x8x512xf32>
    %c208 = arith.constant 208 : index
    %c0_30 = arith.constant 0 : index
    %275 = vector.load %arg5[%c208, %c0_30] : memref<472x512xf32, #tpu.memory_space<vmem>>, vector<128x512xf32>
    %276 = arith.truncf %275 : vector<128x512xf32> to vector<128x512xbf16>
    %cst_31 = arith.constant 0.000000e+00 : f32
    %277 = vector.broadcast %cst_31 : f32 to vector<2x128xf32>
    %cst_32 = arith.constant 0.000000e+00 : f32
    %278 = vector.broadcast %cst_32 : f32 to vector<2x128xf32>
    %279 = arith.truncf %277 : vector<2x128xf32> to vector<2x128xbf16>
    %cst_33 = arith.constant dense<0.000000e+00> : vector<2x512xf32>
    %280 = tpu.matmul %279, %276, %cst_33 {dimension_numbers = #tpu.dot_dimension_numbers<[1], [0], [0], [1], [0, 0, 1, 1], [], []>} : vector<2x128xbf16>, vector<128x512xbf16>, vector<2x512xf32> -> vector<2x512xf32>
    %281 = vector.extract_strided_slice %274 {offsets = [0, 0, 0], sizes = [2, 1, 512], strides = [1, 1, 1]} : vector<2x8x512xf32> to vector<2x1x512xf32>
    %282 = vector.shape_cast %281 : vector<2x1x512xf32> to vector<2x512xf32>
    %283 = vector.extract_strided_slice %274 {offsets = [0, 7, 0], sizes = [2, 1, 512], strides = [1, 1, 1]} : vector<2x8x512xf32> to vector<2x1x512xf32>
    %284 = vector.shape_cast %283 : vector<2x1x512xf32> to vector<2x512xf32>
    %285 = vector.shape_cast %2 : vector<1x512xi1> to vector<1x512xi1>
    %286 = vector.broadcast %285 : vector<1x512xi1> to vector<2x512xi1>
    %287 = arith.select %286, %282, %284 : vector<2x512xi1>, vector<2x512xf32>
    %288 = arith.addf %280, %287 : vector<2x512xf32>
    %289 = vector.extract_strided_slice %288 {offsets = [0, 0], sizes = [2, 384], strides = [1, 1]} : vector<2x512xf32> to vector<2x384xf32>
    %290 = arith.negf %289 : vector<2x384xf32>
    %291 = math.exp %290 : vector<2x384xf32>
    %cst_34 = arith.constant 1.000000e+00 : f32
    %292 = vector.broadcast %cst_34 : f32 to vector<2x384xf32>
    %293 = arith.addf %292, %291 : vector<2x384xf32>
    %294 = arith.divf %292, %293 : vector<2x384xf32>
    %295 = vector.extract_strided_slice %288 {offsets = [0, 384], sizes = [2, 128], strides = [1, 1]} : vector<2x512xf32> to vector<2x128xf32>
    %296 = math.tanh %295 : vector<2x128xf32>
    %297 = vector.extract_strided_slice %294 {offsets = [0, 128], sizes = [2, 128], strides = [1, 1]} : vector<2x384xf32> to vector<2x128xf32>
    %298 = arith.mulf %297, %278 : vector<2x128xf32>
    %299 = vector.extract_strided_slice %294 {offsets = [0, 0], sizes = [2, 128], strides = [1, 1]} : vector<2x384xf32> to vector<2x128xf32>
    %300 = arith.mulf %299, %296 : vector<2x128xf32>
    %301 = arith.addf %298, %300 : vector<2x128xf32>
    %302 = vector.extract_strided_slice %294 {offsets = [0, 256], sizes = [2, 128], strides = [1, 1]} : vector<2x384xf32> to vector<2x128xf32>
    %303 = math.tanh %301 : vector<2x128xf32>
    %304 = arith.mulf %302, %303 : vector<2x128xf32>
    %305 = arith.truncf %304 : vector<2x128xf32> to vector<2x128xbf16>
    %cst_35 = arith.constant dense<0.000000e+00> : vector<2x512xf32>
    %306 = tpu.matmul %305, %276, %cst_35 {dimension_numbers = #tpu.dot_dimension_numbers<[1], [0], [0], [1], [0, 0, 1, 1], [], []>} : vector<2x128xbf16>, vector<128x512xbf16>, vector<2x512xf32> -> vector<2x512xf32>
    %307 = vector.extract_strided_slice %274 {offsets = [0, 1, 0], sizes = [2, 1, 512], strides = [1, 1, 1]} : vector<2x8x512xf32> to vector<2x1x512xf32>
    %308 = vector.shape_cast %307 : vector<2x1x512xf32> to vector<2x512xf32>
    %309 = vector.extract_strided_slice %274 {offsets = [0, 6, 0], sizes = [2, 1, 512], strides = [1, 1, 1]} : vector<2x8x512xf32> to vector<2x1x512xf32>
    %310 = vector.shape_cast %309 : vector<2x1x512xf32> to vector<2x512xf32>
    %311 = vector.shape_cast %2 : vector<1x512xi1> to vector<1x512xi1>
    %312 = vector.broadcast %311 : vector<1x512xi1> to vector<2x512xi1>
    %313 = arith.select %312, %308, %310 : vector<2x512xi1>, vector<2x512xf32>
    %314 = arith.addf %306, %313 : vector<2x512xf32>
    %315 = vector.extract_strided_slice %314 {offsets = [0, 0], sizes = [2, 384], strides = [1, 1]} : vector<2x512xf32> to vector<2x384xf32>
    %316 = arith.negf %315 : vector<2x384xf32>
    %317 = math.exp %316 : vector<2x384xf32>
    %cst_36 = arith.constant 1.000000e+00 : f32
    %318 = vector.broadcast %cst_36 : f32 to vector<2x384xf32>
    %319 = arith.addf %318, %317 : vector<2x384xf32>
    %320 = arith.divf %318, %319 : vector<2x384xf32>
    %321 = vector.extract_strided_slice %314 {offsets = [0, 384], sizes = [2, 128], strides = [1, 1]} : vector<2x512xf32> to vector<2x128xf32>
    %322 = math.tanh %321 : vector<2x128xf32>
    %323 = vector.extract_strided_slice %320 {offsets = [0, 128], sizes = [2, 128], strides = [1, 1]} : vector<2x384xf32> to vector<2x128xf32>
    %324 = arith.mulf %323, %301 : vector<2x128xf32>
    %325 = vector.extract_strided_slice %320 {offsets = [0, 0], sizes = [2, 128], strides = [1, 1]} : vector<2x384xf32> to vector<2x128xf32>
    %326 = arith.mulf %325, %322 : vector<2x128xf32>
    %327 = arith.addf %324, %326 : vector<2x128xf32>
    %328 = vector.extract_strided_slice %320 {offsets = [0, 256], sizes = [2, 128], strides = [1, 1]} : vector<2x384xf32> to vector<2x128xf32>
    %329 = math.tanh %327 : vector<2x128xf32>
    %330 = arith.mulf %328, %329 : vector<2x128xf32>
    %331 = arith.truncf %330 : vector<2x128xf32> to vector<2x128xbf16>
    %cst_37 = arith.constant dense<0.000000e+00> : vector<2x512xf32>
    %332 = tpu.matmul %331, %276, %cst_37 {dimension_numbers = #tpu.dot_dimension_numbers<[1], [0], [0], [1], [0, 0, 1, 1], [], []>} : vector<2x128xbf16>, vector<128x512xbf16>, vector<2x512xf32> -> vector<2x512xf32>
    %333 = vector.extract_strided_slice %274 {offsets = [0, 2, 0], sizes = [2, 1, 512], strides = [1, 1, 1]} : vector<2x8x512xf32> to vector<2x1x512xf32>
    %334 = vector.shape_cast %333 : vector<2x1x512xf32> to vector<2x512xf32>
    %335 = vector.extract_strided_slice %274 {offsets = [0, 5, 0], sizes = [2, 1, 512], strides = [1, 1, 1]} : vector<2x8x512xf32> to vector<2x1x512xf32>
    %336 = vector.shape_cast %335 : vector<2x1x512xf32> to vector<2x512xf32>
    %337 = vector.shape_cast %2 : vector<1x512xi1> to vector<1x512xi1>
    %338 = vector.broadcast %337 : vector<1x512xi1> to vector<2x512xi1>
    %339 = arith.select %338, %334, %336 : vector<2x512xi1>, vector<2x512xf32>
    %340 = arith.addf %332, %339 : vector<2x512xf32>
    %341 = vector.extract_strided_slice %340 {offsets = [0, 0], sizes = [2, 384], strides = [1, 1]} : vector<2x512xf32> to vector<2x384xf32>
    %342 = arith.negf %341 : vector<2x384xf32>
    %343 = math.exp %342 : vector<2x384xf32>
    %cst_38 = arith.constant 1.000000e+00 : f32
    %344 = vector.broadcast %cst_38 : f32 to vector<2x384xf32>
    %345 = arith.addf %344, %343 : vector<2x384xf32>
    %346 = arith.divf %344, %345 : vector<2x384xf32>
    %347 = vector.extract_strided_slice %340 {offsets = [0, 384], sizes = [2, 128], strides = [1, 1]} : vector<2x512xf32> to vector<2x128xf32>
    %348 = math.tanh %347 : vector<2x128xf32>
    %349 = vector.extract_strided_slice %346 {offsets = [0, 128], sizes = [2, 128], strides = [1, 1]} : vector<2x384xf32> to vector<2x128xf32>
    %350 = arith.mulf %349, %327 : vector<2x128xf32>
    %351 = vector.extract_strided_slice %346 {offsets = [0, 0], sizes = [2, 128], strides = [1, 1]} : vector<2x384xf32> to vector<2x128xf32>
    %352 = arith.mulf %351, %348 : vector<2x128xf32>
    %353 = arith.addf %350, %352 : vector<2x128xf32>
    %354 = vector.extract_strided_slice %346 {offsets = [0, 256], sizes = [2, 128], strides = [1, 1]} : vector<2x384xf32> to vector<2x128xf32>
    %355 = math.tanh %353 : vector<2x128xf32>
    %356 = arith.mulf %354, %355 : vector<2x128xf32>
    %357 = arith.truncf %356 : vector<2x128xf32> to vector<2x128xbf16>
    %cst_39 = arith.constant dense<0.000000e+00> : vector<2x512xf32>
    %358 = tpu.matmul %357, %276, %cst_39 {dimension_numbers = #tpu.dot_dimension_numbers<[1], [0], [0], [1], [0, 0, 1, 1], [], []>} : vector<2x128xbf16>, vector<128x512xbf16>, vector<2x512xf32> -> vector<2x512xf32>
    %359 = vector.extract_strided_slice %274 {offsets = [0, 3, 0], sizes = [2, 1, 512], strides = [1, 1, 1]} : vector<2x8x512xf32> to vector<2x1x512xf32>
    %360 = vector.shape_cast %359 : vector<2x1x512xf32> to vector<2x512xf32>
    %361 = vector.extract_strided_slice %274 {offsets = [0, 4, 0], sizes = [2, 1, 512], strides = [1, 1, 1]} : vector<2x8x512xf32> to vector<2x1x512xf32>
    %362 = vector.shape_cast %361 : vector<2x1x512xf32> to vector<2x512xf32>
    %363 = vector.shape_cast %2 : vector<1x512xi1> to vector<1x512xi1>
    %364 = vector.broadcast %363 : vector<1x512xi1> to vector<2x512xi1>
    %365 = arith.select %364, %360, %362 : vector<2x512xi1>, vector<2x512xf32>
    %366 = arith.addf %358, %365 : vector<2x512xf32>
    %367 = vector.extract_strided_slice %366 {offsets = [0, 0], sizes = [2, 384], strides = [1, 1]} : vector<2x512xf32> to vector<2x384xf32>
    %368 = arith.negf %367 : vector<2x384xf32>
    %369 = math.exp %368 : vector<2x384xf32>
    %cst_40 = arith.constant 1.000000e+00 : f32
    %370 = vector.broadcast %cst_40 : f32 to vector<2x384xf32>
    %371 = arith.addf %370, %369 : vector<2x384xf32>
    %372 = arith.divf %370, %371 : vector<2x384xf32>
    %373 = vector.extract_strided_slice %366 {offsets = [0, 384], sizes = [2, 128], strides = [1, 1]} : vector<2x512xf32> to vector<2x128xf32>
    %374 = math.tanh %373 : vector<2x128xf32>
    %375 = vector.extract_strided_slice %372 {offsets = [0, 128], sizes = [2, 128], strides = [1, 1]} : vector<2x384xf32> to vector<2x128xf32>
    %376 = arith.mulf %375, %353 : vector<2x128xf32>
    %377 = vector.extract_strided_slice %372 {offsets = [0, 0], sizes = [2, 128], strides = [1, 1]} : vector<2x384xf32> to vector<2x128xf32>
    %378 = arith.mulf %377, %374 : vector<2x128xf32>
    %379 = arith.addf %376, %378 : vector<2x128xf32>
    %380 = vector.extract_strided_slice %372 {offsets = [0, 256], sizes = [2, 128], strides = [1, 1]} : vector<2x384xf32> to vector<2x128xf32>
    %381 = math.tanh %379 : vector<2x128xf32>
    %382 = arith.mulf %380, %381 : vector<2x128xf32>
    %383 = arith.truncf %382 : vector<2x128xf32> to vector<2x128xbf16>
    %cst_41 = arith.constant dense<0.000000e+00> : vector<2x512xf32>
    %384 = tpu.matmul %383, %276, %cst_41 {dimension_numbers = #tpu.dot_dimension_numbers<[1], [0], [0], [1], [0, 0, 1, 1], [], []>} : vector<2x128xbf16>, vector<128x512xbf16>, vector<2x512xf32> -> vector<2x512xf32>
    %385 = vector.extract_strided_slice %274 {offsets = [0, 4, 0], sizes = [2, 1, 512], strides = [1, 1, 1]} : vector<2x8x512xf32> to vector<2x1x512xf32>
    %386 = vector.shape_cast %385 : vector<2x1x512xf32> to vector<2x512xf32>
    %387 = vector.extract_strided_slice %274 {offsets = [0, 3, 0], sizes = [2, 1, 512], strides = [1, 1, 1]} : vector<2x8x512xf32> to vector<2x1x512xf32>
    %388 = vector.shape_cast %387 : vector<2x1x512xf32> to vector<2x512xf32>
    %389 = vector.shape_cast %2 : vector<1x512xi1> to vector<1x512xi1>
    %390 = vector.broadcast %389 : vector<1x512xi1> to vector<2x512xi1>
    %391 = arith.select %390, %386, %388 : vector<2x512xi1>, vector<2x512xf32>
    %392 = arith.addf %384, %391 : vector<2x512xf32>
    %393 = vector.extract_strided_slice %392 {offsets = [0, 0], sizes = [2, 384], strides = [1, 1]} : vector<2x512xf32> to vector<2x384xf32>
    %394 = arith.negf %393 : vector<2x384xf32>
    %395 = math.exp %394 : vector<2x384xf32>
    %cst_42 = arith.constant 1.000000e+00 : f32
    %396 = vector.broadcast %cst_42 : f32 to vector<2x384xf32>
    %397 = arith.addf %396, %395 : vector<2x384xf32>
    %398 = arith.divf %396, %397 : vector<2x384xf32>
    %399 = vector.extract_strided_slice %392 {offsets = [0, 384], sizes = [2, 128], strides = [1, 1]} : vector<2x512xf32> to vector<2x128xf32>
    %400 = math.tanh %399 : vector<2x128xf32>
    %401 = vector.extract_strided_slice %398 {offsets = [0, 128], sizes = [2, 128], strides = [1, 1]} : vector<2x384xf32> to vector<2x128xf32>
    %402 = arith.mulf %401, %379 : vector<2x128xf32>
    %403 = vector.extract_strided_slice %398 {offsets = [0, 0], sizes = [2, 128], strides = [1, 1]} : vector<2x384xf32> to vector<2x128xf32>
    %404 = arith.mulf %403, %400 : vector<2x128xf32>
    %405 = arith.addf %402, %404 : vector<2x128xf32>
    %406 = vector.extract_strided_slice %398 {offsets = [0, 256], sizes = [2, 128], strides = [1, 1]} : vector<2x384xf32> to vector<2x128xf32>
    %407 = math.tanh %405 : vector<2x128xf32>
    %408 = arith.mulf %406, %407 : vector<2x128xf32>
    %409 = arith.truncf %408 : vector<2x128xf32> to vector<2x128xbf16>
    %cst_43 = arith.constant dense<0.000000e+00> : vector<2x512xf32>
    %410 = tpu.matmul %409, %276, %cst_43 {dimension_numbers = #tpu.dot_dimension_numbers<[1], [0], [0], [1], [0, 0, 1, 1], [], []>} : vector<2x128xbf16>, vector<128x512xbf16>, vector<2x512xf32> -> vector<2x512xf32>
    %411 = vector.extract_strided_slice %274 {offsets = [0, 5, 0], sizes = [2, 1, 512], strides = [1, 1, 1]} : vector<2x8x512xf32> to vector<2x1x512xf32>
    %412 = vector.shape_cast %411 : vector<2x1x512xf32> to vector<2x512xf32>
    %413 = vector.extract_strided_slice %274 {offsets = [0, 2, 0], sizes = [2, 1, 512], strides = [1, 1, 1]} : vector<2x8x512xf32> to vector<2x1x512xf32>
    %414 = vector.shape_cast %413 : vector<2x1x512xf32> to vector<2x512xf32>
    %415 = vector.shape_cast %2 : vector<1x512xi1> to vector<1x512xi1>
    %416 = vector.broadcast %415 : vector<1x512xi1> to vector<2x512xi1>
    %417 = arith.select %416, %412, %414 : vector<2x512xi1>, vector<2x512xf32>
    %418 = arith.addf %410, %417 : vector<2x512xf32>
    %419 = vector.extract_strided_slice %418 {offsets = [0, 0], sizes = [2, 384], strides = [1, 1]} : vector<2x512xf32> to vector<2x384xf32>
    %420 = arith.negf %419 : vector<2x384xf32>
    %421 = math.exp %420 : vector<2x384xf32>
    %cst_44 = arith.constant 1.000000e+00 : f32
    %422 = vector.broadcast %cst_44 : f32 to vector<2x384xf32>
    %423 = arith.addf %422, %421 : vector<2x384xf32>
    %424 = arith.divf %422, %423 : vector<2x384xf32>
    %425 = vector.extract_strided_slice %418 {offsets = [0, 384], sizes = [2, 128], strides = [1, 1]} : vector<2x512xf32> to vector<2x128xf32>
    %426 = math.tanh %425 : vector<2x128xf32>
    %427 = vector.extract_strided_slice %424 {offsets = [0, 128], sizes = [2, 128], strides = [1, 1]} : vector<2x384xf32> to vector<2x128xf32>
    %428 = arith.mulf %427, %405 : vector<2x128xf32>
    %429 = vector.extract_strided_slice %424 {offsets = [0, 0], sizes = [2, 128], strides = [1, 1]} : vector<2x384xf32> to vector<2x128xf32>
    %430 = arith.mulf %429, %426 : vector<2x128xf32>
    %431 = arith.addf %428, %430 : vector<2x128xf32>
    %432 = vector.extract_strided_slice %424 {offsets = [0, 256], sizes = [2, 128], strides = [1, 1]} : vector<2x384xf32> to vector<2x128xf32>
    %433 = math.tanh %431 : vector<2x128xf32>
    %434 = arith.mulf %432, %433 : vector<2x128xf32>
    %435 = arith.truncf %434 : vector<2x128xf32> to vector<2x128xbf16>
    %cst_45 = arith.constant dense<0.000000e+00> : vector<2x512xf32>
    %436 = tpu.matmul %435, %276, %cst_45 {dimension_numbers = #tpu.dot_dimension_numbers<[1], [0], [0], [1], [0, 0, 1, 1], [], []>} : vector<2x128xbf16>, vector<128x512xbf16>, vector<2x512xf32> -> vector<2x512xf32>
    %437 = vector.extract_strided_slice %274 {offsets = [0, 6, 0], sizes = [2, 1, 512], strides = [1, 1, 1]} : vector<2x8x512xf32> to vector<2x1x512xf32>
    %438 = vector.shape_cast %437 : vector<2x1x512xf32> to vector<2x512xf32>
    %439 = vector.extract_strided_slice %274 {offsets = [0, 1, 0], sizes = [2, 1, 512], strides = [1, 1, 1]} : vector<2x8x512xf32> to vector<2x1x512xf32>
    %440 = vector.shape_cast %439 : vector<2x1x512xf32> to vector<2x512xf32>
    %441 = vector.shape_cast %2 : vector<1x512xi1> to vector<1x512xi1>
    %442 = vector.broadcast %441 : vector<1x512xi1> to vector<2x512xi1>
    %443 = arith.select %442, %438, %440 : vector<2x512xi1>, vector<2x512xf32>
    %444 = arith.addf %436, %443 : vector<2x512xf32>
    %445 = vector.extract_strided_slice %444 {offsets = [0, 0], sizes = [2, 384], strides = [1, 1]} : vector<2x512xf32> to vector<2x384xf32>
    %446 = arith.negf %445 : vector<2x384xf32>
    %447 = math.exp %446 : vector<2x384xf32>
    %cst_46 = arith.constant 1.000000e+00 : f32
    %448 = vector.broadcast %cst_46 : f32 to vector<2x384xf32>
    %449 = arith.addf %448, %447 : vector<2x384xf32>
    %450 = arith.divf %448, %449 : vector<2x384xf32>
    %451 = vector.extract_strided_slice %444 {offsets = [0, 384], sizes = [2, 128], strides = [1, 1]} : vector<2x512xf32> to vector<2x128xf32>
    %452 = math.tanh %451 : vector<2x128xf32>
    %453 = vector.extract_strided_slice %450 {offsets = [0, 128], sizes = [2, 128], strides = [1, 1]} : vector<2x384xf32> to vector<2x128xf32>
    %454 = arith.mulf %453, %431 : vector<2x128xf32>
    %455 = vector.extract_strided_slice %450 {offsets = [0, 0], sizes = [2, 128], strides = [1, 1]} : vector<2x384xf32> to vector<2x128xf32>
    %456 = arith.mulf %455, %452 : vector<2x128xf32>
    %457 = arith.addf %454, %456 : vector<2x128xf32>
    %458 = vector.extract_strided_slice %450 {offsets = [0, 256], sizes = [2, 128], strides = [1, 1]} : vector<2x384xf32> to vector<2x128xf32>
    %459 = math.tanh %457 : vector<2x128xf32>
    %460 = arith.mulf %458, %459 : vector<2x128xf32>
    %461 = arith.truncf %460 : vector<2x128xf32> to vector<2x128xbf16>
    %cst_47 = arith.constant dense<0.000000e+00> : vector<2x512xf32>
    %462 = tpu.matmul %461, %276, %cst_47 {dimension_numbers = #tpu.dot_dimension_numbers<[1], [0], [0], [1], [0, 0, 1, 1], [], []>} : vector<2x128xbf16>, vector<128x512xbf16>, vector<2x512xf32> -> vector<2x512xf32>
    %463 = vector.extract_strided_slice %274 {offsets = [0, 7, 0], sizes = [2, 1, 512], strides = [1, 1, 1]} : vector<2x8x512xf32> to vector<2x1x512xf32>
    %464 = vector.shape_cast %463 : vector<2x1x512xf32> to vector<2x512xf32>
    %465 = vector.extract_strided_slice %274 {offsets = [0, 0, 0], sizes = [2, 1, 512], strides = [1, 1, 1]} : vector<2x8x512xf32> to vector<2x1x512xf32>
    %466 = vector.shape_cast %465 : vector<2x1x512xf32> to vector<2x512xf32>
    %467 = vector.shape_cast %2 : vector<1x512xi1> to vector<1x512xi1>
    %468 = vector.broadcast %467 : vector<1x512xi1> to vector<2x512xi1>
    %469 = arith.select %468, %464, %466 : vector<2x512xi1>, vector<2x512xf32>
    %470 = arith.addf %462, %469 : vector<2x512xf32>
    %471 = vector.extract_strided_slice %470 {offsets = [0, 0], sizes = [2, 384], strides = [1, 1]} : vector<2x512xf32> to vector<2x384xf32>
    %472 = arith.negf %471 : vector<2x384xf32>
    %473 = math.exp %472 : vector<2x384xf32>
    %cst_48 = arith.constant 1.000000e+00 : f32
    %474 = vector.broadcast %cst_48 : f32 to vector<2x384xf32>
    %475 = arith.addf %474, %473 : vector<2x384xf32>
    %476 = arith.divf %474, %475 : vector<2x384xf32>
    %477 = vector.extract_strided_slice %470 {offsets = [0, 384], sizes = [2, 128], strides = [1, 1]} : vector<2x512xf32> to vector<2x128xf32>
    %478 = math.tanh %477 : vector<2x128xf32>
    %479 = vector.extract_strided_slice %476 {offsets = [0, 128], sizes = [2, 128], strides = [1, 1]} : vector<2x384xf32> to vector<2x128xf32>
    %480 = arith.mulf %479, %457 : vector<2x128xf32>
    %481 = vector.extract_strided_slice %476 {offsets = [0, 0], sizes = [2, 128], strides = [1, 1]} : vector<2x384xf32> to vector<2x128xf32>
    %482 = arith.mulf %481, %478 : vector<2x128xf32>
    %483 = arith.addf %480, %482 : vector<2x128xf32>
    %484 = vector.extract_strided_slice %476 {offsets = [0, 256], sizes = [2, 128], strides = [1, 1]} : vector<2x384xf32> to vector<2x128xf32>
    %485 = math.tanh %483 : vector<2x128xf32>
    %486 = arith.mulf %484, %485 : vector<2x128xf32>
    %487 = vector.shape_cast %3 : vector<1x128xi1> to vector<1x128xi1>
    %488 = vector.broadcast %487 : vector<1x128xi1> to vector<2x128xi1>
    %489 = arith.select %488, %304, %486 : vector<2x128xi1>, vector<2x128xf32>
    %490 = vector.shape_cast %3 : vector<1x128xi1> to vector<1x128xi1>
    %491 = vector.broadcast %490 : vector<1x128xi1> to vector<2x128xi1>
    %492 = arith.select %491, %330, %460 : vector<2x128xi1>, vector<2x128xf32>
    %493 = vector.shape_cast %3 : vector<1x128xi1> to vector<1x128xi1>
    %494 = vector.broadcast %493 : vector<1x128xi1> to vector<2x128xi1>
    %495 = arith.select %494, %356, %434 : vector<2x128xi1>, vector<2x128xf32>
    %496 = vector.shape_cast %3 : vector<1x128xi1> to vector<1x128xi1>
    %497 = vector.broadcast %496 : vector<1x128xi1> to vector<2x128xi1>
    %498 = arith.select %497, %382, %408 : vector<2x128xi1>, vector<2x128xf32>
    %499 = vector.shape_cast %3 : vector<1x128xi1> to vector<1x128xi1>
    %500 = vector.broadcast %499 : vector<1x128xi1> to vector<2x128xi1>
    %501 = arith.select %500, %408, %382 : vector<2x128xi1>, vector<2x128xf32>
    %502 = vector.shape_cast %3 : vector<1x128xi1> to vector<1x128xi1>
    %503 = vector.broadcast %502 : vector<1x128xi1> to vector<2x128xi1>
    %504 = arith.select %503, %434, %356 : vector<2x128xi1>, vector<2x128xf32>
    %505 = vector.shape_cast %3 : vector<1x128xi1> to vector<1x128xi1>
    %506 = vector.broadcast %505 : vector<1x128xi1> to vector<2x128xi1>
    %507 = arith.select %506, %460, %330 : vector<2x128xi1>, vector<2x128xf32>
    %508 = vector.shape_cast %3 : vector<1x128xi1> to vector<1x128xi1>
    %509 = vector.broadcast %508 : vector<1x128xi1> to vector<2x128xi1>
    %510 = arith.select %509, %486, %304 : vector<2x128xi1>, vector<2x128xf32>
    %511 = vector.shape_cast %489 : vector<2x128xf32> to vector<2x1x128xf32>
    %512 = vector.shape_cast %492 : vector<2x128xf32> to vector<2x1x128xf32>
    %513 = vector.shape_cast %495 : vector<2x128xf32> to vector<2x1x128xf32>
    %514 = vector.shape_cast %498 : vector<2x128xf32> to vector<2x1x128xf32>
    %515 = vector.shape_cast %501 : vector<2x128xf32> to vector<2x1x128xf32>
    %516 = vector.shape_cast %504 : vector<2x128xf32> to vector<2x1x128xf32>
    %517 = vector.shape_cast %507 : vector<2x128xf32> to vector<2x1x128xf32>
    %518 = vector.shape_cast %510 : vector<2x128xf32> to vector<2x1x128xf32>
    %519 = tpu.concatenate %511, %512, %513, %514, %515, %516, %517, %518 in 1 : vector<2x1x128xf32>, vector<2x1x128xf32>, vector<2x1x128xf32>, vector<2x1x128xf32>, vector<2x1x128xf32>, vector<2x1x128xf32>, vector<2x1x128xf32>, vector<2x1x128xf32> -> vector<2x8x128xf32>
    %520 = vector.extract_strided_slice %519 {offsets = [0, 0, 0], sizes = [2, 8, 64], strides = [1, 1, 1]} : vector<2x8x128xf32> to vector<2x8x64xf32>
    %521 = vector.extract_strided_slice %519 {offsets = [0, 0, 64], sizes = [2, 8, 64], strides = [1, 1, 1]} : vector<2x8x128xf32> to vector<2x8x64xf32>
    %c0_49 = arith.constant 0 : index
    %c0_50 = arith.constant 0 : index
    %522 = vector.load %arg6[%c0_49, %c0_50] : memref<368x64xf32, #tpu.memory_space<vmem>>, vector<1x64xf32>
    %523 = vector.shape_cast %522 : vector<1x64xf32> to vector<1x1x64xf32>
    %c8 = arith.constant 8 : index
    %c0_51 = arith.constant 0 : index
    %524 = vector.load %arg6[%c8, %c0_51] : memref<368x64xf32, #tpu.memory_space<vmem>>, vector<1x64xf32>
    %525 = vector.shape_cast %524 : vector<1x64xf32> to vector<1x1x64xf32>
    %c16 = arith.constant 16 : index
    %c0_52 = arith.constant 0 : index
    %526 = vector.load %arg6[%c16, %c0_52] : memref<368x64xf32, #tpu.memory_space<vmem>>, vector<64x64xf32>
    %c80_53 = arith.constant 80 : index
    %c0_54 = arith.constant 0 : index
    %527 = vector.load %arg6[%c80_53, %c0_54] : memref<368x64xf32, #tpu.memory_space<vmem>>, vector<64x64xf32>
    %c144 = arith.constant 144 : index
    %c0_55 = arith.constant 0 : index
    %528 = vector.load %arg6[%c144, %c0_55] : memref<368x64xf32, #tpu.memory_space<vmem>>, vector<1x64xf32>
    %529 = vector.shape_cast %528 : vector<1x64xf32> to vector<1x1x64xf32>
    %c152 = arith.constant 152 : index
    %c0_56 = arith.constant 0 : index
    %530 = vector.load %arg6[%c152, %c0_56] : memref<368x64xf32, #tpu.memory_space<vmem>>, vector<64x64xf32>
    %c216 = arith.constant 216 : index
    %c0_57 = arith.constant 0 : index
    %531 = vector.load %arg6[%c216, %c0_57] : memref<368x64xf32, #tpu.memory_space<vmem>>, vector<1x64xf32>
    %532 = vector.shape_cast %531 : vector<1x64xf32> to vector<1x1x64xf32>
    %cst_58 = arith.constant dense<0.000000e+00> : vector<2x8xf32>
    %533 = vector.multi_reduction <add>, %520, %cst_58 [2] : vector<2x8x64xf32> to vector<2x8xf32>
    %534 = vector.shape_cast %533 : vector<2x8xf32> to vector<2x8x1xf32>
    %cst_59 = arith.constant 6.400000e+01 : f32
    %535 = vector.broadcast %cst_59 : f32 to vector<2x8x1xf32>
    %536 = arith.divf %534, %535 : vector<2x8x1xf32>
    %537 = vector.broadcast %536 : vector<2x8x1xf32> to vector<2x8x64xf32>
    %538 = arith.subf %520, %537 : vector<2x8x64xf32>
    %539 = arith.mulf %538, %538 : vector<2x8x64xf32>
    %cst_60 = arith.constant dense<0.000000e+00> : vector<2x8xf32>
    %540 = vector.multi_reduction <add>, %539, %cst_60 [2] : vector<2x8x64xf32> to vector<2x8xf32>
    %541 = vector.shape_cast %540 : vector<2x8xf32> to vector<2x8x1xf32>
    %cst_61 = arith.constant 6.400000e+01 : f32
    %542 = vector.broadcast %cst_61 : f32 to vector<2x8x1xf32>
    %543 = arith.divf %541, %542 : vector<2x8x1xf32>
    %544 = vector.broadcast %536 : vector<2x8x1xf32> to vector<2x8x64xf32>
    %545 = arith.subf %520, %544 : vector<2x8x64xf32>
    %cst_62 = arith.constant 9.99999974E-6 : f32
    %546 = vector.broadcast %cst_62 : f32 to vector<2x8x1xf32>
    %547 = arith.addf %543, %546 : vector<2x8x1xf32>
    %548 = math.rsqrt %547 : vector<2x8x1xf32>
    %549 = vector.broadcast %548 : vector<2x8x1xf32> to vector<2x8x64xf32>
    %550 = arith.mulf %545, %549 : vector<2x8x64xf32>
    %551 = vector.broadcast %523 : vector<1x1x64xf32> to vector<2x8x64xf32>
    %552 = arith.mulf %550, %551 : vector<2x8x64xf32>
    %553 = vector.broadcast %525 : vector<1x1x64xf32> to vector<2x8x64xf32>
    %554 = arith.addf %552, %553 : vector<2x8x64xf32>
    "tpu.trace_start"() <{level = 10 : i32, message = "btd,de->bte"}> : () -> ()
    %cst_63 = arith.constant dense<0.000000e+00> : vector<2x8x64xf32>
    %555 = tpu.matmul %554, %527, %cst_63 {dimension_numbers = #tpu.dot_dimension_numbers<[2], [0], [0, 1], [1], [0, 0, 0, 1, 1, 1], [], []>} : vector<2x8x64xf32>, vector<64x64xf32>, vector<2x8x64xf32> -> vector<2x8x64xf32>
    "tpu.trace_stop"() : () -> ()
    %556 = vector.broadcast %529 : vector<1x1x64xf32> to vector<2x8x64xf32>
    %557 = arith.addf %555, %556 : vector<2x8x64xf32>
    %558 = math.tanh %557 : vector<2x8x64xf32>
    "tpu.trace_start"() <{level = 10 : i32, message = "bte,eh->bth"}> : () -> ()
    %cst_64 = arith.constant dense<0.000000e+00> : vector<2x8x64xf32>
    %559 = tpu.matmul %558, %530, %cst_64 {dimension_numbers = #tpu.dot_dimension_numbers<[2], [0], [0, 1], [1], [0, 0, 0, 1, 1, 1], [], []>} : vector<2x8x64xf32>, vector<64x64xf32>, vector<2x8x64xf32> -> vector<2x8x64xf32>
    "tpu.trace_stop"() : () -> ()
    %560 = vector.broadcast %532 : vector<1x1x64xf32> to vector<2x8x64xf32>
    %561 = arith.addf %559, %560 : vector<2x8x64xf32>
    %cst_65 = arith.constant dense<0xFF800000> : vector<2x64xf32>
    %562 = vector.multi_reduction <maximumf>, %561, %cst_65 [1] : vector<2x8x64xf32> to vector<2x64xf32>
    %563 = vector.shape_cast %562 : vector<2x64xf32> to vector<2x1x64xf32>
    %564 = vector.broadcast %563 : vector<2x1x64xf32> to vector<2x8x64xf32>
    %565 = arith.subf %561, %564 : vector<2x8x64xf32>
    %566 = math.exp %565 : vector<2x8x64xf32>
    %cst_66 = arith.constant dense<0.000000e+00> : vector<2x64xf32>
    %567 = vector.multi_reduction <add>, %566, %cst_66 [1] : vector<2x8x64xf32> to vector<2x64xf32>
    %568 = vector.shape_cast %567 : vector<2x64xf32> to vector<2x1x64xf32>
    %569 = tpu.reciprocal %568 {approx = true} : vector<2x1x64xf32> -> vector<2x1x64xf32>
    %570 = vector.broadcast %569 : vector<2x1x64xf32> to vector<2x8x64xf32>
    %571 = arith.mulf %566, %570 : vector<2x8x64xf32>
    "tpu.trace_start"() <{level = 10 : i32, message = "bth,hd->btd"}> : () -> ()
    %cst_67 = arith.constant dense<0.000000e+00> : vector<2x8x64xf32>
    %572 = tpu.matmul %571, %526, %cst_67 {dimension_numbers = #tpu.dot_dimension_numbers<[2], [0], [0, 1], [1], [0, 0, 0, 1, 1, 1], [], []>} : vector<2x8x64xf32>, vector<64x64xf32>, vector<2x8x64xf32> -> vector<2x8x64xf32>
    "tpu.trace_stop"() : () -> ()
    %573 = arith.mulf %572, %554 : vector<2x8x64xf32>
    %cst_68 = arith.constant dense<0.000000e+00> : vector<2x64xf32>
    %574 = vector.multi_reduction <add>, %573, %cst_68 [1] : vector<2x8x64xf32> to vector<2x64xf32>
    %c224 = arith.constant 224 : index
    %c0_69 = arith.constant 0 : index
    %575 = vector.load %arg6[%c224, %c0_69] : memref<368x64xf32, #tpu.memory_space<vmem>>, vector<64x64xf32>
    %c288 = arith.constant 288 : index
    %c0_70 = arith.constant 0 : index
    %576 = vector.load %arg6[%c288, %c0_70] : memref<368x64xf32, #tpu.memory_space<vmem>>, vector<1x64xf32>
    %577 = vector.shape_cast %576 : vector<1x64xf32> to vector<1x1x64xf32>
    %c296 = arith.constant 296 : index
    %c0_71 = arith.constant 0 : index
    %578 = vector.load %arg6[%c296, %c0_71] : memref<368x64xf32, #tpu.memory_space<vmem>>, vector<64x64xf32>
    %c360 = arith.constant 360 : index
    %c0_72 = arith.constant 0 : index
    %579 = vector.load %arg6[%c360, %c0_72] : memref<368x64xf32, #tpu.memory_space<vmem>>, vector<1x64xf32>
    %580 = vector.shape_cast %579 : vector<1x64xf32> to vector<1x1x64xf32>
    %cst_73 = arith.constant dense<0.000000e+00> : vector<2x8xf32>
    %581 = vector.multi_reduction <add>, %521, %cst_73 [2] : vector<2x8x64xf32> to vector<2x8xf32>
    %582 = vector.shape_cast %581 : vector<2x8xf32> to vector<2x8x1xf32>
    %cst_74 = arith.constant 6.400000e+01 : f32
    %583 = vector.broadcast %cst_74 : f32 to vector<2x8x1xf32>
    %584 = arith.divf %582, %583 : vector<2x8x1xf32>
    %585 = vector.broadcast %584 : vector<2x8x1xf32> to vector<2x8x64xf32>
    %586 = arith.subf %521, %585 : vector<2x8x64xf32>
    %587 = arith.mulf %586, %586 : vector<2x8x64xf32>
    %cst_75 = arith.constant dense<0.000000e+00> : vector<2x8xf32>
    %588 = vector.multi_reduction <add>, %587, %cst_75 [2] : vector<2x8x64xf32> to vector<2x8xf32>
    %589 = vector.shape_cast %588 : vector<2x8xf32> to vector<2x8x1xf32>
    %cst_76 = arith.constant 6.400000e+01 : f32
    %590 = vector.broadcast %cst_76 : f32 to vector<2x8x1xf32>
    %591 = arith.divf %589, %590 : vector<2x8x1xf32>
    %592 = vector.broadcast %584 : vector<2x8x1xf32> to vector<2x8x64xf32>
    %593 = arith.subf %521, %592 : vector<2x8x64xf32>
    %cst_77 = arith.constant 9.99999974E-6 : f32
    %594 = vector.broadcast %cst_77 : f32 to vector<2x8x1xf32>
    %595 = arith.addf %591, %594 : vector<2x8x1xf32>
    %596 = math.rsqrt %595 : vector<2x8x1xf32>
    %597 = vector.broadcast %596 : vector<2x8x1xf32> to vector<2x8x64xf32>
    %598 = arith.mulf %593, %597 : vector<2x8x64xf32>
    %599 = vector.broadcast %523 : vector<1x1x64xf32> to vector<2x8x64xf32>
    %600 = arith.mulf %598, %599 : vector<2x8x64xf32>
    %601 = vector.broadcast %525 : vector<1x1x64xf32> to vector<2x8x64xf32>
    %602 = arith.addf %600, %601 : vector<2x8x64xf32>
    "tpu.trace_start"() <{level = 10 : i32, message = "btd,de->bte"}> : () -> ()
    %cst_78 = arith.constant dense<0.000000e+00> : vector<2x8x64xf32>
    %603 = tpu.matmul %602, %575, %cst_78 {dimension_numbers = #tpu.dot_dimension_numbers<[2], [0], [0, 1], [1], [0, 0, 0, 1, 1, 1], [], []>} : vector<2x8x64xf32>, vector<64x64xf32>, vector<2x8x64xf32> -> vector<2x8x64xf32>
    "tpu.trace_stop"() : () -> ()
    %604 = vector.broadcast %577 : vector<1x1x64xf32> to vector<2x8x64xf32>
    %605 = arith.addf %603, %604 : vector<2x8x64xf32>
    %606 = math.tanh %605 : vector<2x8x64xf32>
    "tpu.trace_start"() <{level = 10 : i32, message = "bte,eh->bth"}> : () -> ()
    %cst_79 = arith.constant dense<0.000000e+00> : vector<2x8x64xf32>
    %607 = tpu.matmul %606, %578, %cst_79 {dimension_numbers = #tpu.dot_dimension_numbers<[2], [0], [0, 1], [1], [0, 0, 0, 1, 1, 1], [], []>} : vector<2x8x64xf32>, vector<64x64xf32>, vector<2x8x64xf32> -> vector<2x8x64xf32>
    "tpu.trace_stop"() : () -> ()
    %608 = vector.broadcast %580 : vector<1x1x64xf32> to vector<2x8x64xf32>
    %609 = arith.addf %607, %608 : vector<2x8x64xf32>
    %cst_80 = arith.constant dense<0xFF800000> : vector<2x64xf32>
    %610 = vector.multi_reduction <maximumf>, %609, %cst_80 [1] : vector<2x8x64xf32> to vector<2x64xf32>
    %611 = vector.shape_cast %610 : vector<2x64xf32> to vector<2x1x64xf32>
    %612 = vector.broadcast %611 : vector<2x1x64xf32> to vector<2x8x64xf32>
    %613 = arith.subf %609, %612 : vector<2x8x64xf32>
    %614 = math.exp %613 : vector<2x8x64xf32>
    %cst_81 = arith.constant dense<0.000000e+00> : vector<2x64xf32>
    %615 = vector.multi_reduction <add>, %614, %cst_81 [1] : vector<2x8x64xf32> to vector<2x64xf32>
    %616 = vector.shape_cast %615 : vector<2x64xf32> to vector<2x1x64xf32>
    %617 = tpu.reciprocal %616 {approx = true} : vector<2x1x64xf32> -> vector<2x1x64xf32>
    %618 = vector.broadcast %617 : vector<2x1x64xf32> to vector<2x8x64xf32>
    %619 = arith.mulf %614, %618 : vector<2x8x64xf32>
    "tpu.trace_start"() <{level = 10 : i32, message = "bth,hd->btd"}> : () -> ()
    %cst_82 = arith.constant dense<0.000000e+00> : vector<2x8x64xf32>
    %620 = tpu.matmul %619, %526, %cst_82 {dimension_numbers = #tpu.dot_dimension_numbers<[2], [0], [0, 1], [1], [0, 0, 0, 1, 1, 1], [], []>} : vector<2x8x64xf32>, vector<64x64xf32>, vector<2x8x64xf32> -> vector<2x8x64xf32>
    "tpu.trace_stop"() : () -> ()
    %621 = arith.mulf %620, %602 : vector<2x8x64xf32>
    %cst_83 = arith.constant dense<0.000000e+00> : vector<2x64xf32>
    %622 = vector.multi_reduction <add>, %621, %cst_83 [1] : vector<2x8x64xf32> to vector<2x64xf32>
    %c0_84 = arith.constant 0 : index
    %c0_85 = arith.constant 0 : index
    %623 = vector.load %arg2[%c0_84, %c0_85] : memref<2x3xi32, #tpu.memory_space<vmem>>, vector<2x3xi32>
    %c0_86 = arith.constant 0 : index
    %c0_87 = arith.constant 0 : index
    %624 = vector.load %arg3[%c0_86, %c0_87] : memref<2x3xi32, #tpu.memory_space<vmem>>, vector<2x3xi32>
    %625 = tpu.iota {dimensions = array<i32: 1>} : vector<2x96xi32>
    %626 = vector.extract_strided_slice %623 {offsets = [0, 0], sizes = [2, 1], strides = [1, 1]} : vector<2x3xi32> to vector<2x1xi32>
    %627 = vector.broadcast %626 : vector<2x1xi32> to vector<2x96xi32>
    %628 = arith.cmpi eq, %625, %627 : vector<2x96xi32>
    %629 = vector.extract_strided_slice %624 {offsets = [0, 0], sizes = [2, 1], strides = [1, 1]} : vector<2x3xi32> to vector<2x1xi32>
    %c48_i32 = arith.constant 48 : i32
    %630 = vector.broadcast %c48_i32 : i32 to vector<2x1xi32>
    %631 = arith.addi %629, %630 : vector<2x1xi32>
    %632 = vector.broadcast %631 : vector<2x1xi32> to vector<2x96xi32>
    %633 = arith.cmpi eq, %625, %632 : vector<2x96xi32>
    %634 = arith.ori %628, %633 : vector<2x96xi1>
    %635 = vector.extract_strided_slice %623 {offsets = [0, 1], sizes = [2, 1], strides = [1, 1]} : vector<2x3xi32> to vector<2x1xi32>
    %c16_i32 = arith.constant 16 : i32
    %636 = vector.broadcast %c16_i32 : i32 to vector<2x1xi32>
    %637 = arith.addi %635, %636 : vector<2x1xi32>
    %638 = vector.broadcast %637 : vector<2x1xi32> to vector<2x96xi32>
    %639 = arith.cmpi eq, %625, %638 : vector<2x96xi32>
    %640 = arith.ori %634, %639 : vector<2x96xi1>
    %641 = vector.extract_strided_slice %624 {offsets = [0, 1], sizes = [2, 1], strides = [1, 1]} : vector<2x3xi32> to vector<2x1xi32>
    %c64_i32 = arith.constant 64 : i32
    %642 = vector.broadcast %c64_i32 : i32 to vector<2x1xi32>
    %643 = arith.addi %641, %642 : vector<2x1xi32>
    %644 = vector.broadcast %643 : vector<2x1xi32> to vector<2x96xi32>
    %645 = arith.cmpi eq, %625, %644 : vector<2x96xi32>
    %646 = arith.ori %640, %645 : vector<2x96xi1>
    %647 = vector.extract_strided_slice %623 {offsets = [0, 2], sizes = [2, 1], strides = [1, 1]} : vector<2x3xi32> to vector<2x1xi32>
    %c32_i32_88 = arith.constant 32 : i32
    %648 = vector.broadcast %c32_i32_88 : i32 to vector<2x1xi32>
    %649 = arith.addi %647, %648 : vector<2x1xi32>
    %650 = vector.broadcast %649 : vector<2x1xi32> to vector<2x96xi32>
    %651 = arith.cmpi eq, %625, %650 : vector<2x96xi32>
    %652 = arith.ori %646, %651 : vector<2x96xi1>
    %653 = vector.extract_strided_slice %624 {offsets = [0, 2], sizes = [2, 1], strides = [1, 1]} : vector<2x3xi32> to vector<2x1xi32>
    %c80_i32 = arith.constant 80 : i32
    %654 = vector.broadcast %c80_i32 : i32 to vector<2x1xi32>
    %655 = arith.addi %653, %654 : vector<2x1xi32>
    %656 = vector.broadcast %655 : vector<2x1xi32> to vector<2x96xi32>
    %657 = arith.cmpi eq, %625, %656 : vector<2x96xi32>
    %658 = arith.ori %652, %657 : vector<2x96xi1>
    %659 = arith.extui %658 : vector<2x96xi1> to vector<2x96xi32>
    %660 = arith.sitofp %659 : vector<2x96xi32> to vector<2x96xf32>
    %c0_89 = arith.constant 0 : index
    %c0_90 = arith.constant 0 : index
    %661 = vector.load %arg7[%c0_89, %c0_90] : memref<304x32xf32, #tpu.memory_space<vmem>>, vector<64x32xf32>
    %cst_91 = arith.constant dense<0.000000e+00> : vector<2x32xf32>
    %662 = tpu.matmul %574, %661, %cst_91 {dimension_numbers = #tpu.dot_dimension_numbers<[1], [0], [0], [1], [0, 0, 1, 1], [], []>} : vector<2x64xf32>, vector<64x32xf32>, vector<2x32xf32> -> vector<2x32xf32>
    %c64_92 = arith.constant 64 : index
    %c0_93 = arith.constant 0 : index
    %663 = vector.load %arg7[%c64_92, %c0_93] : memref<304x32xf32, #tpu.memory_space<vmem>>, vector<64x32xf32>
    %cst_94 = arith.constant dense<0.000000e+00> : vector<2x32xf32>
    %664 = tpu.matmul %622, %663, %cst_94 {dimension_numbers = #tpu.dot_dimension_numbers<[1], [0], [0], [1], [0, 0, 1, 1], [], []>} : vector<2x64xf32>, vector<64x32xf32>, vector<2x32xf32> -> vector<2x32xf32>
    %665 = arith.addf %662, %664 : vector<2x32xf32>
    %c128 = arith.constant 128 : index
    %c0_95 = arith.constant 0 : index
    %666 = vector.load %arg7[%c128, %c0_95] : memref<304x32xf32, #tpu.memory_space<vmem>>, vector<96x32xf32>
    %cst_96 = arith.constant dense<0.000000e+00> : vector<2x32xf32>
    %667 = tpu.matmul %660, %666, %cst_96 {dimension_numbers = #tpu.dot_dimension_numbers<[1], [0], [0], [1], [0, 0, 1, 1], [], []>} : vector<2x96xf32>, vector<96x32xf32>, vector<2x32xf32> -> vector<2x32xf32>
    %668 = arith.addf %665, %667 : vector<2x32xf32>
    %c0_97 = arith.constant 0 : index
    %c0_98 = arith.constant 0 : index
    %669 = vector.load %arg4[%c0_97, %c0_98] : memref<2x4xf32, #tpu.memory_space<vmem>>, vector<2x4xf32>
    %c224_99 = arith.constant 224 : index
    %c0_100 = arith.constant 0 : index
    %670 = vector.load %arg7[%c224_99, %c0_100] : memref<304x32xf32, #tpu.memory_space<vmem>>, vector<4x32xf32>
    %cst_101 = arith.constant dense<0.000000e+00> : vector<2x32xf32>
    %671 = tpu.matmul %669, %670, %cst_101 {dimension_numbers = #tpu.dot_dimension_numbers<[1], [0], [0], [1], [0, 0, 1, 1], [], []>} : vector<2x4xf32>, vector<4x32xf32>, vector<2x32xf32> -> vector<2x32xf32>
    %672 = arith.addf %668, %671 : vector<2x32xf32>
    %c232 = arith.constant 232 : index
    %c0_102 = arith.constant 0 : index
    %673 = vector.load %arg7[%c232, %c0_102] : memref<304x32xf32, #tpu.memory_space<vmem>>, vector<1x32xf32>
    %674 = vector.broadcast %673 : vector<1x32xf32> to vector<2x32xf32>
    %675 = arith.addf %672, %674 : vector<2x32xf32>
    %cst_103 = arith.constant 0.000000e+00 : f32
    %676 = vector.broadcast %cst_103 : f32 to vector<2x32xf32>
    %677 = arith.maximumf %675, %676 : vector<2x32xf32>
    %c240 = arith.constant 240 : index
    %c0_104 = arith.constant 0 : index
    %678 = vector.load %arg7[%c240, %c0_104] : memref<304x32xf32, #tpu.memory_space<vmem>>, vector<32x32xf32>
    %cst_105 = arith.constant dense<0.000000e+00> : vector<2x32xf32>
    %679 = tpu.matmul %677, %678, %cst_105 {dimension_numbers = #tpu.dot_dimension_numbers<[1], [0], [0], [1], [0, 0, 1, 1], [], []>} : vector<2x32xf32>, vector<32x32xf32>, vector<2x32xf32> -> vector<2x32xf32>
    %c272 = arith.constant 272 : index
    %c0_106 = arith.constant 0 : index
    %680 = vector.load %arg7[%c272, %c0_106] : memref<304x32xf32, #tpu.memory_space<vmem>>, vector<1x32xf32>
    %681 = vector.broadcast %680 : vector<1x32xf32> to vector<2x32xf32>
    %682 = arith.addf %679, %681 : vector<2x32xf32>
    %cst_107 = arith.constant 0.000000e+00 : f32
    %683 = vector.broadcast %cst_107 : f32 to vector<2x32xf32>
    %684 = arith.maximumf %682, %683 : vector<2x32xf32>
    %c280 = arith.constant 280 : index
    %c0_108 = arith.constant 0 : index
    %685 = vector.load %arg7[%c280, %c0_108] : memref<304x32xf32, #tpu.memory_space<vmem>>, vector<1x32xf32>
    %686 = vector.broadcast %685 : vector<1x32xf32> to vector<2x32xf32>
    %687 = arith.mulf %677, %686 : vector<2x32xf32>
    %cst_109 = arith.constant dense<0.000000e+00> : vector<2xf32>
    %688 = vector.multi_reduction <add>, %687, %cst_109 [1] : vector<2x32xf32> to vector<2xf32>
    %689 = vector.shape_cast %688 : vector<2xf32> to vector<2x1xf32>
    %c288_110 = arith.constant 288 : index
    %c0_111 = arith.constant 0 : index
    %690 = vector.load %arg7[%c288_110, %c0_111] : memref<304x32xf32, #tpu.memory_space<vmem>>, vector<1x32xf32>
    %691 = vector.broadcast %690 : vector<1x32xf32> to vector<2x32xf32>
    %692 = arith.mulf %684, %691 : vector<2x32xf32>
    %cst_112 = arith.constant dense<0.000000e+00> : vector<2xf32>
    %693 = vector.multi_reduction <add>, %692, %cst_112 [1] : vector<2x32xf32> to vector<2xf32>
    %694 = vector.shape_cast %693 : vector<2xf32> to vector<2x1xf32>
    %695 = arith.addf %689, %694 : vector<2x1xf32>
    %c296_113 = arith.constant 296 : index
    %c0_114 = arith.constant 0 : index
    %696 = vector.load %arg7[%c296_113, %c0_114] : memref<304x32xf32, #tpu.memory_space<vmem>>, vector<1x32xf32>
    %697 = vector.extract_strided_slice %696 {offsets = [0, 0], sizes = [1, 1], strides = [1, 1]} : vector<1x32xf32> to vector<1x1xf32>
    %698 = vector.broadcast %697 : vector<1x1xf32> to vector<2x1xf32>
    %699 = arith.addf %695, %698 : vector<2x1xf32>
    %c0_115 = arith.constant 0 : index
    %c0_116 = arith.constant 0 : index
    %700 = vector.load %arg8[%c0_115, %c0_116] : memref<2x1xf32, #tpu.memory_space<vmem>>, vector<2x1xf32>
    tpu.vector_store %arg8[%c0_115, %c0_116], %699 {strides = array<i32>} : memref<2x1xf32, #tpu.memory_space<vmem>>, vector<2x1xf32>,
    return
  }
}

</mosaic_0001>

<bundles_post_ra>
// kernel: gender_predictor_v3_forward.1
= control target key start
LH: loop header
LB: loop body
LE: loop exit
PB: predicated region body
PF: predicated region fallthrough
CT: control target
= control target key end

     0   :  { %13 = vsyncpa [#allocation3], 0  ;;  %s5312_s27 = smov [#allocation2]   ;;  %s7740_s0 = inlined_call_operand.vmem [shape: s32[2,8], index: 0, kind: input, shape index: {}]   ;;  %s7741_s1 = inlined_call_operand.vmem [shape: s32[2,8], index: 1, kind: input, shape index: {}]   ;;  %s7742_s2 = inlined_call_operand.vmem [shape: s32[2,3], index: 2, kind: input, shape index: {}]   ;;  %s7743_s3 = inlined_call_operand.vmem [shape: s32[2,3], index: 3, kind: input, shape index: {}]   ;;  %s7744_s4 = inlined_call_operand.vmem [shape: f32[2,4], index: 4, kind: input, shape index: {}]   ;;  %s7745_s5 = inlined_call_operand.hbm [shape: f32[472,512], index: 5, kind: input, shape index: {}]   ;;  %s7746_s6 = inlined_call_operand.vmem [shape: f32[368,64], index: 6, kind: input, shape index: {}]   ;;  %s7747_s7 = inlined_call_operand.vmem [shape: f32[304,32], index: 7, kind: input, shape index: {}]   ;;  %s7748_s8 = inlined_call_operand.vmem [shape: f32[2,1], index: 8, kind: output, shape index: {}]  }
   0x1   :  { %s29_s28 = sshll.u32 %s5312_s27, 4  ;;  %s30_s28 = int_to_ptr.vmem [resolvable:$true] %s29_s28 }
   0x2   :  { %s5298_s29 = scalar_lea.vmem %s30_s28, 30208  ;;  %p5303_p1 = scmp.lt.s32.totalorder %s30_s28, %s30_s28 }
   0x3   :  { %p5299_p0 = scmp.ne.s32.totalorder %s30_s28, %s5298_s29  ;;  %p5304_p2 = scmp.lt.s32.totalorder %s5298_s29, %s5298_s29 }
   0x5   :  { %p5305_p3 = por %p5304_p2, %p5303_p1 }
   0x7   :  { %p5306_p4 = pnand %p5305_p3, %p5299_p0 }
   0x9   :  { %5309 = shalt.err (!%p5306_p4)
}
   0xa   :  { %s5313_s30 = smov 512   ;;  %s5314_s9 = smov 32  }
   0xb   :  { %35 = dma.hbm_to_vmem [thread:$0]  %s7745_s5, 30208, %s30_s28, [#allocation3], %s5313_s30, %s5313_s30, %s5314_s9  }
   0xc   :  { %5310 = dma.done.wait [#allocation3], 30208  }
   0xd   :  { %5311 = vsyncadd [#allocation3], 4294937088  ;;  %v49_v0 = vlaneseq  ;;  %v7749_v1 = vmov 0.0   ;;  %v48_v5 = vld [vmem:[%s7741_s1] sm:$0x3]  ;;  %v120_v7 = vld [vmem:[#allocation2 + $0xe8] sm:$0xff] }
   0xe   :  { %217 = vmatprep.mubr.f32.mxu0 %v7749_v1  ;;  %294 = vmatprep.mubr.f32.mxu1 %v7749_v1  ;;  %v47_v6 = vld [vmem:[%s7740_s0] sm:$0x3]  ;;  %v122_v10 = vld [vmem:[#allocation2 + $0xf8] sm:$0xff]  ;;  %v121_v12 = vld [vmem:[#allocation2 + $0xf0] sm:$0xff]  ;;  %v7751_v49 = vmov 0   ;;  %vm146_vm1 = vcmask 523264  }
   0xf   :  { %v5373_v2 = vshrl.u32 %v49_v0, 7  ;;  %169 = vmatprep.subr.mxu0 %v120_v7  ;;  %v119_v11 = vld [vmem:[#allocation2 + $0xe0] sm:$0xff]  ;;  %246 = vmatprep.subr.mxu1 %v122_v10  ;;  %v116_v13 = vld [vmem:[#allocation2 + $0xc8] sm:$0xff]  ;;  %v118_v14 = vld [vmem:[#allocation2 + $0xd8] sm:$0xff]  ;;  %v5400_v54 = vand.u32 127, %v49_v0  ;;  %vm433_vm9 = vcmask 1041409  }
  0x10   :  { %170 = vmatpush1.msra.mxu0 %v119_v11  ;;  %v115_v15 = vld [vmem:[#allocation2 + $0xc0] sm:$0xff]  ;;  %v117_v18 = vld [vmem:[#allocation2 + $0xd0] sm:$0xff]  ;;  %v112_v19 = vld [vmem:[#allocation2 + $0xa8] sm:$0xff]  ;;  %247 = vmatpush1.msra.mxu1 %v121_v12  ;;  %vm1704_vm13 = vcmask 1040384   ;;  %vm1707_vm14 = vcmask 1041408   ;;  %vm1710_vm15 = vcmask 1042432  }
  0x11   :  { %7927 = vst [vmem:[#allocation5_spill] sm:$0xff] %v5373_v2  ;;  %v5376_v3 = vsub.s32 0, %v5373_v2  ;;  %v5379_v4 = vsub.s32 1, %v5373_v2  ;;  %171 = vmatprep.subr.mxu0 %v116_v13  ;;  %248 = vmatprep.subr.mxu1 %v118_v14  ;;  %v114_v20 = vld [vmem:[#allocation2 + $0xb8] sm:$0xff]  ;;  %v111_v21 = vld [vmem:[#allocation2 + $0xa0] sm:$0xff]  ;;  %v113_v22 = vld [vmem:[#allocation2 + $0xb0] sm:$0xff] }
  0x12   :  { %172 = vmatpush1.msra.mxu0 %v115_v15  ;;  %249 = vmatpush1.msra.mxu1 %v117_v18  ;;  %v108_v23 = vld [vmem:[#allocation2 + $0x88] sm:$0xff]  ;;  %v110_v24 = vld [vmem:[#allocation2 + $0x98] sm:$0xff]  ;;  %v107_v25 = vld [vmem:[#allocation2 + $0x80] sm:$0xff]  ;;  %7932 = vst [vmem:[#allocation10_spill] sm:$0xff] %v5400_v54  ;;  %s5318_s0 = smov 64  }
  0x13   :  { %7928 = vst [vmem:[#allocation6_spill] sm:$0xff] %v5376_v3  ;;  %7929 = vst [vmem:[#allocation7_spill] sm:$0xff] %v5379_v4  ;;  %v70_v8 = vrot.slane %v48_v5, %v5376_v3  ;;  %v77_v9 = vrot.slane %v48_v5, %v5379_v4  ;;  %v54_v16 = vrot.slane %v47_v6, %v5376_v3  ;;  %173 = vmatprep.subr.mxu0 %v112_v19  ;;  %v109_v26 = vld [vmem:[#allocation2 + $0x90] sm:$0xff]  ;;  %v104_v27 = vld [vmem:[#allocation2 + $0x68] sm:$0xff] }
  0x14   :  { %v61_v17 = vrot.slane %v47_v6, %v5379_v4  ;;  %250 = vmatprep.subr.mxu1 %v114_v20  ;;  %174 = vmatpush1.msra.mxu0 %v111_v21  ;;  %v106_v28 = vld [vmem:[#allocation2 + $0x78] sm:$0xff]  ;;  %v103_v29 = vld [vmem:[#allocation2 + $0x60] sm:$0xff]  ;;  %v105_v30 = vld [vmem:[#allocation2 + $0x70] sm:$0xff] }
  0x15   :  { %72 = vbcast.lane.b32.xlu0 %v70_v8, 256  ;;  %79 = vbcast.lane.b32.xlu1 %v77_v9, 256  ;;  %v100_v31 = vld [vmem:[#allocation2 + $0x48] sm:$0xff]  ;;  %v102_v32 = vld [vmem:[#allocation2 + $0x58] sm:$0xff]  ;;  %v99_v33 = vld [vmem:[#allocation2 + $0x40] sm:$0xff] }
  0x16   :  { %251 = vmatpush1.msra.mxu1 %v113_v22  ;;  %175 = vmatprep.subr.mxu0 %v108_v23  ;;  %v101_v34 = vld [vmem:[#allocation2 + $0x50] sm:$0xff]  ;;  %v96_v35 = vld [vmem:[#allocation2 + $0x28] sm:$0xff]  ;;  %v98_v36 = vld [vmem:[#allocation2 + $0x38] sm:$0xff] }
  0x17   :  { %252 = vmatprep.subr.mxu1 %v110_v24  ;;  %176 = vmatpush1.msra.mxu0 %v107_v25  ;;  %v364_v37 = vld [vmem:[#allocation2 + $0x308] sm:$0xff]  ;;  %v95_v39 = vld [vmem:[#allocation2 + $0x20] sm:$0xff]  ;;  %v366_v40 = vld [vmem:[#allocation2 + $0x318] sm:$0xff] }
  0x18   :  { %253 = vmatpush1.msra.mxu1 %v109_v26  ;;  %177 = vmatprep.subr.mxu0 %v104_v27  ;;  %v368_v38 = vld [vmem:[#allocation2 + $0x328] sm:$0xff]  ;;  %v370_v41 = vld [vmem:[#allocation2 + $0x338] sm:$0xff]  ;;  %v97_v42 = vld [vmem:[#allocation2 + $0x30] sm:$0xff] }
  0x19   :  { %56 = vbcast.lane.b32.xlu0 %v54_v16, 256  ;;  %63 = vbcast.lane.b32.xlu1 %v61_v17, 256  ;;  %v92_v43 = vld [vmem:[#allocation2 + $0x8] sm:$0xff]  ;;  %v94_v44 = vld [vmem:[#allocation2 + $0x18] sm:$0xff]  ;;  %v91_v45 = vld [vmem:[#allocation2] sm:$0xff]  ;;  %v5391_v46 = vpack.c.bf16 %v368_v38, %v364_v37  ;;  %v5393_v48 = vpack.c.bf16 %v370_v41, %v366_v40 }
  0x1a   :  { %254 = vmatprep.subr.mxu1 %v106_v28  ;;  %178 = vmatpush1.msra.mxu0 %v103_v29  ;;  %v93_v47 = vld [vmem:[#allocation2 + $0x10] sm:$0xff]  ;;  %v363_v55 = vld [vmem:[#allocation2 + $0x300] sm:$0xff]  ;;  %v356_v59 = vld [vmem:[#allocation2 + $0x2c8] sm:$0xff] }
  0x1b   :  { %255 = vmatpush1.msra.mxu1 %v105_v30  ;;  %179 = vmatprep.subr.mxu0 %v100_v31  ;;  %7930 = vst [vmem:[#allocation8_spill] sm:$0xff] %v5391_v46  ;;  %7931 = vst [vmem:[#allocation9_spill] sm:$0xff] %v5393_v48  ;;  %v367_v56 = vld [vmem:[#allocation2 + $0x320] sm:$0xff]  ;;  %v365_v57 = vld [vmem:[#allocation2 + $0x310] sm:$0xff] }
  0x1c   :  { %256 = vmatprep.subr.mxu1 %v102_v32  ;;  %180 = vmatpush1.msra.mxu0 %v99_v33  ;;  %v369_v58 = vld [vmem:[#allocation2 + $0x330] sm:$0xff]  ;;  %v360_v60 = vld [vmem:[#allocation2 + $0x2e8] sm:$0xff]  ;;  %v5403_v63 = vpack.c.bf16 %v367_v56, %v363_v55  ;;  %v358_v5 = vld [vmem:[#allocation2 + $0x2d8] sm:$0xff] }
  0x1d   :  { %257 = vmatpush1.msra.mxu1 %v101_v34  ;;  %181 = vmatprep.subr.mxu0 %v96_v35  ;;  %v362_v6 = vld [vmem:[#allocation2 + $0x2f8] sm:$0xff]  ;;  %v355_v7 = vld [vmem:[#allocation2 + $0x2c0] sm:$0xff]  ;;  %v5408_v0 = vpack.c.bf16 %v369_v58, %v365_v57  ;;  %v357_v9 = vld [vmem:[#allocation2 + $0x2d0] sm:$0xff]  ;;  %v5413_v14 = vpack.c.bf16 %v360_v60, %v356_v59 }
  0x1e   :  { %258 = vmatprep.subr.mxu1 %v98_v36  ;;  %182 = vmatpush1.msra.mxu0 %v95_v39  ;;  %v359_v8 = vld [vmem:[#allocation2 + $0x2e0] sm:$0xff]  ;;  %v361_v10 = vld [vmem:[#allocation2 + $0x2f0] sm:$0xff]  ;;  %v348_v11 = vld [vmem:[#allocation2 + $0x288] sm:$0xff]  ;;  %v5415_v15 = vpack.c.bf16 %v362_v6, %v358_v5 }
  0x1f   :  { %259 = vmatpush1.msra.mxu1 %v97_v42  ;;  %183 = vmatprep.subr.mxu0 %v92_v43  ;;  %v352_v12 = vld [vmem:[#allocation2 + $0x2a8] sm:$0xff]  ;;  %v350_v16 = vld [vmem:[#allocation2 + $0x298] sm:$0xff]  ;;  %v5422_v19 = vpack.c.bf16 %v359_v8, %v355_v7  ;;  %v5424_v20 = vpack.c.bf16 %v361_v10, %v357_v9  ;;  %v347_v21 = vld [vmem:[#allocation2 + $0x280] sm:$0xff] }
  0x20   :  { %260 = vmatprep.subr.mxu1 %v94_v44  ;;  %184 = vmatpush1.msra.mxu0 %v91_v45  ;;  %v354_v17 = vld [vmem:[#allocation2 + $0x2b8] sm:$0xff]  ;;  %v351_v22 = vld [vmem:[#allocation2 + $0x2a0] sm:$0xff]  ;;  %v5428_v23 = vpack.c.bf16 %v352_v12, %v348_v11  ;;  %v349_v25 = vld [vmem:[#allocation2 + $0x290] sm:$0xff] }
  0x21   :  { %261 = vmatpush1.msra.mxu1 %v93_v47  ;;  %465 = vmatprep.subr.bf16.mxu0 %v5391_v46  ;;  %v5430_v24 = vpack.c.bf16 %v354_v17, %v350_v16  ;;  %v353_v26 = vld [vmem:[#allocation2 + $0x2b0] sm:$0xff]  ;;  %v340_v27 = vld [vmem:[#allocation2 + $0x248] sm:$0xff]  ;;  %v342_v29 = vld [vmem:[#allocation2 + $0x258] sm:$0xff]  ;;  %v5438_v31 = vpack.c.bf16 %v351_v22, %v347_v21 }
  0x22   :  { %506 = vmatprep.subr.bf16.mxu1 %v5393_v48  ;;  %4997 = vset.pattern.permute.xlu1 %v7751_v49  ;;  %v344_v28 = vld [vmem:[#allocation2 + $0x268] sm:$0xff]  ;;  %v346_v30 = vld [vmem:[#allocation2 + $0x278] sm:$0xff]  ;;  %v5440_v32 = vpack.c.bf16 %v353_v26, %v349_v25  ;;  %v339_v33 = vld [vmem:[#allocation2 + $0x240] sm:$0xff] }
  0x23   :  { %4996 = vset.pattern.permute.xlu0 %v7751_v49  ;;  %v343_v34 = vld [vmem:[#allocation2 + $0x260] sm:$0xff]  ;;  %v5444_v35 = vpack.c.bf16 %v344_v28, %v340_v27  ;;  %v5446_v36 = vpack.c.bf16 %v346_v30, %v342_v29  ;;  %v341_v37 = vld [vmem:[#allocation2 + $0x250] sm:$0xff]  ;;  %v332_v39 = vld [vmem:[#allocation2 + $0x208] sm:$0xff] }
  0x24   :  { %v345_v38 = vld [vmem:[#allocation2 + $0x270] sm:$0xff]  ;;  %v336_v40 = vld [vmem:[#allocation2 + $0x228] sm:$0xff]  ;;  %v334_v41 = vld [vmem:[#allocation2 + $0x218] sm:$0xff]  ;;  %v5452_v43 = vpack.c.bf16 %v343_v34, %v339_v33 }
  0x25   :  { %v338_v42 = vld [vmem:[#allocation2 + $0x238] sm:$0xff]  ;;  %v5454_v44 = vpack.c.bf16 %v345_v38, %v341_v37  ;;  %v331_v45 = vld [vmem:[#allocation2 + $0x200] sm:$0xff]  ;;  %v324_v55 = vld [vmem:[#allocation2 + $0x1c8] sm:$0xff] }
  0x26   :  { %v335_v47 = vld [vmem:[#allocation2 + $0x220] sm:$0xff]  ;;  %v328_v56 = vld [vmem:[#allocation2 + $0x1e8] sm:$0xff]  ;;  %v326_v57 = vld [vmem:[#allocation2 + $0x1d8] sm:$0xff] }
  0x27   :  { %v330_v58 = vld [vmem:[#allocation2 + $0x1f8] sm:$0xff]  ;;  %v5464_v59 = vpack.c.bf16 %v335_v47, %v331_v45  ;;  %v5470_v5 = vpack.c.bf16 %v328_v56, %v324_v55  ;;  %v325_v7 = vld [vmem:[#allocation2 + $0x1d0] sm:$0xff]  ;;  %v316_v9 = vld [vmem:[#allocation2 + $0x188] sm:$0xff]  ;;  %v5550_v56 = vsub.s32 3, %v5373_v2 }
  0x28   :  { %v5472_v6 = vpack.c.bf16 %v330_v58, %v326_v57  ;;  %v329_v8 = vld [vmem:[#allocation2 + $0x1f0] sm:$0xff]  ;;  %v320_v10 = vld [vmem:[#allocation2 + $0x1a8] sm:$0xff]  ;;  %v318_v11 = vld [vmem:[#allocation2 + $0x198] sm:$0xff] }
  0x29   :  { %7933 = vst [vmem:[#allocation11_spill] sm:$0xff] %v5464_v59  ;;  %7935 = vst [vmem:[#allocation13_spill] sm:$0xff] %v5470_v5  ;;  %v322_v12 = vld [vmem:[#allocation2 + $0x1b8] sm:$0xff]  ;;  %v5478_v16 = vpack.c.bf16 %v329_v8, %v325_v7  ;;  %v315_v17 = vld [vmem:[#allocation2 + $0x180] sm:$0xff]  ;;  %v5482_v21 = vpack.c.bf16 %v320_v10, %v316_v9 }
  0x2a   :  { %7936 = vst [vmem:[#allocation14_spill] sm:$0xff] %v5472_v6  ;;  %v5484_v22 = vpack.c.bf16 %v322_v12, %v318_v11  ;;  %v317_v25 = vld [vmem:[#allocation2 + $0x190] sm:$0xff]  ;;  %v308_v27 = vld [vmem:[#allocation2 + $0x148] sm:$0xff]  ;;  %v310_v29 = vld [vmem:[#allocation2 + $0x158] sm:$0xff] }
  0x2b   :  { %7938 = vst [vmem:[#allocation16_spill] sm:$0xff] %v5478_v16  ;;  %7939 = vst [vmem:[#allocation17_spill] sm:$0xff] %v5482_v21  ;;  %v321_v26 = vld [vmem:[#allocation2 + $0x1b0] sm:$0xff]  ;;  %v312_v28 = vld [vmem:[#allocation2 + $0x168] sm:$0xff] }
  0x2c   :  { %7940 = vst [vmem:[#allocation18_spill] sm:$0xff] %v5484_v22  ;;  %v314_v30 = vld [vmem:[#allocation2 + $0x178] sm:$0xff]  ;;  %v5490_v34 = vpack.c.bf16 %v321_v26, %v317_v25  ;;  %v307_v37 = vld [vmem:[#allocation2 + $0x140] sm:$0xff]  ;;  %v5494_v38 = vpack.c.bf16 %v312_v28, %v308_v27  ;;  %7948 = vst [vmem:[#allocation26_spill] sm:$0xff] %v5550_v56 }
  0x2d   :  { %v124_v55 = vld [vmem:[#allocation2 + $0x100] ss:$8 sm:$0xf] }
  0x2e   :  { %7942 = vst [vmem:[#allocation20_spill] sm:$0xff] %v5490_v34  ;;  %7943 = vst [vmem:[#allocation21_spill] sm:$0xff] %v5494_v38  ;;  %v129_v58 = vrot.slane %v124_v55, %v5376_v3  ;;  %v133_v7 = vrot.slane %v124_v55, %v5379_v4  ;;  %v141_v8 = vrot.slane %v124_v55, %v5550_v56 }
  0x87   :  { %v73_v50 = vpop.permute.xlu0 %72  ;;  %v80_v51 = vpop.permute.xlu1 %79 }
  0x88   :  { %v81_v52 = vadd.s32 32, %v73_v50  ;;  %v82_v53 = vadd.s32 32, %v80_v51  ;;  %v5458_v50 = vpack.c.bf16 %v336_v40, %v332_v39  ;;  %v5460_v51 = vpack.c.bf16 %v338_v42, %v334_v41  ;;  %v311_v40 = vld [vmem:[#allocation2 + $0x160] sm:$0xff]  ;;  %v309_v41 = vld [vmem:[#allocation2 + $0x150] sm:$0xff] }
  0x89   :  { %v5496_v39 = vpack.c.bf16 %v314_v30, %v310_v29  ;;  %v313_v42 = vld [vmem:[#allocation2 + $0x170] sm:$0xff]  ;;  %v5500_v45 = vpack.c.bf16 %v311_v40, %v307_v37 }
  0x8a   :  { %vm84_vm0 = vcmp.eq.s32.totalorder %v5400_v54, %v82_v53  ;;  %vm83_vm2 = vcmp.eq.s32.totalorder %v5400_v54, %v81_v52  ;;  %v333_v52 = vld [vmem:[#allocation2 + $0x210] sm:$0xff]  ;;  %v5502_v47 = vpack.c.bf16 %v313_v42, %v309_v41 }
  0x8b   :  { %v57_v61 = vpop.permute.xlu0 %56  ;;  %v64_v62 = vpop.permute.xlu1 %63  ;;  %v337_v53 = vld [vmem:[#allocation2 + $0x230] sm:$0xff]  ;;  %7944 = vst [vmem:[#allocation22_spill] sm:$0xff] %v5496_v39  ;;  %7945 = vst [vmem:[#allocation23_spill] sm:$0xff] %v5500_v45 }
  0x8c   :  { %vm65_vm3 = vcmp.eq.s32.totalorder %v5400_v54, %v57_v61  ;;  %vm66_vm4 = vcmp.eq.s32.totalorder %v5400_v54, %v64_v62  ;;  %v5466_v60 = vpack.c.bf16 %v337_v53, %v333_v52  ;;  %v323_v61 = vld [vmem:[#allocation2 + $0x1c0] sm:$0xff]  ;;  %7946 = vst [vmem:[#allocation24_spill] sm:$0xff] %v5502_v47  ;;  %v5547_v53 = vsub.s32 2, %v5373_v2 }
  0x8d   :  { %vm85_vm5 = vmor %vm65_vm3, %vm83_vm2  ;;  %v327_v62 = vld [vmem:[#allocation2 + $0x1e0] sm:$0xff]  ;;  %vm1716_vm2 = vcmask 1044480   ;;  %vm1719_vm3 = vcmask 1045504  }
  0x8e   :  { %v4609_v13 = vsel %vm85_vm5, 1.0, %v7749_v1  ;;  %vm86_vm6 = vmor %vm66_vm4, %vm84_vm0  ;;  %7934 = vst [vmem:[#allocation12_spill] sm:$0xff] %v5466_v60  ;;  %v45_v52 = vld [vmem:[#allocation2 + $0x120] ss:$8 sm:$0xf]  ;;  %vm1713_vm0 = vcmask 1043456  }
  0x8f   :  { %4611 = vmatmul.mubr.msk.f32.vlgmr.msra.gmra.mxu0 %vm146_vm1, %v4609_v13  ;;  %4613 = vmatmul.mubr.msk.f32.vlgmr.msra.gmra.mxu1 %vm146_vm1, %v4609_v13  ;;  %v4610_v18 = vsel %vm86_vm6, 1.0, %v7749_v1  ;;  %v5476_v13 = vpack.c.bf16 %v327_v62, %v323_v61  ;;  %vm46_vm7 = vcmp.gt.f32.partialorder %v45_v52, 0.5  ;;  %7947 = vst [vmem:[#allocation25_spill] sm:$0xff] %v5547_v53  ;;  %v137_v61 = vrot.slane %v124_v55, %v5547_v53 }
  0x90   :  { %466 = vmatpush1.bf16.msra.mxu0 %v5403_v63  ;;  %507 = vmatpush1.bf16.msra.mxu1 %v5408_v0  ;;  %v403_v57 = vsel %vm46_vm7, 1, %v7751_v49  ;;  %vm1722_vm4 = vcmask 1046528   ;;  %vm5319_vm5 = vmmov 0   ;;  %vm4407_vm6 = vcmask 31744  }
  0x91   :  { %223 = vmatprep.mubr.f32.mxu0 %v7749_v1  ;;  %300 = vmatprep.mubr.f32.mxu1 %v7749_v1  ;;  %7937 = vst [vmem:[#allocation15_spill] sm:$0xff] %v5476_v13  ;;  %v407_v62 = vrot.slane %v403_v57, %v5376_v3  ;;  %v419_v27 = vrot.slane %v403_v57, %v5550_v56 }
  0x92   :  { %467 = vmatprep.subr.bf16.mxu0 %v5413_v14  ;;  %508 = vmatprep.subr.bf16.mxu1 %v5415_v15 }
  0x93   :  { %4612 = vmatmul.mubr.msk.f32.gmra.mxu0 %vm146_vm1, %v4610_v18  ;;  %4614 = vmatmul.mubr.msk.f32.gmra.mxu1 %vm146_vm1, %v4610_v18  ;;  %v319_v18 = vld [vmem:[#allocation2 + $0x1a0] sm:$0xff]  ;;  %vm5565_vm8 = vcmp.eq.s32.totalorder %v407_v62, 1  ;;  %vm5590_vm12 = vcmp.eq.s32.totalorder %v419_v27, 1 }
  0x94   :  { %468 = vmatpush1.bf16.msra.mxu0 %v5422_v19  ;;  %509 = vmatpush1.bf16.msra.mxu1 %v5424_v20  ;;  %v5488_v33 = vpack.c.bf16 %v319_v18, %v315_v17  ;;  %v415_v17 = vrot.slane %v403_v57, %v5547_v53  ;;  %v411_v18 = vrot.slane %v403_v57, %v5379_v4 }
  0x95   :  { %469 = vmatprep.subr.bf16.mxu0 %v5428_v23  ;;  %510 = vmatprep.subr.bf16.mxu1 %v5430_v24 }
  0x96   :  { %497 = vmatprep.mubr.bf16.mxu0 %v7751_v49  ;;  %538 = vmatprep.mubr.bf16.mxu1 %v7751_v49  ;;  %7941 = vst [vmem:[#allocation19_spill] sm:$0xff] %v5488_v33  ;;  %vm5576_vm10 = vcmp.eq.s32.totalorder %v415_v17, 1  ;;  %vm5586_vm11 = vcmp.eq.s32.totalorder %v411_v18, 1 }
  0x98   :  { %470 = vmatpush1.bf16.msra.mxu0 %v5438_v31  ;;  %511 = vmatpush1.bf16.msra.mxu1 %v5440_v32 }
  0x99   :  { %471 = vmatprep.subr.bf16.mxu0 %v5444_v35  ;;  %512 = vmatprep.subr.bf16.mxu1 %v5446_v36 }
  0x9c   :  { %472 = vmatpush1.bf16.msra.mxu0 %v5452_v43  ;;  %513 = vmatpush1.bf16.msra.mxu1 %v5454_v44 }
  0x9d   :  { %473 = vmatprep.subr.bf16.mxu0 %v5458_v50  ;;  %514 = vmatprep.subr.bf16.mxu1 %v5460_v51 }
  0xa0   :  { %474 = vmatpush1.bf16.msra.mxu0 %v5464_v59  ;;  %515 = vmatpush1.bf16.msra.mxu1 %v5466_v60 }
  0xa1   :  { %475 = vmatprep.subr.bf16.mxu0 %v5470_v5  ;;  %516 = vmatprep.subr.bf16.mxu1 %v5472_v6 }
  0xa4   :  { %476 = vmatpush1.bf16.msra.mxu0 %v5476_v13  ;;  %517 = vmatpush1.bf16.msra.mxu1 %v5478_v16 }
  0xa5   :  { %477 = vmatprep.subr.bf16.mxu0 %v5482_v21  ;;  %518 = vmatprep.subr.bf16.mxu1 %v5484_v22 }
  0xa8   :  { %478 = vmatpush1.bf16.msra.mxu0 %v5488_v33  ;;  %519 = vmatpush1.bf16.msra.mxu1 %v5490_v34 }
  0xa9   :  { %479 = vmatprep.subr.bf16.mxu0 %v5494_v38  ;;  %520 = vmatprep.subr.bf16.mxu1 %v5496_v39 }
  0xac   :  { %480 = vmatpush1.bf16.msra.mxu0 %v5500_v45  ;;  %521 = vmatpush1.bf16.msra.mxu1 %v5502_v47 }
  0xad   :  { %604 = vmatprep.subr.bf16.mxu0 %v5391_v46  ;;  %645 = vmatprep.subr.bf16.mxu1 %v5393_v48 }
  0xaf   :  { %498 = vmatmul.mubr.bf16.vlgmr.msra.gmra.mxu0 %v7751_v49  ;;  %539 = vmatmul.mubr.bf16.vlgmr.msra.gmra.mxu1 %v7751_v49 }
  0xb0   :  { %605 = vmatpush1.bf16.msra.mxu0 %v5403_v63  ;;  %646 = vmatpush1.bf16.msra.mxu1 %v5408_v0 }
  0xb1   :  { %606 = vmatprep.subr.bf16.mxu0 %v5413_v14  ;;  %647 = vmatprep.subr.bf16.mxu1 %v5415_v15 }
  0xb2   :  { %636 = vmatprep.mubr.bf16.mxu0 %v7751_v49  ;;  %677 = vmatprep.mubr.bf16.mxu1 %v7751_v49 }
  0xb4   :  { %607 = vmatpush1.bf16.msra.mxu0 %v5422_v19  ;;  %648 = vmatpush1.bf16.msra.mxu1 %v5424_v20 }
  0xb5   :  { %608 = vmatprep.subr.bf16.mxu0 %v5428_v23  ;;  %649 = vmatprep.subr.bf16.mxu1 %v5430_v24 }
  0xb8   :  { %609 = vmatpush1.bf16.msra.mxu0 %v5438_v31  ;;  %650 = vmatpush1.bf16.msra.mxu1 %v5440_v32 }
  0xb9   :  { %610 = vmatprep.subr.bf16.mxu0 %v5444_v35  ;;  %651 = vmatprep.subr.bf16.mxu1 %v5446_v36 }
  0xbc   :  { %611 = vmatpush1.bf16.msra.mxu0 %v5452_v43  ;;  %652 = vmatpush1.bf16.msra.mxu1 %v5454_v44 }
  0xbd   :  { %612 = vmatprep.subr.bf16.mxu0 %v5458_v50  ;;  %653 = vmatprep.subr.bf16.mxu1 %v5460_v51 }
  0xc0   :  { %613 = vmatpush1.bf16.msra.mxu0 %v5464_v59  ;;  %654 = vmatpush1.bf16.msra.mxu1 %v5466_v60 }
  0xc1   :  { %614 = vmatprep.subr.bf16.mxu0 %v5470_v5  ;;  %655 = vmatprep.subr.bf16.mxu1 %v5472_v6 }
  0xc4   :  { %615 = vmatpush1.bf16.msra.mxu0 %v5476_v13  ;;  %656 = vmatpush1.bf16.msra.mxu1 %v5478_v16 }
  0xc5   :  { %616 = vmatprep.subr.bf16.mxu0 %v5482_v21  ;;  %657 = vmatprep.subr.bf16.mxu1 %v5484_v22 }
  0xc8   :  { %617 = vmatpush1.bf16.msra.mxu0 %v5488_v33  ;;  %658 = vmatpush1.bf16.msra.mxu1 %v5490_v34 }
  0xc9   :  { %618 = vmatprep.subr.bf16.mxu0 %v5494_v38  ;;  %659 = vmatprep.subr.bf16.mxu1 %v5496_v39 }
  0xcc   :  { %619 = vmatpush1.bf16.msra.mxu0 %v5500_v45  ;;  %660 = vmatpush1.bf16.msra.mxu1 %v5502_v47 }
  0xcd   :  { %747 = vmatprep.subr.bf16.mxu0 %v5391_v46  ;;  %788 = vmatprep.subr.bf16.mxu1 %v5393_v48 }
 0x14f   :  { %v219_v9 = vpop.f32.mrf.mxu0  ;;  %v296_v10 = vpop.f32.mrf.mxu1 }
 0x150   :  { %v5558_v11 = vadd.f32 %v219_v9, %v129_v58  ;;  %v5560_v12 = vadd.f32 %v296_v10, %v137_v61 }
 0x151   :  { %v221_v25 = vpop.f32.mrf.mxu0  ;;  %v298_v26 = vpop.f32.mrf.mxu1 }
 0x152   :  { %v5569_v29 = vadd.f32 %v221_v25, %v133_v7  ;;  %v5571_v30 = vadd.f32 %v298_v26, %v141_v8  ;;  %v445_v41 = vrot.slane %v5558_v11, 7  ;;  %v451_v42 = vrot.slane %v5560_v12, 7 }
 0x153   :  { %v225_v37 = vpop.f32.mrf.mxu0  ;;  %v302_v40 = vpop.f32.mrf.mxu1  ;;  %v572_v52 = vrot.slane %v5558_v11, 1  ;;  %v584_v9 = vrot.slane %v5558_v11, 6  ;;  %v576_v10 = vrot.slane %v5560_v12, 1  ;;  %v860_v60 = vrot.slane %v5560_v12, 3 }
 0x154   :  { %v5580_v57 = vadd.f32 %v225_v37, %v129_v58  ;;  %v5582_v62 = vadd.f32 %v302_v40, %v137_v61  ;;  %v448_v49 = vrot.slane %v5569_v29, 7  ;;  %v454_v58 = vrot.slane %v5571_v30, 7 }
 0x155   :  { %v227_v17 = vpop.f32.mrf.mxu0  ;;  %v304_v1 = vpop.f32.mrf.mxu1  ;;  %v590_v61 = vrot.slane %v5560_v12, 6  ;;  %v574_v37 = vrot.slane %v5569_v29, 1  ;;  %v587_v48 = vrot.slane %v5569_v29, 6  ;;  %v593_v46 = vrot.slane %v5571_v30, 6 }
 0x156   :  { %v5598_v40 = vadd.f32 %v227_v17, %v133_v7  ;;  %v5600_v18 = vadd.f32 %v304_v1, %v141_v8  ;;  %v432_v54 = vrot.slane %v5580_v57, 7  ;;  %v446_v27 = vrot.slane %v5580_v57, 6 }
 0x157   :  { %v437_v56 = vrot.slane %v5582_v62, 7  ;;  %v452_v4 = vrot.slane %v5582_v62, 6  ;;  %v5608_v53 = vsel %vm433_vm9, %v5580_v57, %v572_v52  ;;  %v585_v3 = vrot.slane %v5580_v57, 5 }
 0x158   :  { %7957 = vst [vmem:[#allocation27_spill] sm:$0xff] %v5608_v53  ;;  %v5613_v7 = vsel %vm433_vm9, %v432_v54, %v5558_v11  ;;  %v5616_v1 = vsel %vm433_vm9, %v446_v27, %v445_v41  ;;  %v435_v8 = vrot.slane %v5598_v40, 7  ;;  %v449_v17 = vrot.slane %v5598_v40, 6 }
 0x159   :  { %7958 = vst [vmem:[#allocation28_spill] sm:$0xff] %v5613_v7  ;;  %7959 = vst [vmem:[#allocation29_spill] sm:$0xff] %v5616_v1  ;;  %v439_v2 = vrot.slane %v5600_v18, 7  ;;  %v578_v52 = vrot.slane %v5571_v30, 1  ;;  %v5630_v41 = vsel %vm433_vm9, %v437_v56, %v5560_v12  ;;  %v5633_v27 = vsel %vm433_vm9, %v452_v4, %v451_v42 }
 0x15a   :  { %7960 = vst [vmem:[#allocation30_spill] sm:$0xff] %v5630_v41  ;;  %7961 = vst [vmem:[#allocation31_spill] sm:$0xff] %v5633_v27  ;;  %v455_v47 = vrot.slane %v5600_v18, 6  ;;  %v5638_v45 = vsel %vm433_vm9, %v435_v8, %v5569_v29  ;;  %v5641_v39 = vsel %vm433_vm9, %v449_v17, %v448_v49  ;;  %v5644_v38 = vsel %vm433_vm9, %v585_v3, %v584_v9 }
 0x15b   :  { %7962 = vst [vmem:[#allocation32_spill] sm:$0xff] %v5638_v45  ;;  %7963 = vst [vmem:[#allocation33_spill] sm:$0xff] %v5641_v39  ;;  %v5648_v54 = vsel %vm433_vm9, %v5582_v62, %v576_v10  ;;  %v5652_v4 = vsel %vm433_vm9, %v439_v2, %v5571_v30  ;;  %v591_v42 = vrot.slane %v5582_v62, 5  ;;  %v5661_v49 = vsel %vm433_vm9, %v5598_v40, %v574_v37 }
 0x15c   :  { %7964 = vst [vmem:[#allocation34_spill] sm:$0xff] %v5644_v38  ;;  %7965 = vst [vmem:[#allocation35_spill] sm:$0xff] %v5648_v54  ;;  %v5664_v3 = vsel %vm433_vm9, %v455_v47, %v454_v58  ;;  %v588_v9 = vrot.slane %v5598_v40, 5  ;;  %v5669_v2 = vsel %vm433_vm9, %v5600_v18, %v578_v52  ;;  %v594_v10 = vrot.slane %v5600_v18, 5 }
 0x15d   :  { %7966 = vst [vmem:[#allocation36_spill] sm:$0xff] %v5652_v4  ;;  %7967 = vst [vmem:[#allocation37_spill] sm:$0xff] %v5661_v49  ;;  %v5673_v8 = vsel %vm433_vm9, %v591_v42, %v590_v61  ;;  %v711_v17 = vrot.slane %v5558_v11, 2  ;;  %v712_v56 = vrot.slane %v5580_v57, 1  ;;  %v727_v37 = vrot.slane %v5558_v11, 5 }
 0x15e   :  { %7968 = vst [vmem:[#allocation38_spill] sm:$0xff] %v5664_v3  ;;  %7969 = vst [vmem:[#allocation39_spill] sm:$0xff] %v5669_v2  ;;  %v5683_v58 = vsel %vm433_vm9, %v588_v9, %v587_v48  ;;  %v5686_v52 = vsel %vm433_vm9, %v594_v10, %v593_v46  ;;  %v728_v61 = vrot.slane %v5580_v57, 4  ;;  %v717_v48 = vrot.slane %v5560_v12, 2 }
 0x15f   :  { %7970 = vst [vmem:[#allocation40_spill] sm:$0xff] %v5673_v8  ;;  %7971 = vst [vmem:[#allocation41_spill] sm:$0xff] %v5683_v58  ;;  %v5698_v47 = vsel %vm433_vm9, %v712_v56, %v711_v17  ;;  %v718_v9 = vrot.slane %v5582_v62, 1  ;;  %v733_v10 = vrot.slane %v5560_v12, 5  ;;  %v734_v33 = vrot.slane %v5582_v62, 4 }
 0x160   :  { %7972 = vst [vmem:[#allocation42_spill] sm:$0xff] %v5686_v52  ;;  %v5702_v46 = vsel %vm433_vm9, %v728_v61, %v727_v37  ;;  %v714_v34 = vrot.slane %v5569_v29, 2  ;;  %v715_v56 = vrot.slane %v5598_v40, 1  ;;  %v730_v17 = vrot.slane %v5569_v29, 5 }
 0x161   :  { %v5715_v37 = vsel %vm433_vm9, %v718_v9, %v717_v48  ;;  %v5718_v61 = vsel %vm433_vm9, %v734_v33, %v733_v10  ;;  %v731_v22 = vrot.slane %v5598_v40, 4  ;;  %v720_v21 = vrot.slane %v5571_v30, 2 }
 0x162   :  { %7973 = vst [vmem:[#allocation43_spill] sm:$0xff] %v5715_v37  ;;  %7974 = vst [vmem:[#allocation44_spill] sm:$0xff] %v5718_v61  ;;  %v5727_v16 = vsel %vm433_vm9, %v715_v56, %v714_v34  ;;  %v721_v13 = vrot.slane %v5600_v18, 1  ;;  %v736_v48 = vrot.slane %v5571_v30, 5  ;;  %v737_v33 = vrot.slane %v5600_v18, 4 }
 0x163   :  { %7975 = vst [vmem:[#allocation45_spill] sm:$0xff] %v5727_v16  ;;  %v5732_v9 = vsel %vm433_vm9, %v731_v22, %v730_v17  ;;  %v854_v10 = vrot.slane %v5558_v11, 3  ;;  %v855_v6 = vrot.slane %v5580_v57, 2  ;;  %v870_v56 = vrot.slane %v5558_v11, 4 }
 0x164   :  { %7976 = vst [vmem:[#allocation46_spill] sm:$0xff] %v5732_v9  ;;  %v5742_v34 = vsel %vm433_vm9, %v721_v13, %v720_v21  ;;  %v871_v5 = vrot.slane %v5580_v57, 3  ;;  %v5747_v22 = vsel %vm433_vm9, %v737_v33, %v736_v48  ;;  %v861_v59 = vrot.slane %v5582_v62, 2 }
 0x165   :  { %7977 = vst [vmem:[#allocation47_spill] sm:$0xff] %v5742_v34  ;;  %7978 = vst [vmem:[#allocation48_spill] sm:$0xff] %v5747_v22  ;;  %v5750_v17 = vsel %vm433_vm9, %v855_v6, %v854_v10  ;;  %v876_v11 = vrot.slane %v5560_v12, 4  ;;  %v877_v57 = vrot.slane %v5582_v62, 3  ;;  %v857_v33 = vrot.slane %v5569_v29, 3 }
 0x166   :  { %7979 = vst [vmem:[#allocation49_spill] sm:$0xff] %v5750_v17  ;;  %v5759_v21 = vsel %vm433_vm9, %v871_v5, %v870_v56  ;;  %v5768_v48 = vsel %vm433_vm9, %v861_v59, %v860_v60  ;;  %v858_v10 = vrot.slane %v5598_v40, 2  ;;  %v873_v5 = vrot.slane %v5569_v29, 4 }
 0x167   :  { %7980 = vst [vmem:[#allocation50_spill] sm:$0xff] %v5759_v21  ;;  %7981 = vst [vmem:[#allocation51_spill] sm:$0xff] %v5768_v48  ;;  %v5773_v13 = vsel %vm433_vm9, %v877_v57, %v876_v11  ;;  %v874_v12 = vrot.slane %v5598_v40, 3  ;;  %v863_v62 = vrot.slane %v5571_v30, 3  ;;  %v864_v60 = vrot.slane %v5600_v18, 2 }
 0x168   :  { %7982 = vst [vmem:[#allocation52_spill] sm:$0xff] %v5773_v13  ;;  %v5783_v59 = vsel %vm433_vm9, %v858_v10, %v857_v33  ;;  %v879_v6 = vrot.slane %v5571_v30, 4  ;;  %v880_v29 = vrot.slane %v5600_v18, 3 }
 0x169   :  { %7983 = vst [vmem:[#allocation53_spill] sm:$0xff] %v5783_v59  ;;  %v5788_v11 = vsel %vm433_vm9, %v874_v12, %v873_v5  ;;  %v5804_v33 = vsel %vm433_vm9, %v864_v60, %v863_v62  ;;  %v7987_v62 = vsel %vm5565_vm8, %v5613_v7, %v5616_v1  ;;  %v8007_v59 = vsel %vm5586_vm11, %v5661_v49, %v5683_v58 }
 0x16a   :  { %7984 = vst [vmem:[#allocation54_spill] sm:$0xff] %v5788_v11  ;;  %7985 = vst [vmem:[#allocation55_spill] sm:$0xff] %v5804_v33  ;;  %v5815_v5 = vsel %vm433_vm9, %v880_v29, %v879_v6  ;;  %v462_v29 = vsel %vm5586_vm11, %v5638_v45, %v5641_v39  ;;  %v8006_v39 = vsel %vm5565_vm8, %v5608_v53, %v5644_v38 }
 0x16b   :  { %7986 = vst [vmem:[#allocation56_spill] sm:$0xff] %v5815_v5  ;;  %v8009_v49 = vsel %vm5590_vm12, %v5669_v2, %v5686_v52 }
 0x16c   :  { %v8016_v2 = vld [vmem:[#allocation47_spill] sm:$0xff]  ;;  %v8017_v52 = vld [vmem:[#allocation48_spill] sm:$0xff] }
 0x16f   :  { %v499_v57 = vpop.f32.mrf.mxu0  ;;  %v540_v10 = vpop.f32.mrf.mxu1 }
 0x170   :  { %v500_v18 = vadd.f32 %v499_v57, %v7987_v62  ;;  %v463_v62 = vsel %vm5576_vm10, %v5630_v41, %v5633_v27 }
 0x171   :  { %v501_v40 = vpop.f32.mrf.mxu0  ;;  %v542_v6 = vpop.f32.mrf.mxu1  ;;  %v541_v12 = vadd.f32 %v540_v10, %v463_v62 }
 0x172   :  { %v4615_v56 = vmul.f32 -1.442695, %v500_v18  ;;  %v502_v30 = vadd.f32 %v501_v40, %v462_v29  ;;  %v464_v18 = vsel %vm5590_vm12, %v5652_v4, %v5664_v3  ;;  %v8004_v4 = vld [vmem:[#allocation8_spill] sm:$0xff]  ;;  %v8005_v3 = vld [vmem:[#allocation9_spill] sm:$0xff] }
 0x173   :  { %v503_v42 = vpop.f32.mrf.mxu0  ;;  %v544_v5 = vpop.f32.mrf.mxu1  ;;  %v4617_v45 = vmul.f32 -1.442695, %v541_v12 }
 0x174   :  { %5002 = vpow2.f32 %v4615_v56  ;;  %v4616_v57 = vmul.f32 -1.442695, %v502_v30  ;;  %v543_v42 = vadd.f32 %v542_v6, %v464_v18 }
 0x175   :  { %v504_v7 = vpop.f32.mrf.mxu0  ;;  %v545_v1 = vpop.f32.mrf.mxu1 }
 0x176   :  { %5004 = vpow2.f32 %v4616_v57 }
 0x177   :  { %5006 = vpow2.f32 %v4617_v45 }
 0x181   :  { %v5003_v40 = vpop.eup %5002 }
 0x182   :  { %v556_v5 = vadd.f32 1.0, %v5003_v40 }
 0x183   :  { %v5005_v56 = vpop.eup %5004 }
 0x184   :  { %5008 = vrcp.f32 %v556_v5  ;;  %v557_v7 = vadd.f32 1.0, %v5005_v56  ;;  %v5007_v1 = vpop.eup %5006  ;;  %v7990_v5 = vld [vmem:[#allocation11_spill] sm:$0xff]  ;;  %v7991_v56 = vld [vmem:[#allocation12_spill] sm:$0xff] }
 0x185   :  { %5010 = vtanh.f32 %v543_v42  ;;  %v558_v10 = vadd.f32 1.0, %v5007_v1  ;;  %v7989_v42 = vmov 0   ;;  %v7993_v1 = vld [vmem:[#allocation14_spill] sm:$0xff] }
 0x186   :  { %5012 = vrcp.f32 %v557_v7  ;;  %v7992_v7 = vld [vmem:[#allocation13_spill] sm:$0xff] }
 0x187   :  { %5014 = vrcp.f32 %v558_v10  ;;  %v7997_v10 = vld [vmem:[#allocation18_spill] sm:$0xff] }
 0x191   :  { %v5009_v30 = vpop.eup %5008 }
 0x192   :  { %v5011_v29 = vpop.eup %5010 }
 0x193   :  { %v5013_v57 = vpop.eup %5012  ;;  %v567_v62 = vmul.f32 %v5011_v29, %v5009_v30  ;;  %v7994_v30 = vld [vmem:[#allocation15_spill] sm:$0xff]  ;;  %v7995_v29 = vld [vmem:[#allocation16_spill] sm:$0xff] }
 0x194   :  { %v566_v12 = vmul.f32 0.0, %v5013_v57  ;;  %v5015_v6 = vpop.eup %5014  ;;  %v7996_v57 = vld [vmem:[#allocation17_spill] sm:$0xff] }
 0x196   :  { %v5886_v60 = vadd.f32 %v567_v62, %v566_v12  ;;  %v7998_v12 = vld [vmem:[#allocation19_spill] sm:$0xff]  ;;  %v7999_v62 = vld [vmem:[#allocation20_spill] sm:$0xff] }
 0x198   :  { %5016 = vtanh.f32 %v5886_v60 }
 0x1a5   :  { %v5017_v18 = vpop.eup %5016 }
 0x1a6   :  { %v5889_v40 = vmul.f32 %v5017_v18, %v5015_v6  ;;  %v8000_v6 = vld [vmem:[#allocation21_spill] sm:$0xff]  ;;  %v8001_v18 = vld [vmem:[#allocation22_spill] sm:$0xff] }
 0x1a8   :  { %7988 = vst [vmem:[#allocation57_spill] sm:$0xff] %v5889_v40  ;;  %v571_v45 = vpack.c.bf16 %v5889_v40, %v5889_v40  ;;  %v8003_v40 = vld [vmem:[#allocation24_spill] sm:$0xff] }
 0x1aa   :  { %637 = vmatmul.mubr.bf16.vlgmr.msra.gmra.mxu0 %v571_v45  ;;  %678 = vmatmul.mubr.bf16.vlgmr.msra.gmra.mxu1 %v571_v45  ;;  %v8002_v45 = vld [vmem:[#allocation23_spill] sm:$0xff] }
 0x1ab   :  { %748 = vmatpush1.bf16.msra.mxu0 %v5403_v63  ;;  %789 = vmatpush1.bf16.msra.mxu1 %v5408_v0 }
 0x1ac   :  { %749 = vmatprep.subr.bf16.mxu0 %v5413_v14  ;;  %790 = vmatprep.subr.bf16.mxu1 %v5415_v15 }
 0x1ad   :  { %779 = vmatprep.mubr.bf16.mxu0 %v7989_v42  ;;  %820 = vmatprep.mubr.bf16.mxu1 %v7989_v42 }
 0x1af   :  { %750 = vmatpush1.bf16.msra.mxu0 %v5422_v19  ;;  %791 = vmatpush1.bf16.msra.mxu1 %v5424_v20 }
 0x1b0   :  { %751 = vmatprep.subr.bf16.mxu0 %v5428_v23  ;;  %792 = vmatprep.subr.bf16.mxu1 %v5430_v24 }
 0x1b3   :  { %752 = vmatpush1.bf16.msra.mxu0 %v5438_v31  ;;  %793 = vmatpush1.bf16.msra.mxu1 %v5440_v32 }
 0x1b4   :  { %753 = vmatprep.subr.bf16.mxu0 %v5444_v35  ;;  %794 = vmatprep.subr.bf16.mxu1 %v5446_v36 }
 0x1b7   :  { %754 = vmatpush1.bf16.msra.mxu0 %v5452_v43  ;;  %795 = vmatpush1.bf16.msra.mxu1 %v5454_v44 }
 0x1b8   :  { %755 = vmatprep.subr.bf16.mxu0 %v5458_v50  ;;  %796 = vmatprep.subr.bf16.mxu1 %v5460_v51 }
 0x1bb   :  { %756 = vmatpush1.bf16.msra.mxu0 %v7990_v5  ;;  %797 = vmatpush1.bf16.msra.mxu1 %v7991_v56 }
 0x1bc   :  { %757 = vmatprep.subr.bf16.mxu0 %v7992_v7  ;;  %798 = vmatprep.subr.bf16.mxu1 %v7993_v1 }
 0x1bf   :  { %758 = vmatpush1.bf16.msra.mxu0 %v7994_v30  ;;  %799 = vmatpush1.bf16.msra.mxu1 %v7995_v29 }
 0x1c0   :  { %759 = vmatprep.subr.bf16.mxu0 %v7996_v57  ;;  %800 = vmatprep.subr.bf16.mxu1 %v7997_v10 }
 0x1c3   :  { %760 = vmatpush1.bf16.msra.mxu0 %v7998_v12  ;;  %801 = vmatpush1.bf16.msra.mxu1 %v7999_v62 }
 0x1c4   :  { %761 = vmatprep.subr.bf16.mxu0 %v8000_v6  ;;  %802 = vmatprep.subr.bf16.mxu1 %v8001_v18 }
 0x1c7   :  { %762 = vmatpush1.bf16.msra.mxu0 %v8002_v45  ;;  %803 = vmatpush1.bf16.msra.mxu1 %v8003_v40 }
 0x1c8   :  { %890 = vmatprep.subr.bf16.mxu0 %v8004_v4  ;;  %931 = vmatprep.subr.bf16.mxu1 %v8005_v3 }
 0x26a   :  { %v638_v41 = vpop.f32.mrf.mxu0  ;;  %v679_v27 = vpop.f32.mrf.mxu1 }
 0x26b   :  { %v639_v33 = vadd.f32 %v638_v41, %v8006_v39  ;;  %v8008_v39 = vsel %vm5576_vm10, %v5648_v54, %v5673_v8  ;;  %v8018_v8 = vsel %vm5590_vm12, %v8016_v2, %v8017_v52  ;;  %v8026_v2 = vld [vmem:[#allocation51_spill] sm:$0xff] }
 0x26c   :  { %v640_v13 = vpop.f32.mrf.mxu0  ;;  %v681_v48 = vpop.f32.mrf.mxu1  ;;  %v680_v41 = vadd.f32 %v679_v27, %v8008_v39 }
 0x26d   :  { %v4618_v11 = vmul.f32 -1.442695, %v639_v33  ;;  %v641_v21 = vadd.f32 %v640_v13, %v8007_v59  ;;  %v682_v13 = vadd.f32 %v681_v48, %v8009_v49 }
 0x26e   :  { %v642_v17 = vpop.f32.mrf.mxu0  ;;  %v683_v22 = vpop.f32.mrf.mxu1  ;;  %v4620_v33 = vmul.f32 -1.442695, %v680_v41 }
 0x26f   :  { %5018 = vpow2.f32 %v4618_v11  ;;  %v4619_v34 = vmul.f32 -1.442695, %v641_v21 }
 0x270   :  { %v643_v61 = vpop.f32.mrf.mxu0  ;;  %v684_v37 = vpop.f32.mrf.mxu1 }
 0x271   :  { %5020 = vpow2.f32 %v4619_v34 }
 0x272   :  { %5022 = vpow2.f32 %v4620_v33 }
 0x273   :  { %5024 = vtanh.f32 %v682_v13 }
 0x27c   :  { %v5019_v17 = vpop.eup %5018 }
 0x27d   :  { %v695_v22 = vadd.f32 1.0, %v5019_v17 }
 0x27e   :  { %v5021_v21 = vpop.eup %5020 }
 0x27f   :  { %5026 = vrcp.f32 %v695_v22  ;;  %v696_v37 = vadd.f32 1.0, %v5021_v21  ;;  %v5023_v61 = vpop.eup %5022  ;;  %v8011_v22 = vsel %vm5565_vm8, %v5698_v47, %v5702_v46 }
 0x280   :  { %v5025_v34 = vpop.eup %5024  ;;  %v697_v39 = vadd.f32 1.0, %v5023_v61 }
 0x281   :  { %5028 = vrcp.f32 %v696_v37 }
 0x282   :  { %5030 = vrcp.f32 %v697_v39 }
 0x28c   :  { %v5027_v59 = vpop.eup %5026 }
 0x28d   :  { %v706_v11 = vmul.f32 %v5027_v59, %v5025_v34  ;;  %v8012_v59 = vsel %vm5586_vm11, %v5727_v16, %v5732_v9 }
 0x28e   :  { %v5029_v27 = vpop.eup %5028 }
 0x28f   :  { %v705_v41 = vmul.f32 %v5029_v27, %v5886_v60  ;;  %v5031_v49 = vpop.eup %5030 }
 0x291   :  { %v5948_v54 = vadd.f32 %v706_v11, %v705_v41 }
 0x293   :  { %5032 = vtanh.f32 %v5948_v54 }
 0x2a0   :  { %v5033_v48 = vpop.eup %5032 }
 0x2a1   :  { %v5951_v33 = vmul.f32 %v5033_v48, %v5031_v49 }
 0x2a3   :  { %8010 = vst [vmem:[#allocation11_spill] sm:$0xff] %v5951_v33  ;;  %v710_v13 = vpack.c.bf16 %v5951_v33, %v5951_v33 }
 0x2a5   :  { %780 = vmatmul.mubr.bf16.vlgmr.msra.gmra.mxu0 %v710_v13  ;;  %821 = vmatmul.mubr.bf16.vlgmr.msra.gmra.mxu1 %v710_v13  ;;  %v8013_v13 = vld [vmem:[#allocation43_spill] sm:$0xff] }
 0x2a6   :  { %891 = vmatpush1.bf16.msra.mxu0 %v5403_v63  ;;  %932 = vmatpush1.bf16.msra.mxu1 %v5408_v0 }
 0x2a7   :  { %892 = vmatprep.subr.bf16.mxu0 %v5413_v14  ;;  %933 = vmatprep.subr.bf16.mxu1 %v5415_v15 }
 0x2a8   :  { %922 = vmatprep.mubr.bf16.mxu0 %v7989_v42  ;;  %963 = vmatprep.mubr.bf16.mxu1 %v7989_v42 }
 0x2aa   :  { %893 = vmatpush1.bf16.msra.mxu0 %v5422_v19  ;;  %934 = vmatpush1.bf16.msra.mxu1 %v5424_v20 }
 0x2ab   :  { %894 = vmatprep.subr.bf16.mxu0 %v5428_v23  ;;  %935 = vmatprep.subr.bf16.mxu1 %v5430_v24 }
 0x2ae   :  { %895 = vmatpush1.bf16.msra.mxu0 %v5438_v31  ;;  %936 = vmatpush1.bf16.msra.mxu1 %v5440_v32 }
 0x2af   :  { %896 = vmatprep.subr.bf16.mxu0 %v5444_v35  ;;  %937 = vmatprep.subr.bf16.mxu1 %v5446_v36 }
 0x2b2   :  { %897 = vmatpush1.bf16.msra.mxu0 %v5452_v43  ;;  %938 = vmatpush1.bf16.msra.mxu1 %v5454_v44 }
 0x2b3   :  { %898 = vmatprep.subr.bf16.mxu0 %v5458_v50  ;;  %939 = vmatprep.subr.bf16.mxu1 %v5460_v51 }
 0x2b6   :  { %899 = vmatpush1.bf16.msra.mxu0 %v7990_v5  ;;  %940 = vmatpush1.bf16.msra.mxu1 %v7991_v56 }
 0x2b7   :  { %900 = vmatprep.subr.bf16.mxu0 %v7992_v7  ;;  %941 = vmatprep.subr.bf16.mxu1 %v7993_v1 }
 0x2ba   :  { %901 = vmatpush1.bf16.msra.mxu0 %v7994_v30  ;;  %942 = vmatpush1.bf16.msra.mxu1 %v7995_v29 }
 0x2bb   :  { %902 = vmatprep.subr.bf16.mxu0 %v7996_v57  ;;  %943 = vmatprep.subr.bf16.mxu1 %v7997_v10 }
 0x2be   :  { %903 = vmatpush1.bf16.msra.mxu0 %v7998_v12  ;;  %944 = vmatpush1.bf16.msra.mxu1 %v7999_v62 }
 0x2bf   :  { %904 = vmatprep.subr.bf16.mxu0 %v8000_v6  ;;  %945 = vmatprep.subr.bf16.mxu1 %v8001_v18 }
 0x2c2   :  { %905 = vmatpush1.bf16.msra.mxu0 %v8002_v45  ;;  %946 = vmatpush1.bf16.msra.mxu1 %v8003_v40 }
 0x2c3   :  { %1001 = vmatprep.subr.bf16.mxu0 %v8004_v4  ;;  %1042 = vmatprep.subr.bf16.mxu1 %v8005_v3 }
 0x365   :  { %v781_v60 = vpop.f32.mrf.mxu0  ;;  %v822_v17 = vpop.f32.mrf.mxu1 }
 0x366   :  { %v782_v21 = vadd.f32 %v781_v60, %v8011_v22  ;;  %v8014_v60 = vld [vmem:[#allocation44_spill] sm:$0xff] }
 0x367   :  { %v783_v37 = vpop.f32.mrf.mxu0  ;;  %v824_v61 = vpop.f32.mrf.mxu1  ;;  %v8015_v22 = vsel %vm5576_vm10, %v8013_v13, %v8014_v60  ;;  %v8029_v13 = vld [vmem:[#allocation55_spill] sm:$0xff]  ;;  %v8030_v60 = vld [vmem:[#allocation56_spill] sm:$0xff] }
 0x368   :  { %v4621_v34 = vmul.f32 -1.442695, %v782_v21  ;;  %v784_v11 = vadd.f32 %v783_v37, %v8012_v59  ;;  %v823_v33 = vadd.f32 %v822_v17, %v8015_v22  ;;  %v825_v37 = vadd.f32 %v824_v61, %v8018_v8 }
 0x369   :  { %v785_v27 = vpop.f32.mrf.mxu0  ;;  %v826_v39 = vpop.f32.mrf.mxu1  ;;  %v8031_v16 = vsel %vm5590_vm12, %v8029_v13, %v8030_v60 }
 0x36a   :  { %5034 = vpow2.f32 %v4621_v34  ;;  %v4622_v41 = vmul.f32 -1.442695, %v784_v11  ;;  %v4623_v21 = vmul.f32 -1.442695, %v823_v33 }
 0x36b   :  { %v786_v49 = vpop.f32.mrf.mxu0  ;;  %v827_v48 = vpop.f32.mrf.mxu1 }
 0x36c   :  { %5036 = vpow2.f32 %v4622_v41 }
 0x36d   :  { %5038 = vpow2.f32 %v4623_v21 }
 0x36e   :  { %5040 = vtanh.f32 %v825_v37 }
 0x377   :  { %v5035_v59 = vpop.eup %5034 }
 0x378   :  { %v838_v27 = vadd.f32 1.0, %v5035_v59 }
 0x379   :  { %v5037_v34 = vpop.eup %5036 }
 0x37a   :  { %5042 = vrcp.f32 %v838_v27  ;;  %v839_v11 = vadd.f32 1.0, %v5037_v34  ;;  %v5039_v39 = vpop.eup %5038  ;;  %v8020_v27 = vld [vmem:[#allocation49_spill] sm:$0xff]  ;;  %v8021_v34 = vld [vmem:[#allocation50_spill] sm:$0xff] }
 0x37b   :  { %v5041_v41 = vpop.eup %5040  ;;  %v840_v33 = vadd.f32 1.0, %v5039_v39 }
 0x37c   :  { %5044 = vrcp.f32 %v839_v11  ;;  %v8022_v11 = vsel %vm5565_vm8, %v8020_v27, %v8021_v34 }
 0x37d   :  { %5046 = vrcp.f32 %v840_v33  ;;  %v8024_v33 = vld [vmem:[#allocation54_spill] sm:$0xff] }
 0x387   :  { %v5043_v49 = vpop.eup %5042 }
 0x388   :  { %v849_v48 = vmul.f32 %v5043_v49, %v5041_v41 }
 0x389   :  { %v5045_v17 = vpop.eup %5044 }
 0x38a   :  { %v848_v22 = vmul.f32 %v5045_v17, %v5948_v54  ;;  %v5047_v8 = vpop.eup %5046  ;;  %v8023_v17 = vld [vmem:[#allocation53_spill] sm:$0xff] }
 0x38c   :  { %v6010_v58 = vadd.f32 %v849_v48, %v848_v22  ;;  %v8025_v22 = vsel %vm5586_vm11, %v8023_v17, %v8024_v33 }
 0x38e   :  { %5048 = vtanh.f32 %v6010_v58 }
 0x39b   :  { %v5049_v61 = vpop.eup %5048 }
 0x39c   :  { %v6013_v21 = vmul.f32 %v5049_v61, %v5047_v8 }
 0x39e   :  { %8019 = vst [vmem:[#allocation12_spill] sm:$0xff] %v6013_v21  ;;  %v853_v37 = vpack.c.bf16 %v6013_v21, %v6013_v21 }
 0x3a0   :  { %923 = vmatmul.mubr.bf16.vlgmr.msra.gmra.mxu0 %v853_v37  ;;  %964 = vmatmul.mubr.bf16.vlgmr.msra.gmra.mxu1 %v853_v37 }
 0x3a1   :  { %1002 = vmatpush1.bf16.msra.mxu0 %v5403_v63  ;;  %1043 = vmatpush1.bf16.msra.mxu1 %v5408_v0 }
 0x3a2   :  { %1003 = vmatprep.subr.bf16.mxu0 %v5413_v14  ;;  %1044 = vmatprep.subr.bf16.mxu1 %v5415_v15 }
 0x3a3   :  { %1033 = vmatprep.mubr.bf16.mxu0 %v7989_v42  ;;  %1074 = vmatprep.mubr.bf16.mxu1 %v7989_v42 }
 0x3a5   :  { %1004 = vmatpush1.bf16.msra.mxu0 %v5422_v19  ;;  %1045 = vmatpush1.bf16.msra.mxu1 %v5424_v20 }
 0x3a6   :  { %1005 = vmatprep.subr.bf16.mxu0 %v5428_v23  ;;  %1046 = vmatprep.subr.bf16.mxu1 %v5430_v24 }
 0x3a9   :  { %1006 = vmatpush1.bf16.msra.mxu0 %v5438_v31  ;;  %1047 = vmatpush1.bf16.msra.mxu1 %v5440_v32 }
 0x3aa   :  { %1007 = vmatprep.subr.bf16.mxu0 %v5444_v35  ;;  %1048 = vmatprep.subr.bf16.mxu1 %v5446_v36 }
 0x3ad   :  { %1008 = vmatpush1.bf16.msra.mxu0 %v5452_v43  ;;  %1049 = vmatpush1.bf16.msra.mxu1 %v5454_v44 }
 0x3ae   :  { %1009 = vmatprep.subr.bf16.mxu0 %v5458_v50  ;;  %1050 = vmatprep.subr.bf16.mxu1 %v5460_v51 }
 0x3b1   :  { %1010 = vmatpush1.bf16.msra.mxu0 %v7990_v5  ;;  %1051 = vmatpush1.bf16.msra.mxu1 %v7991_v56 }
 0x3b2   :  { %1011 = vmatprep.subr.bf16.mxu0 %v7992_v7  ;;  %1052 = vmatprep.subr.bf16.mxu1 %v7993_v1 }
 0x3b5   :  { %1012 = vmatpush1.bf16.msra.mxu0 %v7994_v30  ;;  %1053 = vmatpush1.bf16.msra.mxu1 %v7995_v29 }
 0x3b6   :  { %1013 = vmatprep.subr.bf16.mxu0 %v7996_v57  ;;  %1054 = vmatprep.subr.bf16.mxu1 %v7997_v10 }
 0x3b9   :  { %1014 = vmatpush1.bf16.msra.mxu0 %v7998_v12  ;;  %1055 = vmatpush1.bf16.msra.mxu1 %v7999_v62 }
 0x3ba   :  { %1015 = vmatprep.subr.bf16.mxu0 %v8000_v6  ;;  %1056 = vmatprep.subr.bf16.mxu1 %v8001_v18 }
 0x3bd   :  { %1016 = vmatpush1.bf16.msra.mxu0 %v8002_v45  ;;  %1057 = vmatpush1.bf16.msra.mxu1 %v8003_v40 }
 0x3be   :  { %1112 = vmatprep.subr.bf16.mxu0 %v8004_v4  ;;  %1153 = vmatprep.subr.bf16.mxu1 %v8005_v3 }
 0x460   :  { %v924_v54 = vpop.f32.mrf.mxu0  ;;  %v965_v59 = vpop.f32.mrf.mxu1 }
 0x461   :  { %v925_v39 = vadd.f32 %v924_v54, %v8022_v11  ;;  %v8027_v54 = vld [vmem:[#allocation52_spill] sm:$0xff] }
 0x462   :  { %v926_v41 = vpop.f32.mrf.mxu0  ;;  %v967_v49 = vpop.f32.mrf.mxu1  ;;  %v8028_v11 = vsel %vm5576_vm10, %v8026_v2, %v8027_v54 }
 0x463   :  { %v4624_v48 = vmul.f32 -1.442695, %v925_v39  ;;  %v927_v8 = vadd.f32 %v926_v41, %v8025_v22  ;;  %v966_v52 = vadd.f32 %v965_v59, %v8028_v11  ;;  %v968_v41 = vadd.f32 %v967_v49, %v8031_v16 }
 0x464   :  { %v928_v61 = vpop.f32.mrf.mxu0  ;;  %v969_v37 = vpop.f32.mrf.mxu1 }
 0x465   :  { %5050 = vpow2.f32 %v4624_v48  ;;  %v4625_v21 = vmul.f32 -1.442695, %v927_v8  ;;  %v4626_v39 = vmul.f32 -1.442695, %v966_v52 }
 0x466   :  { %v929_v53 = vpop.f32.mrf.mxu0  ;;  %v970_v38 = vpop.f32.mrf.mxu1 }
 0x467   :  { %5052 = vpow2.f32 %v4625_v21 }
 0x468   :  { %5054 = vpow2.f32 %v4626_v39 }
 0x469   :  { %5056 = vtanh.f32 %v968_v41 }
 0x472   :  { %v5051_v22 = vpop.eup %5050 }
 0x473   :  { %v981_v61 = vadd.f32 1.0, %v5051_v22 }
 0x474   :  { %v5053_v48 = vpop.eup %5052 }
 0x475   :  { %5058 = vrcp.f32 %v981_v61  ;;  %v982_v38 = vadd.f32 1.0, %v5053_v48  ;;  %v5055_v53 = vpop.eup %5054  ;;  %v8032_v61 = vsel %vm5565_vm8, %v8021_v34, %v8020_v27  ;;  %v8034_v27 = vsel %vm5576_vm10, %v8027_v54, %v8026_v2 }
 0x476   :  { %v5057_v21 = vpop.eup %5056  ;;  %v983_v52 = vadd.f32 1.0, %v5055_v53 }
 0x477   :  { %5060 = vrcp.f32 %v982_v38 }
 0x478   :  { %5062 = vrcp.f32 %v983_v52 }
 0x482   :  { %v5059_v8 = vpop.eup %5058 }
 0x483   :  { %v992_v37 = vmul.f32 %v5059_v8, %v5057_v21  ;;  %v8033_v8 = vsel %vm5586_vm11, %v8024_v33, %v8023_v17  ;;  %v8035_v17 = vsel %vm5590_vm12, %v8030_v60, %v8029_v13 }
 0x484   :  { %v5061_v59 = vpop.eup %5060 }
 0x485   :  { %v991_v11 = vmul.f32 %v5061_v59, %v6010_v58  ;;  %v5063_v16 = vpop.eup %5062 }
 0x487   :  { %v6072_v9 = vadd.f32 %v992_v37, %v991_v11 }
 0x489   :  { %5064 = vtanh.f32 %v6072_v9 }
 0x496   :  { %v5065_v49 = vpop.eup %5064 }
 0x497   :  { %v6075_v39 = vmul.f32 %v5065_v49, %v5063_v16 }
 0x499   :  { %v996_v41 = vpack.c.bf16 %v6075_v39, %v6075_v39 }
 0x49b   :  { %1034 = vmatmul.mubr.bf16.vlgmr.msra.gmra.mxu0 %v996_v41  ;;  %1075 = vmatmul.mubr.bf16.vlgmr.msra.gmra.mxu1 %v996_v41 }
 0x49c   :  { %1113 = vmatpush1.bf16.msra.mxu0 %v5403_v63  ;;  %1154 = vmatpush1.bf16.msra.mxu1 %v5408_v0 }
 0x49d   :  { %1114 = vmatprep.subr.bf16.mxu0 %v5413_v14  ;;  %1155 = vmatprep.subr.bf16.mxu1 %v5415_v15 }
 0x49e   :  { %1144 = vmatprep.mubr.bf16.mxu0 %v7989_v42  ;;  %1185 = vmatprep.mubr.bf16.mxu1 %v7989_v42 }
 0x4a0   :  { %1115 = vmatpush1.bf16.msra.mxu0 %v5422_v19  ;;  %1156 = vmatpush1.bf16.msra.mxu1 %v5424_v20 }
 0x4a1   :  { %1116 = vmatprep.subr.bf16.mxu0 %v5428_v23  ;;  %1157 = vmatprep.subr.bf16.mxu1 %v5430_v24 }
 0x4a4   :  { %1117 = vmatpush1.bf16.msra.mxu0 %v5438_v31  ;;  %1158 = vmatpush1.bf16.msra.mxu1 %v5440_v32 }
 0x4a5   :  { %1118 = vmatprep.subr.bf16.mxu0 %v5444_v35  ;;  %1159 = vmatprep.subr.bf16.mxu1 %v5446_v36 }
 0x4a8   :  { %1119 = vmatpush1.bf16.msra.mxu0 %v5452_v43  ;;  %1160 = vmatpush1.bf16.msra.mxu1 %v5454_v44 }
 0x4a9   :  { %1120 = vmatprep.subr.bf16.mxu0 %v5458_v50  ;;  %1161 = vmatprep.subr.bf16.mxu1 %v5460_v51 }
 0x4ac   :  { %1121 = vmatpush1.bf16.msra.mxu0 %v7990_v5  ;;  %1162 = vmatpush1.bf16.msra.mxu1 %v7991_v56 }
 0x4ad   :  { %1122 = vmatprep.subr.bf16.mxu0 %v7992_v7  ;;  %1163 = vmatprep.subr.bf16.mxu1 %v7993_v1 }
 0x4b0   :  { %1123 = vmatpush1.bf16.msra.mxu0 %v7994_v30  ;;  %1164 = vmatpush1.bf16.msra.mxu1 %v7995_v29 }
 0x4b1   :  { %1124 = vmatprep.subr.bf16.mxu0 %v7996_v57  ;;  %1165 = vmatprep.subr.bf16.mxu1 %v7997_v10 }
 0x4b4   :  { %1125 = vmatpush1.bf16.msra.mxu0 %v7998_v12  ;;  %1166 = vmatpush1.bf16.msra.mxu1 %v7999_v62 }
 0x4b5   :  { %1126 = vmatprep.subr.bf16.mxu0 %v8000_v6  ;;  %1167 = vmatprep.subr.bf16.mxu1 %v8001_v18 }
 0x4b8   :  { %1127 = vmatpush1.bf16.msra.mxu0 %v8002_v45  ;;  %1168 = vmatpush1.bf16.msra.mxu1 %v8003_v40 }
 0x4b9   :  { %1223 = vmatprep.subr.bf16.mxu0 %v8004_v4  ;;  %1264 = vmatprep.subr.bf16.mxu1 %v8005_v3 }
 0x55b   :  { %v1035_v58 = vpop.f32.mrf.mxu0  ;;  %v1076_v22 = vpop.f32.mrf.mxu1 }
 0x55c   :  { %v1036_v48 = vadd.f32 %v1035_v58, %v8032_v61  ;;  %v1077_v34 = vadd.f32 %v1076_v22, %v8034_v27 }
 0x55d   :  { %v1037_v38 = vpop.f32.mrf.mxu0  ;;  %v1078_v53 = vpop.f32.mrf.mxu1 }
 0x55e   :  { %v4627_v21 = vmul.f32 -1.442695, %v1036_v48  ;;  %v1038_v37 = vadd.f32 %v1037_v38, %v8033_v8  ;;  %v4629_v41 = vmul.f32 -1.442695, %v1077_v34  ;;  %v1079_v33 = vadd.f32 %v1078_v53, %v8035_v17 }
 0x55f   :  { %v1039_v59 = vpop.f32.mrf.mxu0  ;;  %v1080_v52 = vpop.f32.mrf.mxu1 }
 0x560   :  { %5066 = vpow2.f32 %v4627_v21  ;;  %v4628_v11 = vmul.f32 -1.442695, %v1038_v37 }
 0x561   :  { %v1040_v16 = vpop.f32.mrf.mxu0  ;;  %v1081_v49 = vpop.f32.mrf.mxu1 }
 0x562   :  { %5068 = vpow2.f32 %v4628_v11  ;;  %v8036_v49 = vsel %vm5565_vm8, %v5702_v46, %v5698_v47  ;;  %v8040_v47 = vld [vmem:[#allocation44_spill] sm:$0xff]  ;;  %v8041_v46 = vld [vmem:[#allocation43_spill] sm:$0xff] }
 0x563   :  { %5070 = vpow2.f32 %v4629_v41 }
 0x564   :  { %5072 = vtanh.f32 %v1079_v33  ;;  %v8037_v33 = vld [vmem:[#allocation46_spill] sm:$0xff] }
 0x56d   :  { %v5067_v58 = vpop.eup %5066 }
 0x56e   :  { %v1092_v61 = vadd.f32 1.0, %v5067_v58  ;;  %v8038_v58 = vld [vmem:[#allocation45_spill] sm:$0xff] }
 0x56f   :  { %v5069_v48 = vpop.eup %5068 }
 0x570   :  { %5074 = vrcp.f32 %v1092_v61  ;;  %v1093_v38 = vadd.f32 1.0, %v5069_v48  ;;  %v5071_v21 = vpop.eup %5070  ;;  %v8039_v61 = vsel %vm5586_vm11, %v8037_v33, %v8038_v58 }
 0x571   :  { %v5073_v8 = vpop.eup %5072  ;;  %v1094_v22 = vadd.f32 1.0, %v5071_v21 }
 0x572   :  { %5076 = vrcp.f32 %v1093_v38 }
 0x573   :  { %5078 = vrcp.f32 %v1094_v22  ;;  %v8043_v22 = vld [vmem:[#allocation48_spill] sm:$0xff] }
 0x57d   :  { %v5075_v37 = vpop.eup %5074 }
 0x57e   :  { %v1103_v2 = vmul.f32 %v5075_v37, %v5073_v8  ;;  %v8042_v37 = vsel %vm5576_vm10, %v8040_v47, %v8041_v46 }
 0x57f   :  { %v5077_v54 = vpop.eup %5076 }
 0x580   :  { %v1102_v59 = vmul.f32 %v5077_v54, %v6072_v9  ;;  %v5079_v13 = vpop.eup %5078 }
 0x582   :  { %v6134_v52 = vadd.f32 %v1103_v2, %v1102_v59  ;;  %v8044_v59 = vld [vmem:[#allocation47_spill] sm:$0xff] }
 0x584   :  { %5080 = vtanh.f32 %v6134_v52 }
 0x591   :  { %v5081_v60 = vpop.eup %5080 }
 0x592   :  { %v6137_v53 = vmul.f32 %v5081_v60, %v5079_v13  ;;  %v8045_v13 = vsel %vm5590_vm12, %v8043_v22, %v8044_v59 }
 0x594   :  { %v1107_v11 = vpack.c.bf16 %v6137_v53, %v6137_v53 }
 0x596   :  { %1145 = vmatmul.mubr.bf16.vlgmr.msra.gmra.mxu0 %v1107_v11  ;;  %1186 = vmatmul.mubr.bf16.vlgmr.msra.gmra.mxu1 %v1107_v11 }
 0x597   :  { %1224 = vmatpush1.bf16.msra.mxu0 %v5403_v63  ;;  %1265 = vmatpush1.bf16.msra.mxu1 %v5408_v0 }
 0x598   :  { %1225 = vmatprep.subr.bf16.mxu0 %v5413_v14  ;;  %1266 = vmatprep.subr.bf16.mxu1 %v5415_v15 }
 0x599   :  { %1255 = vmatprep.mubr.bf16.mxu0 %v7989_v42  ;;  %1296 = vmatprep.mubr.bf16.mxu1 %v7989_v42 }
 0x59b   :  { %1226 = vmatpush1.bf16.msra.mxu0 %v5422_v19  ;;  %1267 = vmatpush1.bf16.msra.mxu1 %v5424_v20 }
 0x59c   :  { %1227 = vmatprep.subr.bf16.mxu0 %v5428_v23  ;;  %1268 = vmatprep.subr.bf16.mxu1 %v5430_v24 }
 0x59f   :  { %1228 = vmatpush1.bf16.msra.mxu0 %v5438_v31  ;;  %1269 = vmatpush1.bf16.msra.mxu1 %v5440_v32 }
 0x5a0   :  { %1229 = vmatprep.subr.bf16.mxu0 %v5444_v35  ;;  %1270 = vmatprep.subr.bf16.mxu1 %v5446_v36 }
 0x5a3   :  { %1230 = vmatpush1.bf16.msra.mxu0 %v5452_v43  ;;  %1271 = vmatpush1.bf16.msra.mxu1 %v5454_v44 }
 0x5a4   :  { %1231 = vmatprep.subr.bf16.mxu0 %v5458_v50  ;;  %1272 = vmatprep.subr.bf16.mxu1 %v5460_v51 }
 0x5a7   :  { %1232 = vmatpush1.bf16.msra.mxu0 %v7990_v5  ;;  %1273 = vmatpush1.bf16.msra.mxu1 %v7991_v56 }
 0x5a8   :  { %1233 = vmatprep.subr.bf16.mxu0 %v7992_v7  ;;  %1274 = vmatprep.subr.bf16.mxu1 %v7993_v1 }
 0x5ab   :  { %1234 = vmatpush1.bf16.msra.mxu0 %v7994_v30  ;;  %1275 = vmatpush1.bf16.msra.mxu1 %v7995_v29 }
 0x5ac   :  { %1235 = vmatprep.subr.bf16.mxu0 %v7996_v57  ;;  %1276 = vmatprep.subr.bf16.mxu1 %v7997_v10 }
 0x5af   :  { %1236 = vmatpush1.bf16.msra.mxu0 %v7998_v12  ;;  %1277 = vmatpush1.bf16.msra.mxu1 %v7999_v62 }
 0x5b0   :  { %1237 = vmatprep.subr.bf16.mxu0 %v8000_v6  ;;  %1278 = vmatprep.subr.bf16.mxu1 %v8001_v18 }
 0x5b3   :  { %1238 = vmatpush1.bf16.msra.mxu0 %v8002_v45  ;;  %1279 = vmatpush1.bf16.msra.mxu1 %v8003_v40 }
 0x5b4   :  { %1334 = vmatprep.subr.bf16.mxu0 %v8004_v4  ;;  %1375 = vmatprep.subr.bf16.mxu1 %v8005_v3 }
 0x656   :  { %v1146_v9 = vpop.f32.mrf.mxu0  ;;  %v1187_v16 = vpop.f32.mrf.mxu1 }
 0x657   :  { %v1147_v27 = vadd.f32 %v1146_v9, %v8036_v49  ;;  %v1188_v2 = vadd.f32 %v1187_v16, %v8042_v37 }
 0x658   :  { %v1148_v34 = vpop.f32.mrf.mxu0  ;;  %v1189_v41 = vpop.f32.mrf.mxu1 }
 0x659   :  { %v4630_v17 = vmul.f32 -1.442695, %v1147_v27  ;;  %v1149_v48 = vadd.f32 %v1148_v34, %v8039_v61  ;;  %v4632_v54 = vmul.f32 -1.442695, %v1188_v2  ;;  %v1190_v60 = vadd.f32 %v1189_v41, %v8045_v13 }
 0x65a   :  { %v1150_v4 = vpop.f32.mrf.mxu0  ;;  %v1191_v38 = vpop.f32.mrf.mxu1 }
 0x65b   :  { %5082 = vpow2.f32 %v4630_v17  ;;  %v4631_v3 = vmul.f32 -1.442695, %v1149_v48 }
 0x65c   :  { %v1151_v21 = vpop.f32.mrf.mxu0  ;;  %v1192_v8 = vpop.f32.mrf.mxu1 }
 0x65d   :  { %5084 = vpow2.f32 %v4631_v3 }
 0x65e   :  { %5086 = vpow2.f32 %v4632_v54 }
 0x65f   :  { %5088 = vtanh.f32 %v1190_v60 }
 0x668   :  { %v5083_v11 = vpop.eup %5082 }
 0x669   :  { %v1203_v9 = vadd.f32 1.0, %v5083_v11 }
 0x66a   :  { %v5085_v49 = vpop.eup %5084 }
 0x66b   :  { %5090 = vrcp.f32 %v1203_v9  ;;  %v1204_v27 = vadd.f32 1.0, %v5085_v49  ;;  %v5087_v34 = vpop.eup %5086  ;;  %v8058_v49 = vmov 0.0  }
 0x66c   :  { %v5089_v17 = vpop.eup %5088  ;;  %v1205_v61 = vadd.f32 1.0, %v5087_v34  ;;  %v1788_v34 = vld [vmem:[#allocation2 + $0x738] sm:$0xff] }
 0x66d   :  { %5092 = vrcp.f32 %v1204_v27  ;;  %v1786_v27 = vld [vmem:[#allocation2 + $0x728] sm:$0xff] }
 0x66e   :  { %5094 = vrcp.f32 %v1205_v61  ;;  %v1781_v61 = vld [vmem:[#allocation2 + $0x700] sm:$0xff] }
 0x678   :  { %v5091_v33 = vpop.eup %5090 }
 0x679   :  { %v1214_v58 = vmul.f32 %v5091_v33, %v5089_v17  ;;  %v1785_v17 = vld [vmem:[#allocation2 + $0x720] sm:$0xff]  ;;  %v1787_v33 = vld [vmem:[#allocation2 + $0x730] sm:$0xff] }
 0x67a   :  { %v5093_v16 = vpop.eup %5092 }
 0x67b   :  { %v1213_v48 = vmul.f32 %v5093_v16, %v6134_v52  ;;  %v5095_v41 = vpop.eup %5094  ;;  %v1784_v16 = vld [vmem:[#allocation2 + $0x718] sm:$0xff] }
 0x67d   :  { %v6196_v4 = vadd.f32 %v1214_v58, %v1213_v48  ;;  %v1782_v58 = vld [vmem:[#allocation2 + $0x708] sm:$0xff]  ;;  %v1783_v48 = vld [vmem:[#allocation2 + $0x710] sm:$0xff] }
 0x67f   :  { %5096 = vtanh.f32 %v6196_v4 }
 0x68c   :  { %v5097_v38 = vpop.eup %5096 }
 0x68d   :  { %v6199_v3 = vmul.f32 %v5097_v38, %v5095_v41  ;;  %v1780_v41 = vld [vmem:[#allocation2 + $0x6f8] sm:$0xff]  ;;  %v1777_v38 = vld [vmem:[#allocation2 + $0x6e0] sm:$0xff] }
 0x68f   :  { %v1218_v21 = vpack.c.bf16 %v6199_v3, %v6199_v3 }
 0x691   :  { %1256 = vmatmul.mubr.bf16.vlgmr.msra.gmra.mxu0 %v1218_v21  ;;  %1297 = vmatmul.mubr.bf16.vlgmr.msra.gmra.mxu1 %v1218_v21  ;;  %v1779_v21 = vld [vmem:[#allocation2 + $0x6f0] sm:$0xff] }
 0x692   :  { %1335 = vmatpush1.bf16.msra.mxu0 %v5403_v63  ;;  %1376 = vmatpush1.bf16.msra.mxu1 %v5408_v0 }
 0x693   :  { %1336 = vmatprep.subr.bf16.mxu0 %v5413_v14  ;;  %1377 = vmatprep.subr.bf16.mxu1 %v5415_v15  ;;  %v8046_v14 = vld [vmem:[#allocation34_spill] sm:$0xff]  ;;  %v8047_v15 = vld [vmem:[#allocation27_spill] sm:$0xff] }
 0x694   :  { %1366 = vmatprep.mubr.bf16.mxu0 %v7989_v42  ;;  %1407 = vmatprep.mubr.bf16.mxu1 %v7989_v42 }
 0x696   :  { %1337 = vmatpush1.bf16.msra.mxu0 %v5422_v19  ;;  %1378 = vmatpush1.bf16.msra.mxu1 %v5424_v20  ;;  %v8048_v19 = vsel %vm5565_vm8, %v8046_v14, %v8047_v15  ;;  %v1773_v14 = vld [vmem:[#allocation2 + $0x6c0] sm:$0xff]  ;;  %v1775_v15 = vld [vmem:[#allocation2 + $0x6d0] sm:$0xff] }
 0x697   :  { %1338 = vmatprep.subr.bf16.mxu0 %v5428_v23  ;;  %1379 = vmatprep.subr.bf16.mxu1 %v5430_v24 }
 0x69a   :  { %1339 = vmatpush1.bf16.msra.mxu0 %v5438_v31  ;;  %1380 = vmatpush1.bf16.msra.mxu1 %v5440_v32  ;;  %v8049_v32 = vld [vmem:[#allocation41_spill] sm:$0xff] }
 0x69b   :  { %1340 = vmatprep.subr.bf16.mxu0 %v5444_v35  ;;  %1381 = vmatprep.subr.bf16.mxu1 %v5446_v36  ;;  %v8050_v35 = vld [vmem:[#allocation37_spill] sm:$0xff] }
 0x69c   :  { %v8051_v36 = vsel %vm5586_vm11, %v8049_v32, %v8050_v35  ;;  %v1768_v32 = vld [vmem:[#allocation2 + $0x698] sm:$0xff]  ;;  %v1765_v35 = vld [vmem:[#allocation2 + $0x680] sm:$0xff] }
 0x69e   :  { %1341 = vmatpush1.bf16.msra.mxu0 %v5452_v43  ;;  %1382 = vmatpush1.bf16.msra.mxu1 %v5454_v44 }
 0x69f   :  { %1342 = vmatprep.subr.bf16.mxu0 %v5458_v50  ;;  %1383 = vmatprep.subr.bf16.mxu1 %v5460_v51 }
 0x6a2   :  { %1343 = vmatpush1.bf16.msra.mxu0 %v7990_v5  ;;  %1384 = vmatpush1.bf16.msra.mxu1 %v7991_v56  ;;  %v8052_v56 = vld [vmem:[#allocation40_spill] sm:$0xff] }
 0x6a3   :  { %1344 = vmatprep.subr.bf16.mxu0 %v7992_v7  ;;  %1385 = vmatprep.subr.bf16.mxu1 %v7993_v1  ;;  %v8053_v7 = vld [vmem:[#allocation35_spill] sm:$0xff] }
 0x6a4   :  { %v8054_v1 = vsel %vm5576_vm10, %v8052_v56, %v8053_v7  ;;  %v1757_v56 = vld [vmem:[#allocation2 + $0x640] sm:$0xff]  ;;  %v1759_v7 = vld [vmem:[#allocation2 + $0x650] sm:$0xff] }
 0x6a6   :  { %1345 = vmatpush1.bf16.msra.mxu0 %v7994_v30  ;;  %1386 = vmatpush1.bf16.msra.mxu1 %v7995_v29 }
 0x6a7   :  { %1346 = vmatprep.subr.bf16.mxu0 %v7996_v57  ;;  %1387 = vmatprep.subr.bf16.mxu1 %v7997_v10  ;;  %v8055_v57 = vld [vmem:[#allocation42_spill] sm:$0xff]  ;;  %v8056_v10 = vld [vmem:[#allocation39_spill] sm:$0xff] }
 0x6aa   :  { %1347 = vmatpush1.bf16.msra.mxu0 %v7998_v12  ;;  %1388 = vmatpush1.bf16.msra.mxu1 %v7999_v62  ;;  %v8057_v12 = vsel %vm5590_vm12, %v8055_v57, %v8056_v10  ;;  %v1755_v57 = vld [vmem:[#allocation2 + $0x630] sm:$0xff]  ;;  %v1750_v10 = vld [vmem:[#allocation2 + $0x608] sm:$0xff] }
 0x6ab   :  { %1348 = vmatprep.subr.bf16.mxu0 %v8000_v6  ;;  %1389 = vmatprep.subr.bf16.mxu1 %v8001_v18 }
 0x6ae   :  { %1349 = vmatpush1.bf16.msra.mxu0 %v8002_v45  ;;  %1390 = vmatpush1.bf16.msra.mxu1 %v8003_v40 }
 0x6af   :  { %1812 = vmatprep.subr.mxu0 %v1786_v27  ;;  %1889 = vmatprep.subr.mxu1 %v1788_v34  ;;  %v1736_v27 = vld [vmem:[#allocation2 + $0x598] sm:$0xff]  ;;  %v1733_v34 = vld [vmem:[#allocation2 + $0x580] sm:$0xff] }
 0x751   :  { %v1257_v63 = vpop.f32.mrf.mxu0  ;;  %v1298_v0 = vpop.f32.mrf.mxu1 }
 0x752   :  { %v1258_v20 = vadd.f32 %v1257_v63, %v8048_v19  ;;  %v1299_v30 = vadd.f32 %v1298_v0, %v8054_v1  ;;  %v1774_v63 = vld [vmem:[#allocation2 + $0x6c8] sm:$0xff]  ;;  %v1776_v0 = vld [vmem:[#allocation2 + $0x6d8] sm:$0xff] }
 0x753   :  { %v1259_v23 = vpop.f32.mrf.mxu0  ;;  %v1300_v24 = vpop.f32.mrf.mxu1  ;;  %v1770_v19 = vld [vmem:[#allocation2 + $0x6a8] sm:$0xff] }
 0x754   :  { %v4633_v31 = vmul.f32 -1.442695, %v1258_v20  ;;  %v1260_v43 = vadd.f32 %v1259_v23, %v8051_v36  ;;  %v4635_v29 = vmul.f32 -1.442695, %v1299_v30  ;;  %v1301_v62 = vadd.f32 %v1300_v24, %v8057_v12  ;;  %v1772_v20 = vld [vmem:[#allocation2 + $0x6b8] sm:$0xff]  ;;  %v1769_v23 = vld [vmem:[#allocation2 + $0x6a0] sm:$0xff] }
 0x755   :  { %v1261_v44 = vpop.f32.mrf.mxu0  ;;  %v1302_v50 = vpop.f32.mrf.mxu1  ;;  %v1771_v24 = vld [vmem:[#allocation2 + $0x6b0] sm:$0xff]  ;;  %v1754_v1 = vld [vmem:[#allocation2 + $0x628] sm:$0xff]  ;;  %v1756_v30 = vld [vmem:[#allocation2 + $0x638] sm:$0xff] }
 0x756   :  { %5098 = vpow2.f32 %v4633_v31  ;;  %v4634_v51 = vmul.f32 -1.442695, %v1260_v43  ;;  %v1766_v31 = vld [vmem:[#allocation2 + $0x688] sm:$0xff]  ;;  %v1767_v36 = vld [vmem:[#allocation2 + $0x690] sm:$0xff]  ;;  %v1764_v44 = vld [vmem:[#allocation2 + $0x678] sm:$0xff] }
 0x757   :  { %v1262_v40 = vpop.f32.mrf.mxu0  ;;  %v1303_v5 = vpop.f32.mrf.mxu1  ;;  %v1762_v43 = vld [vmem:[#allocation2 + $0x668] sm:$0xff]  ;;  %v1761_v50 = vld [vmem:[#allocation2 + $0x660] sm:$0xff]  ;;  %v1752_v12 = vld [vmem:[#allocation2 + $0x618] sm:$0xff] }
 0x758   :  { %5100 = vpow2.f32 %v4634_v51  ;;  %v1763_v51 = vld [vmem:[#allocation2 + $0x670] sm:$0xff]  ;;  %v1758_v40 = vld [vmem:[#allocation2 + $0x648] sm:$0xff]  ;;  %v1760_v5 = vld [vmem:[#allocation2 + $0x658] sm:$0xff] }
 0x759   :  { %5102 = vpow2.f32 %v4635_v29  ;;  %v1753_v29 = vld [vmem:[#allocation2 + $0x620] sm:$0xff] }
 0x75a   :  { %5104 = vtanh.f32 %v1301_v62  ;;  %v1749_v62 = vld [vmem:[#allocation2 + $0x600] sm:$0xff] }
 0x763   :  { %v5099_v6 = vpop.eup %5098 }
 0x764   :  { %v1314_v18 = vadd.f32 1.0, %v5099_v6  ;;  %v1751_v6 = vld [vmem:[#allocation2 + $0x610] sm:$0xff] }
 0x765   :  { %v5101_v45 = vpop.eup %5100 }
 0x766   :  { %5106 = vrcp.f32 %v1314_v18  ;;  %v1315_v52 = vadd.f32 1.0, %v5101_v45  ;;  %v5103_v8 = vpop.eup %5102  ;;  %v1746_v18 = vld [vmem:[#allocation2 + $0x5e8] sm:$0xff]  ;;  %v1748_v45 = vld [vmem:[#allocation2 + $0x5f8] sm:$0xff] }
 0x767   :  { %v5105_v47 = vpop.eup %5104  ;;  %v1316_v54 = vadd.f32 1.0, %v5103_v8  ;;  %v1747_v8 = vld [vmem:[#allocation2 + $0x5f0] sm:$0xff] }
 0x768   :  { %5108 = vrcp.f32 %v1315_v52  ;;  %v1745_v52 = vld [vmem:[#allocation2 + $0x5e0] sm:$0xff] }
 0x769   :  { %5110 = vrcp.f32 %v1316_v54  ;;  %v1738_v54 = vld [vmem:[#allocation2 + $0x5a8] sm:$0xff] }
 0x773   :  { %v5107_v46 = vpop.eup %5106 }
 0x774   :  { %v1325_v37 = vmul.f32 %v5107_v46, %v5105_v47  ;;  %v1742_v47 = vld [vmem:[#allocation2 + $0x5c8] sm:$0xff]  ;;  %v1744_v46 = vld [vmem:[#allocation2 + $0x5d8] sm:$0xff] }
 0x775   :  { %v5109_v2 = vpop.eup %5108 }
 0x776   :  { %v1324_v22 = vmul.f32 %v5109_v2, %v6196_v4  ;;  %v5111_v13 = vpop.eup %5110  ;;  %v1778_v4 = vld [vmem:[#allocation2 + $0x6e8] sm:$0xff]  ;;  %v1743_v2 = vld [vmem:[#allocation2 + $0x5d0] sm:$0xff] }
 0x778   :  { %v6256_v59 = vadd.f32 %v1325_v37, %v1324_v22  ;;  %v1741_v37 = vld [vmem:[#allocation2 + $0x5c0] sm:$0xff]  ;;  %v1740_v22 = vld [vmem:[#allocation2 + $0x5b8] sm:$0xff] }
 0x77a   :  { %5112 = vtanh.f32 %v6256_v59 }
 0x787   :  { %v5113_v60 = vpop.eup %5112 }
 0x788   :  { %v6259_v11 = vmul.f32 %v5113_v60, %v5111_v13  ;;  %v1737_v13 = vld [vmem:[#allocation2 + $0x5a0] sm:$0xff]  ;;  %v1739_v60 = vld [vmem:[#allocation2 + $0x5b0] sm:$0xff] }
 0x78a   :  { %v1329_v9 = vpack.c.bf16 %v6259_v11, %v6259_v11 }
 0x78c   :  { %1367 = vmatmul.mubr.bf16.vlgmr.msra.gmra.mxu0 %v1329_v9  ;;  %1408 = vmatmul.mubr.bf16.vlgmr.msra.gmra.mxu1 %v1329_v9  ;;  %v1734_v9 = vld [vmem:[#allocation2 + $0x588] sm:$0xff] }
 0x78d   :  { %1876 = vmatprep.mubr.f32.mxu0 %v8058_v49  ;;  %1953 = vmatprep.mubr.f32.mxu1 %v8058_v49 }
 0x78e   :  { %1813 = vmatpush1.msra.mxu0 %v1785_v17  ;;  %1890 = vmatpush1.msra.mxu1 %v1787_v33  ;;  %v1735_v17 = vld [vmem:[#allocation2 + $0x590] sm:$0xff]  ;;  %v1730_v33 = vld [vmem:[#allocation2 + $0x568] sm:$0xff] }
 0x78f   :  { %1814 = vmatprep.subr.mxu0 %v1782_v58  ;;  %1891 = vmatprep.subr.mxu1 %v1784_v16  ;;  %v1732_v58 = vld [vmem:[#allocation2 + $0x578] sm:$0xff]  ;;  %v2023_v16 = vld [vmem:[#allocation2 + $0x508] sm:$0xff] }
 0x790   :  { %1815 = vmatpush1.msra.mxu0 %v1781_v61  ;;  %1892 = vmatpush1.msra.mxu1 %v1783_v48  ;;  %v2027_v61 = vld [vmem:[#allocation2 + $0x528] sm:$0xff]  ;;  %v2025_v48 = vld [vmem:[#allocation2 + $0x518] sm:$0xff] }
 0x791   :  { %1816 = vmatprep.subr.mxu0 %v1778_v4  ;;  %1893 = vmatprep.subr.mxu1 %v1780_v41  ;;  %v2029_v4 = vld [vmem:[#allocation2 + $0x538] sm:$0xff]  ;;  %v1729_v41 = vld [vmem:[#allocation2 + $0x560] sm:$0xff] }
 0x792   :  { %1817 = vmatpush1.msra.mxu0 %v1777_v38  ;;  %1894 = vmatpush1.msra.mxu1 %v1779_v21  ;;  %v1731_v38 = vld [vmem:[#allocation2 + $0x570] sm:$0xff]  ;;  %v1726_v21 = vld [vmem:[#allocation2 + $0x548] sm:$0xff] }
 0x793   :  { %1818 = vmatprep.subr.mxu0 %v1774_v63  ;;  %1895 = vmatprep.subr.mxu1 %v1776_v0  ;;  %v1728_v63 = vld [vmem:[#allocation2 + $0x558] sm:$0xff]  ;;  %v1725_v0 = vld [vmem:[#allocation2 + $0x540] sm:$0xff] }
 0x794   :  { %1819 = vmatpush1.msra.mxu0 %v1773_v14  ;;  %1896 = vmatpush1.msra.mxu1 %v1775_v15  ;;  %v1727_v14 = vld [vmem:[#allocation2 + $0x550] sm:$0xff]  ;;  %v6265_v15 = vpack.c.bf16 %v2027_v61, %v2023_v16  ;;  %v8073_v61 = vld [vmem:[#allocation5_spill] sm:$0xff] }
 0x795   :  { %1820 = vmatprep.subr.mxu0 %v1770_v19  ;;  %1897 = vmatprep.subr.mxu1 %v1772_v20  ;;  %v6267_v19 = vpack.c.bf16 %v2029_v4, %v2025_v48  ;;  %v1443_v4 = vsel %vm5565_vm8, %v6075_v39, %v6137_v53 }
 0x796   :  { %1821 = vmatpush1.msra.mxu0 %v1769_v23  ;;  %1898 = vmatpush1.msra.mxu1 %v1771_v24  ;;  %8059 = vst [vmem:[#allocation13_spill] sm:$0xff] %v6265_v15  ;;  %v8061_v24 = vld [vmem:[#allocation29_spill] sm:$0xff] }
 0x797   :  { %1822 = vmatprep.subr.mxu0 %v1766_v31  ;;  %1899 = vmatprep.subr.mxu1 %v1768_v32  ;;  %8060 = vst [vmem:[#allocation14_spill] sm:$0xff] %v6267_v19  ;;  %v8062_v31 = vld [vmem:[#allocation28_spill] sm:$0xff] }
 0x798   :  { %1823 = vmatpush1.msra.mxu0 %v1765_v35  ;;  %1900 = vmatpush1.msra.mxu1 %v1767_v36  ;;  %v8063_v32 = vsel %vm5565_vm8, %v8061_v24, %v8062_v31 }
 0x799   :  { %1824 = vmatprep.subr.mxu0 %v1762_v43  ;;  %1901 = vmatprep.subr.mxu1 %v1764_v44 }
 0x79a   :  { %1825 = vmatpush1.msra.mxu0 %v1761_v50  ;;  %1902 = vmatpush1.msra.mxu1 %v1763_v51  ;;  %v8064_v50 = vld [vmem:[#allocation33_spill] sm:$0xff]  ;;  %v8065_v51 = vld [vmem:[#allocation32_spill] sm:$0xff] }
 0x79b   :  { %1826 = vmatprep.subr.mxu0 %v1758_v40  ;;  %1903 = vmatprep.subr.mxu1 %v1760_v5  ;;  %v8066_v40 = vsel %vm5586_vm11, %v8064_v50, %v8065_v51 }
 0x79c   :  { %1827 = vmatpush1.msra.mxu0 %v1757_v56  ;;  %1904 = vmatpush1.msra.mxu1 %v1759_v7 }
 0x79d   :  { %1828 = vmatprep.subr.mxu0 %v1754_v1  ;;  %1905 = vmatprep.subr.mxu1 %v1756_v30 }
 0x79e   :  { %1829 = vmatpush1.msra.mxu0 %v1753_v29  ;;  %1906 = vmatpush1.msra.mxu1 %v1755_v57  ;;  %v8067_v57 = vld [vmem:[#allocation31_spill] sm:$0xff] }
 0x79f   :  { %1830 = vmatprep.subr.mxu0 %v1750_v10  ;;  %1907 = vmatprep.subr.mxu1 %v1752_v12  ;;  %v8068_v10 = vld [vmem:[#allocation30_spill] sm:$0xff] }
 0x7a0   :  { %1831 = vmatpush1.msra.mxu0 %v1749_v62  ;;  %1908 = vmatpush1.msra.mxu1 %v1751_v6  ;;  %v8069_v12 = vsel %vm5576_vm10, %v8067_v57, %v8068_v10 }
 0x7a1   :  { %1832 = vmatprep.subr.mxu0 %v1746_v18  ;;  %1909 = vmatprep.subr.mxu1 %v1748_v45  ;;  %v8070_v18 = vld [vmem:[#allocation38_spill] sm:$0xff]  ;;  %v8071_v45 = vld [vmem:[#allocation36_spill] sm:$0xff] }
 0x7a2   :  { %1833 = vmatpush1.msra.mxu0 %v1745_v52  ;;  %1910 = vmatpush1.msra.mxu1 %v1747_v8  ;;  %v8072_v52 = vsel %vm5590_vm12, %v8070_v18, %v8071_v45  ;;  %v8078_v45 = vld [vmem:[#allocation57_spill] sm:$0xff] }
 0x7a3   :  { %1834 = vmatprep.subr.mxu0 %v1742_v47  ;;  %1911 = vmatprep.subr.mxu1 %v1744_v46 }
 0x7a4   :  { %1835 = vmatpush1.msra.mxu0 %v1741_v37  ;;  %1912 = vmatpush1.msra.mxu1 %v1743_v2 }
 0x7a5   :  { %1836 = vmatprep.subr.mxu0 %v1738_v54  ;;  %1913 = vmatprep.subr.mxu1 %v1740_v22  ;;  %v5317_v22 = vmov 1966171168  }
 0x7a6   :  { %1837 = vmatpush1.msra.mxu0 %v1737_v13  ;;  %1914 = vmatpush1.msra.mxu1 %v1739_v60  ;;  %v1450_v13 = vunpack.c.l.s4 %v5317_v22 }
 0x7a7   :  { %1838 = vmatprep.subr.mxu0 %v1734_v9  ;;  %1915 = vmatprep.subr.mxu1 %v1736_v27 }
 0x7a8   :  { %1839 = vmatpush1.msra.mxu0 %v1733_v34  ;;  %1916 = vmatpush1.msra.mxu1 %v1735_v17  ;;  %v1451_v17 = vunpack.c.0.s8 %v1450_v13 }
 0x7a9   :  { %1840 = vmatprep.subr.mxu0 %v1730_v33  ;;  %1917 = vmatprep.subr.mxu1 %v1732_v58 }
 0x7aa   :  { %1841 = vmatpush1.msra.mxu0 %v1729_v41  ;;  %1918 = vmatpush1.msra.mxu1 %v1731_v38  ;;  %v6293_v48 = vsub.s32 %v1451_v17, %v8073_v61  ;;  %v1444_v41 = vsel %vm5565_vm8, %v6137_v53, %v6075_v39 }
 0x7ab   :  { %1842 = vmatprep.subr.mxu0 %v1726_v21  ;;  %1919 = vmatprep.subr.mxu1 %v1728_v63  ;;  %v8075_v21 = vld [vmem:[#allocation12_spill] sm:$0xff] }
 0x7ac   :  { %1843 = vmatpush1.msra.mxu0 %v1725_v0  ;;  %1920 = vmatpush1.msra.mxu1 %v1727_v14  ;;  %8074 = vst [vmem:[#allocation15_spill] sm:$0xff] %v6293_v48  ;;  %v1526_v38 = vrot.slane %v1443_v4, %v6293_v48  ;;  %v1442_v63 = vsel %vm5565_vm8, %v8075_v21, %v6199_v3  ;;  %v8076_v14 = vld [vmem:[#allocation11_spill] sm:$0xff]  ;;  %v2022_v4 = vld [vmem:[#allocation2 + $0x500] sm:$0xff] }
 0x7ad   :  { %2102 = vmatprep.subr.bf16.mxu0 %v6265_v15  ;;  %2143 = vmatprep.subr.bf16.mxu1 %v6267_v19  ;;  %v1445_v0 = vsel %vm5565_vm8, %v6199_v3, %v8075_v21  ;;  %v1441_v39 = vsel %vm5565_vm8, %v8076_v14, %v6259_v11  ;;  %v1503_v53 = vrot.slane %v1442_v63, %v6293_v48  ;;  %v2024_v63 = vld [vmem:[#allocation2 + $0x510] sm:$0xff] }
 0x7ae   :  { %v1480_v24 = vrot.slane %v1441_v39, %v6293_v48  ;;  %v1572_v31 = vrot.slane %v1445_v0, %v6293_v48  ;;  %v1446_v3 = vsel %vm5565_vm8, %v6259_v11, %v8076_v14  ;;  %v8077_v11 = vld [vmem:[#allocation6_spill] sm:$0xff]  ;;  %v2028_v0 = vld [vmem:[#allocation2 + $0x530] sm:$0xff] }
 0x7b0   :  { %v1481_v51 = vcombine.high %v1480_v24, %v1480_v24 }
 0x7b2   :  { %v1495_v18 = vrot.slane %v1481_v51, %v6293_v48 }
 0x7b4   :  { %v1641_v17 = vrot.slane %v1495_v18, %v8077_v11 }
 0x84c   :  { %v1368_v20 = vpop.f32.mrf.mxu0  ;;  %v1409_v23 = vpop.f32.mrf.mxu1 }
 0x84d   :  { %v1369_v35 = vadd.f32 %v1368_v20, %v8063_v32  ;;  %v1410_v62 = vadd.f32 %v1409_v23, %v8069_v12  ;;  %v1527_v20 = vcombine.high %v1526_v38, %v1526_v38  ;;  %v1534_v32 = vrot.slane %v1526_v38, %v6293_v48 }
 0x84e   :  { %v1370_v36 = vpop.f32.mrf.mxu0  ;;  %v1411_v43 = vpop.f32.mrf.mxu1 }
 0x84f   :  { %v4636_v44 = vmul.f32 -1.442695, %v1369_v35  ;;  %v1371_v5 = vadd.f32 %v1370_v36, %v8066_v40  ;;  %v4638_v6 = vmul.f32 -1.442695, %v1410_v62  ;;  %v1412_v8 = vadd.f32 %v1411_v43, %v8072_v52 }
 0x850   :  { %v1372_v56 = vpop.f32.mrf.mxu0  ;;  %v1413_v7 = vpop.f32.mrf.mxu1  ;;  %v1504_v36 = vcombine.high %v1503_v53, %v1503_v53  ;;  %v6327_v43 = vrot.slane %v1527_v20, %v6293_v48  ;;  %v1573_v40 = vcombine.high %v1572_v31, %v1572_v31  ;;  %v1657_v57 = vrot.slane %v1534_v32, %v8077_v11  ;;  %v2019_v20 = vld [vmem:[#allocation2 + $0x4e8] sm:$0xff] }
 0x851   :  { %5114 = vpow2.f32 %v4636_v44  ;;  %v4637_v1 = vmul.f32 -1.442695, %v1371_v5  ;;  %v1511_v56 = vrot.slane %v1503_v53, %v6293_v48  ;;  %v1580_v7 = vrot.slane %v1572_v31, %v6293_v48  ;;  %v2015_v53 = vld [vmem:[#allocation2 + $0x4c8] sm:$0xff] }
 0x852   :  { %v1373_v30 = vpop.f32.mrf.mxu0  ;;  %v1414_v29 = vpop.f32.mrf.mxu1  ;;  %v1518_v12 = vrot.slane %v1504_v36, %v6293_v48  ;;  %v1661_v62 = vrot.slane %v6327_v43, %v8077_v11  ;;  %v2021_v36 = vld [vmem:[#allocation2 + $0x4f8] sm:$0xff] }
 0x853   :  { %5116 = vpow2.f32 %v4637_v1  ;;  %v1488_v1 = vrot.slane %v1480_v24, %v6293_v48  ;;  %v1595_v29 = vrot.slane %v1446_v3, %v6293_v48 }
 0x854   :  { %5118 = vpow2.f32 %v4638_v6 }
 0x855   :  { %5120 = vtanh.f32 %v1412_v8  ;;  %v1603_v22 = vrot.slane %v1595_v29, %v6293_v48  ;;  %v1637_v13 = vrot.slane %v1488_v1, %v8077_v11 }
 0x85e   :  { %v5115_v47 = vpop.eup %5114 }
 0x85f   :  { %v1425_v46 = vadd.f32 1.0, %v5115_v47  ;;  %v1587_v47 = vrot.slane %v1573_v40, %v6293_v48  ;;  %v2014_v40 = vld [vmem:[#allocation2 + $0x4c0] sm:$0xff] }
 0x860   :  { %v5117_v37 = vpop.eup %5116 }
 0x861   :  { %5122 = vrcp.f32 %v1425_v46  ;;  %v1426_v2 = vadd.f32 1.0, %v5117_v37  ;;  %v5119_v54 = vpop.eup %5118 }
 0x862   :  { %v5121_v60 = vpop.eup %5120  ;;  %v1427_v33 = vadd.f32 1.0, %v5119_v54  ;;  %v1677_v54 = vrot.slane %v1580_v7, %v8077_v11  ;;  %v6380_v7 = vpack.c.bf16 %v2019_v20, %v2015_v53  ;;  %v1997_v53 = vld [vmem:[#allocation2 + $0x438] sm:$0xff] }
 0x863   :  { %5124 = vrcp.f32 %v1426_v2  ;;  %v1647_v2 = vrot.slane %v1511_v56, %v8077_v11 }
 0x864   :  { %5126 = vrcp.f32 %v1427_v33  ;;  %v1651_v33 = vrot.slane %v1518_v12, %v8077_v11 }
 0x86e   :  { %v5123_v9 = vpop.eup %5122 }
 0x86f   :  { %v1436_v27 = vmul.f32 %v5123_v9, %v5121_v60  ;;  %v1596_v60 = vcombine.high %v1595_v29, %v1595_v29  ;;  %v2016_v29 = vld [vmem:[#allocation2 + $0x4d0] sm:$0xff] }
 0x870   :  { %v5125_v34 = vpop.eup %5124 }
 0x871   :  { %v1435_v58 = vmul.f32 %v5125_v34, %v6256_v59  ;;  %v1549_v59 = vrot.slane %v1444_v41, %v6293_v48  ;;  %v5127_v50 = vpop.eup %5126  ;;  %v2026_v41 = vld [vmem:[#allocation2 + $0x520] sm:$0xff]  ;;  %v1610_v14 = vrot.slane %v1596_v60, %v6293_v48 }
 0x872   :  { %v6371_v32 = vpack.c.bf16 %v2026_v41, %v2022_v4  ;;  %v1998_v4 = vld [vmem:[#allocation2 + $0x440] sm:$0xff] }
 0x873   :  { %v1437_v16 = vadd.f32 %v1436_v27, %v1435_v58  ;;  %v1550_v23 = vcombine.high %v1549_v59, %v1549_v59  ;;  %v1557_v35 = vrot.slane %v1549_v59, %v6293_v48  ;;  %v1681_v58 = vrot.slane %v1587_v47, %v8077_v11  ;;  %v2013_v47 = vld [vmem:[#allocation2 + $0x4b8] sm:$0xff]  ;;  %v2002_v41 = vld [vmem:[#allocation2 + $0x460] sm:$0xff] }
 0x874   :  { %v1687_v59 = vrot.slane %v1603_v22, %v8077_v11  ;;  %v1691_v1 = vrot.slane %v1610_v14, %v8077_v11  ;;  %v2010_v22 = vld [vmem:[#allocation2 + $0x4a0] sm:$0xff]  ;;  %v1995_v14 = vld [vmem:[#allocation2 + $0x428] sm:$0xff]  ;;  %v6421_v20 = vpack.c.bf16 %v2002_v41, %v1998_v4  ;;  %v1969_v4 = vld [vmem:[#allocation2 + $0x358] sm:$0xff] }
 0x875   :  { %5128 = vtanh.f32 %v1437_v16  ;;  %v6330_v44 = vrot.slane %v1550_v23, %v6293_v48  ;;  %v1667_v10 = vrot.slane %v1557_v35, %v8077_v11  ;;  %v2017_v35 = vld [vmem:[#allocation2 + $0x4d8] sm:$0xff] }
 0x876   :  { %v6385_v18 = vpack.c.bf16 %v2021_v36, %v2017_v35  ;;  %v1973_v41 = vld [vmem:[#allocation2 + $0x378] sm:$0xff] }
 0x877   :  { %v1671_v6 = vrot.slane %v6330_v44, %v8077_v11 }
 0x882   :  { %v5129_v5 = vpop.eup %5128 }
 0x883   :  { %v1439_v30 = vmul.f32 %v5129_v5, %v5127_v50  ;;  %v6376_v50 = vpack.c.bf16 %v2028_v0, %v2024_v63  ;;  %v2018_v5 = vld [vmem:[#allocation2 + $0x4e0] sm:$0xff]  ;;  %v2004_v63 = vld [vmem:[#allocation2 + $0x470] sm:$0xff]  ;;  %v1991_v0 = vld [vmem:[#allocation2 + $0x408] sm:$0xff] }
 0x884   :  { %v6427_v35 = vpack.c.bf16 %v1995_v14, %v1991_v0  ;;  %v1966_v0 = vld [vmem:[#allocation2 + $0x340] sm:$0xff] }
 0x885   :  { %v1440_v52 = vsel %vm5565_vm8, %v8078_v45, %v1439_v30  ;;  %v1447_v8 = vsel %vm5565_vm8, %v1439_v30, %v8078_v45 }
 0x886   :  { %v1455_v46 = vrot.slane %v1440_v52, %v6293_v48  ;;  %v1618_v37 = vrot.slane %v1447_v8, %v6293_v48  ;;  %v2011_v52 = vld [vmem:[#allocation2 + $0x4a8] sm:$0xff]  ;;  %v2009_v8 = vld [vmem:[#allocation2 + $0x498] sm:$0xff] }
 0x887   :  { %v6401_v60 = vpack.c.bf16 %v2013_v47, %v2009_v8  ;;  %v1977_v8 = vld [vmem:[#allocation2 + $0x398] sm:$0xff] }
 0x888   :  { %v1463_v9 = vrot.slane %v1455_v46, %v6293_v48  ;;  %v1456_v27 = vcombine.high %v1455_v46, %v1455_v46  ;;  %v1619_v34 = vcombine.high %v1618_v37, %v1618_v37  ;;  %v1626_v16 = vrot.slane %v1618_v37, %v6293_v48  ;;  %v1981_v47 = vld [vmem:[#allocation2 + $0x3b8] sm:$0xff] }
 0x889   :  { %v6393_v37 = vpack.c.bf16 %v2018_v5, %v2014_v40  ;;  %v1985_v40 = vld [vmem:[#allocation2 + $0x3d8] sm:$0xff] }
 0x88a   :  { %v1705_v61 = vsel %vm1704_vm13, %v1463_v9, %v1637_v13  ;;  %v1470_v38 = vrot.slane %v1456_v27, %v6293_v48  ;;  %v1633_v23 = vrot.slane %v1619_v34, %v6293_v48  ;;  %v1697_v43 = vrot.slane %v1626_v16, %v8077_v11  ;;  %v2008_v9 = vld [vmem:[#allocation2 + $0x490] sm:$0xff]  ;;  %v1999_v34 = vld [vmem:[#allocation2 + $0x448] sm:$0xff]  ;;  %v1989_v5 = vld [vmem:[#allocation2 + $0x3f8] sm:$0xff] }
 0x88b   :  { %v1708_v21 = vsel %vm1707_vm14, %v1705_v61, %v1647_v2  ;;  %v2012_v27 = vld [vmem:[#allocation2 + $0x4b0] sm:$0xff] }
 0x88c   :  { %v1711_v39 = vsel %vm1710_vm15, %v1708_v21, %v1657_v57  ;;  %v1706_v24 = vsel %vm1704_vm13, %v1470_v38, %v1641_v17  ;;  %v2020_v57 = vld [vmem:[#allocation2 + $0x4f0] sm:$0xff]  ;;  %v1701_v45 = vrot.slane %v1633_v23, %v8077_v11  ;;  %v2003_v17 = vld [vmem:[#allocation2 + $0x468] sm:$0xff]  ;;  %v6409_v61 = vpack.c.bf16 %v2012_v27, %v2008_v9 }
 0x88d   :  { %v1714_v31 = vsel %vm1713_vm0, %v1711_v39, %v1667_v10  ;;  %v1709_v3 = vsel %vm1707_vm14, %v1706_v24, %v1651_v33  ;;  %v2007_v10 = vld [vmem:[#allocation2 + $0x488] sm:$0xff]  ;;  %v6395_v2 = vpack.c.bf16 %v2020_v57, %v2016_v29  ;;  %v2001_v33 = vld [vmem:[#allocation2 + $0x458] sm:$0xff]  ;;  %v6413_v38 = vpack.c.bf16 %v2003_v17, %v1999_v34  ;;  %v2000_v21 = vld [vmem:[#allocation2 + $0x450] sm:$0xff] }
 0x88e   :  { %v1717_v44 = vsel %vm1716_vm2, %v1714_v31, %v1677_v54  ;;  %v1712_v51 = vsel %vm1710_vm15, %v1709_v3, %v1661_v62  ;;  %v2006_v54 = vld [vmem:[#allocation2 + $0x480] sm:$0xff]  ;;  %v6399_v13 = vpack.c.bf16 %v2011_v52, %v2007_v10  ;;  %v1993_v39 = vld [vmem:[#allocation2 + $0x418] sm:$0xff]  ;;  %v6423_v23 = vpack.c.bf16 %v2004_v63, %v2000_v21  ;;  %v1992_v3 = vld [vmem:[#allocation2 + $0x410] sm:$0xff] }
 0x88f   :  { %v1720_v56 = vsel %vm1719_vm3, %v1717_v44, %v1687_v59  ;;  %v1715_v30 = vsel %vm1713_vm0, %v1712_v51, %v1671_v6  ;;  %v6407_v16 = vpack.c.bf16 %v2010_v22, %v2006_v54  ;;  %v1990_v24 = vld [vmem:[#allocation2 + $0x400] sm:$0xff]  ;;  %v6429_v36 = vpack.c.bf16 %v1997_v53, %v1993_v39  ;;  %v1983_v44 = vld [vmem:[#allocation2 + $0x3c8] sm:$0xff]  ;;  %v1976_v34 = vld [vmem:[#allocation2 + $0x390] sm:$0xff] }
 0x890   :  { %v1723_v12 = vsel %vm1722_vm4, %v1720_v56, %v1697_v43  ;;  %v1718_v62 = vsel %vm1716_vm2, %v1715_v30, %v1681_v58  ;;  %v2005_v58 = vld [vmem:[#allocation2 + $0x478] sm:$0xff]  ;;  %v1994_v31 = vld [vmem:[#allocation2 + $0x420] sm:$0xff]  ;;  %v1996_v43 = vld [vmem:[#allocation2 + $0x430] sm:$0xff]  ;;  %v6441_v10 = vpack.c.bf16 %v1989_v5, %v1985_v40  ;;  %v6453_v27 = vpack.c.bf16 %v1981_v47, %v1977_v8 }
 0x891   :  { %1877 = vmatmul.mubr.f32.vlgmr.msra.gmra.mxu0 %v1723_v12  ;;  %1954 = vmatmul.mubr.f32.vlgmr.msra.gmra.mxu1 %v1723_v12  ;;  %v1721_v46 = vsel %vm1719_vm3, %v1718_v62, %v1691_v1  ;;  %v6415_v59 = vpack.c.bf16 %v2005_v58, %v2001_v33  ;;  %8079 = vst [vmem:[#allocation16_spill] sm:$0xff] %v6429_v36  ;;  %v1987_v51 = vld [vmem:[#allocation2 + $0x3e8] sm:$0xff]  ;;  %v1982_v30 = vld [vmem:[#allocation2 + $0x3c0] sm:$0xff]  ;;  %v1984_v12 = vld [vmem:[#allocation2 + $0x3d0] sm:$0xff] }
 0x892   :  { %2103 = vmatpush1.bf16.msra.mxu0 %v6371_v32  ;;  %2144 = vmatpush1.bf16.msra.mxu1 %v6376_v50  ;;  %v1724_v6 = vsel %vm1722_vm4, %v1721_v46, %v1701_v45  ;;  %v6433_v56 = vpack.c.bf16 %v1994_v31, %v1990_v24  ;;  %v6435_v1 = vpack.c.bf16 %v1996_v43, %v1992_v3  ;;  %v1986_v29 = vld [vmem:[#allocation2 + $0x3e0] sm:$0xff]  ;;  %v1988_v45 = vld [vmem:[#allocation2 + $0x3f0] sm:$0xff]  ;;  %v1975_v62 = vld [vmem:[#allocation2 + $0x388] sm:$0xff] }
 0x893   :  { %1882 = vmatprep.mubr.f32.mxu0 %v8058_v49  ;;  %1959 = vmatprep.mubr.f32.mxu1 %v8058_v49  ;;  %v6439_v57 = vpack.c.bf16 %v1987_v51, %v1983_v44  ;;  %8083 = vst [vmem:[#allocation20_spill] sm:$0xff] %v6441_v10  ;;  %v1979_v52 = vld [vmem:[#allocation2 + $0x3a8] sm:$0xff]  ;;  %v6445_v46 = vpack.c.bf16 %v1986_v29, %v1982_v30  ;;  %v1974_v54 = vld [vmem:[#allocation2 + $0x380] sm:$0xff]  ;;  %8087 = vst [vmem:[#allocation24_spill] sm:$0xff] %v6453_v27 }
 0x894   :  { %2104 = vmatprep.subr.bf16.mxu0 %v6380_v7  ;;  %2145 = vmatprep.subr.bf16.mxu1 %v6385_v18  ;;  %8080 = vst [vmem:[#allocation17_spill] sm:$0xff] %v6433_v56  ;;  %8081 = vst [vmem:[#allocation18_spill] sm:$0xff] %v6435_v1  ;;  %v1978_v22 = vld [vmem:[#allocation2 + $0x3a0] sm:$0xff]  ;;  %v6451_v9 = vpack.c.bf16 %v1979_v52, %v1975_v62  ;;  %v1980_v17 = vld [vmem:[#allocation2 + $0x3b0] sm:$0xff]  ;;  %v6465_v39 = vpack.c.bf16 %v1973_v41, %v1969_v4 }
 0x895   :  { %1883 = vmatmul.mubr.f32.gmra.mxu0 %v1724_v6  ;;  %1960 = vmatmul.mubr.f32.gmra.mxu1 %v1724_v6  ;;  %8082 = vst [vmem:[#allocation19_spill] sm:$0xff] %v6439_v57  ;;  %8084 = vst [vmem:[#allocation21_spill] sm:$0xff] %v6445_v46  ;;  %v6447_v6 = vpack.c.bf16 %v1988_v45, %v1984_v12  ;;  %v1967_v33 = vld [vmem:[#allocation2 + $0x348] sm:$0xff]  ;;  %v6457_v21 = vpack.c.bf16 %v1978_v22, %v1974_v54  ;;  %v1970_v53 = vld [vmem:[#allocation2 + $0x360] sm:$0xff] }
 0x896   :  { %2105 = vmatpush1.bf16.msra.mxu0 %v6393_v37  ;;  %2146 = vmatpush1.bf16.msra.mxu1 %v6395_v2  ;;  %8086 = vst [vmem:[#allocation23_spill] sm:$0xff] %v6451_v9  ;;  %v1971_v58 = vld [vmem:[#allocation2 + $0x368] sm:$0xff]  ;;  %v6459_v63 = vpack.c.bf16 %v1980_v17, %v1976_v34  ;;  %8091 = vst [vmem:[#allocation50_spill] sm:$0xff] %v6465_v39  ;;  %v1968_v24 = vld [vmem:[#allocation2 + $0x350] sm:$0xff]  ;;  %v6469_v3 = vpack.c.bf16 %v1970_v53, %v1966_v0 }
 0x897   :  { %2106 = vmatprep.subr.bf16.mxu0 %v6399_v13  ;;  %2147 = vmatprep.subr.bf16.mxu1 %v6401_v60  ;;  %8085 = vst [vmem:[#allocation22_spill] sm:$0xff] %v6447_v6  ;;  %8088 = vst [vmem:[#allocation8_spill] sm:$0xff] %v6457_v21  ;;  %v6463_v14 = vpack.c.bf16 %v1971_v58, %v1967_v33  ;;  %v1972_v31 = vld [vmem:[#allocation2 + $0x370] sm:$0xff]  ;;  %v8094_v40 = vld [vmem:[#allocation25_spill] sm:$0xff] }
 0x898   :  { %2134 = vmatprep.mubr.bf16.mxu0 %v7989_v42  ;;  %2175 = vmatprep.mubr.bf16.mxu1 %v7989_v42  ;;  %8089 = vst [vmem:[#allocation9_spill] sm:$0xff] %v6459_v63  ;;  %8092 = vst [vmem:[#allocation53_spill] sm:$0xff] %v6469_v3  ;;  %v6471_v43 = vpack.c.bf16 %v1972_v31, %v1968_v24  ;;  %v1790_v44 = vld [vmem:[#allocation2 + $0x740] ss:$8 sm:$0xf] }
 0x899   :  { %8090 = vst [vmem:[#allocation49_spill] sm:$0xff] %v6463_v14  ;;  %v1795_v51 = vrot.slane %v1790_v44, %v8077_v11  ;;  %v1803_v5 = vrot.slane %v1790_v44, %v8094_v40  ;;  %v8095_v30 = vld [vmem:[#allocation7_spill] sm:$0xff]  ;;  %v8096_v12 = vld [vmem:[#allocation26_spill] sm:$0xff] }
 0x89a   :  { %2107 = vmatpush1.bf16.msra.mxu0 %v6407_v16  ;;  %2148 = vmatpush1.bf16.msra.mxu1 %v6409_v61  ;;  %8093 = vst [vmem:[#allocation54_spill] sm:$0xff] %v6471_v43  ;;  %v1799_v29 = vrot.slane %v1790_v44, %v8095_v30  ;;  %v1807_v45 = vrot.slane %v1790_v44, %v8096_v12 }
 0x89b   :  { %2108 = vmatprep.subr.bf16.mxu0 %v6413_v38  ;;  %2149 = vmatprep.subr.bf16.mxu1 %v6415_v59 }
 0x89e   :  { %2109 = vmatpush1.bf16.msra.mxu0 %v6421_v20  ;;  %2150 = vmatpush1.bf16.msra.mxu1 %v6423_v23 }
 0x89f   :  { %2110 = vmatprep.subr.bf16.mxu0 %v6427_v35  ;;  %2151 = vmatprep.subr.bf16.mxu1 %v6429_v36 }
 0x8a2   :  { %2111 = vmatpush1.bf16.msra.mxu0 %v6433_v56  ;;  %2152 = vmatpush1.bf16.msra.mxu1 %v6435_v1 }
 0x8a3   :  { %2112 = vmatprep.subr.bf16.mxu0 %v6439_v57  ;;  %2153 = vmatprep.subr.bf16.mxu1 %v6441_v10 }
 0x8a6   :  { %2113 = vmatpush1.bf16.msra.mxu0 %v6445_v46  ;;  %2154 = vmatpush1.bf16.msra.mxu1 %v6447_v6 }
 0x8a7   :  { %2114 = vmatprep.subr.bf16.mxu0 %v6451_v9  ;;  %2155 = vmatprep.subr.bf16.mxu1 %v6453_v27 }
 0x8aa   :  { %2115 = vmatpush1.bf16.msra.mxu0 %v6457_v21  ;;  %2156 = vmatpush1.bf16.msra.mxu1 %v6459_v63 }
 0x8ab   :  { %2116 = vmatprep.subr.bf16.mxu0 %v6463_v14  ;;  %2157 = vmatprep.subr.bf16.mxu1 %v6465_v39 }
 0x8ae   :  { %2117 = vmatpush1.bf16.msra.mxu0 %v6469_v3  ;;  %2158 = vmatpush1.bf16.msra.mxu1 %v6471_v43 }
 0x8af   :  { %2241 = vmatprep.subr.bf16.mxu0 %v6265_v15  ;;  %2282 = vmatprep.subr.bf16.mxu1 %v6267_v19 }
 0x8b1   :  { %2135 = vmatmul.mubr.bf16.vlgmr.msra.gmra.mxu0 %v7989_v42  ;;  %2176 = vmatmul.mubr.bf16.vlgmr.msra.gmra.mxu1 %v7989_v42 }
 0x8b2   :  { %2242 = vmatpush1.bf16.msra.mxu0 %v6371_v32  ;;  %2283 = vmatpush1.bf16.msra.mxu1 %v6376_v50 }
 0x8b3   :  { %2243 = vmatprep.subr.bf16.mxu0 %v6380_v7  ;;  %2284 = vmatprep.subr.bf16.mxu1 %v6385_v18 }
 0x8b4   :  { %2273 = vmatprep.mubr.bf16.mxu0 %v7989_v42  ;;  %2314 = vmatprep.mubr.bf16.mxu1 %v7989_v42 }
 0x8b6   :  { %2244 = vmatpush1.bf16.msra.mxu0 %v6393_v37  ;;  %2285 = vmatpush1.bf16.msra.mxu1 %v6395_v2 }
 0x8b7   :  { %2245 = vmatprep.subr.bf16.mxu0 %v6399_v13  ;;  %2286 = vmatprep.subr.bf16.mxu1 %v6401_v60 }
 0x8ba   :  { %2246 = vmatpush1.bf16.msra.mxu0 %v6407_v16  ;;  %2287 = vmatpush1.bf16.msra.mxu1 %v6409_v61 }
 0x8bb   :  { %2247 = vmatprep.subr.bf16.mxu0 %v6413_v38  ;;  %2288 = vmatprep.subr.bf16.mxu1 %v6415_v59 }
 0x8be   :  { %2248 = vmatpush1.bf16.msra.mxu0 %v6421_v20  ;;  %2289 = vmatpush1.bf16.msra.mxu1 %v6423_v23 }
 0x8bf   :  { %2249 = vmatprep.subr.bf16.mxu0 %v6427_v35  ;;  %2290 = vmatprep.subr.bf16.mxu1 %v6429_v36 }
 0x8c2   :  { %2250 = vmatpush1.bf16.msra.mxu0 %v6433_v56  ;;  %2291 = vmatpush1.bf16.msra.mxu1 %v6435_v1 }
 0x8c3   :  { %2251 = vmatprep.subr.bf16.mxu0 %v6439_v57  ;;  %2292 = vmatprep.subr.bf16.mxu1 %v6441_v10 }
 0x8c6   :  { %2252 = vmatpush1.bf16.msra.mxu0 %v6445_v46  ;;  %2293 = vmatpush1.bf16.msra.mxu1 %v6447_v6 }
 0x8c7   :  { %2253 = vmatprep.subr.bf16.mxu0 %v6451_v9  ;;  %2294 = vmatprep.subr.bf16.mxu1 %v6453_v27 }
 0x8ca   :  { %2254 = vmatpush1.bf16.msra.mxu0 %v6457_v21  ;;  %2295 = vmatpush1.bf16.msra.mxu1 %v6459_v63 }
 0x8cb   :  { %2255 = vmatprep.subr.bf16.mxu0 %v6463_v14  ;;  %2296 = vmatprep.subr.bf16.mxu1 %v6465_v39 }
 0x8ce   :  { %2256 = vmatpush1.bf16.msra.mxu0 %v6469_v3  ;;  %2297 = vmatpush1.bf16.msra.mxu1 %v6471_v43 }
 0x8cf   :  { %2384 = vmatprep.subr.bf16.mxu0 %v6265_v15  ;;  %2425 = vmatprep.subr.bf16.mxu1 %v6267_v19 }
 0x951   :  { %v1878_v62 = vpop.f32.mrf.mxu0  ;;  %v1955_v52 = vpop.f32.mrf.mxu1 }
 0x952   :  { %v6519_v8 = vadd.f32 %v1878_v62, %v1795_v51  ;;  %v6521_v47 = vadd.f32 %v1955_v52, %v1803_v5 }
 0x953   :  { %v1880_v54 = vpop.f32.mrf.mxu0  ;;  %v1957_v22 = vpop.f32.mrf.mxu1 }
 0x954   :  { %v6523_v34 = vadd.f32 %v1880_v54, %v1799_v29  ;;  %v6525_v17 = vadd.f32 %v1957_v22, %v1807_v45  ;;  %v2082_v4 = vrot.slane %v6519_v8, 7  ;;  %v2088_v41 = vrot.slane %v6521_v47, 7 }
 0x955   :  { %v1884_v33 = vpop.f32.mrf.mxu0  ;;  %v1961_v58 = vpop.f32.mrf.mxu1  ;;  %v2209_v0 = vrot.slane %v6519_v8, 1  ;;  %v2221_v31 = vrot.slane %v6519_v8, 6  ;;  %v2213_v44 = vrot.slane %v6521_v47, 1  ;;  %v2227_v52 = vrot.slane %v6521_v47, 6 }
 0x956   :  { %v6530_v53 = vadd.f32 %v1884_v33, %v1795_v51  ;;  %v6532_v24 = vadd.f32 %v1961_v58, %v1803_v5  ;;  %v2085_v12 = vrot.slane %v6523_v34, 7  ;;  %v2091_v62 = vrot.slane %v6525_v17, 7 }
 0x957   :  { %v1886_v40 = vpop.f32.mrf.mxu0  ;;  %v1963_v30 = vpop.f32.mrf.mxu1  ;;  %v2211_v54 = vrot.slane %v6523_v34, 1  ;;  %v2224_v15 = vrot.slane %v6523_v34, 6  ;;  %v2230_v43 = vrot.slane %v6525_v17, 6  ;;  %v2351_v21 = vrot.slane %v6523_v34, 2 }
 0x958   :  { %v6540_v22 = vadd.f32 %v1886_v40, %v1799_v29  ;;  %v6542_v51 = vadd.f32 %v1963_v30, %v1807_v45  ;;  %v2070_v5 = vrot.slane %v6530_v53, 7  ;;  %v2083_v33 = vrot.slane %v6530_v53, 6 }
 0x959   :  { %v2074_v58 = vrot.slane %v6532_v24, 7  ;;  %v2089_v49 = vrot.slane %v6532_v24, 6  ;;  %v6550_v11 = vsel %vm433_vm9, %v6530_v53, %v2209_v0  ;;  %v2222_v48 = vrot.slane %v6530_v53, 5 }
 0x95a   :  { %8097 = vst [vmem:[#allocation51_spill] sm:$0xff] %v6550_v11  ;;  %v6555_v29 = vsel %vm433_vm9, %v2070_v5, %v6519_v8  ;;  %v6558_v45 = vsel %vm433_vm9, %v2083_v33, %v2082_v4  ;;  %v2072_v40 = vrot.slane %v6540_v22, 7  ;;  %v2086_v30 = vrot.slane %v6540_v22, 6 }
 0x95b   :  { %8098 = vst [vmem:[#allocation52_spill] sm:$0xff] %v6555_v29  ;;  %8099 = vst [vmem:[#allocation55_spill] sm:$0xff] %v6558_v45  ;;  %v2076_v19 = vrot.slane %v6542_v51, 7  ;;  %v2215_v0 = vrot.slane %v6525_v17, 1  ;;  %v6572_v4 = vsel %vm433_vm9, %v2074_v58, %v6521_v47  ;;  %v6575_v33 = vsel %vm433_vm9, %v2089_v49, %v2088_v41 }
 0x95c   :  { %8100 = vst [vmem:[#allocation56_spill] sm:$0xff] %v6572_v4  ;;  %8101 = vst [vmem:[#allocation46_spill] sm:$0xff] %v6575_v33  ;;  %v2092_v3 = vrot.slane %v6542_v51, 6  ;;  %v6580_v39 = vsel %vm433_vm9, %v2072_v40, %v6523_v34  ;;  %v6583_v14 = vsel %vm433_vm9, %v2086_v30, %v2085_v12  ;;  %v6586_v63 = vsel %vm433_vm9, %v2222_v48, %v2221_v31 }
 0x95d   :  { %8102 = vst [vmem:[#allocation45_spill] sm:$0xff] %v6580_v39  ;;  %8103 = vst [vmem:[#allocation44_spill] sm:$0xff] %v6583_v14  ;;  %v6590_v5 = vsel %vm433_vm9, %v6532_v24, %v2213_v44  ;;  %v6594_v49 = vsel %vm433_vm9, %v2076_v19, %v6525_v17  ;;  %v2228_v58 = vrot.slane %v6532_v24, 5  ;;  %v6603_v12 = vsel %vm433_vm9, %v6540_v22, %v2211_v54 }
 0x95e   :  { %8104 = vst [vmem:[#allocation43_spill] sm:$0xff] %v6586_v63  ;;  %8105 = vst [vmem:[#allocation48_spill] sm:$0xff] %v6590_v5  ;;  %v6606_v48 = vsel %vm433_vm9, %v2092_v3, %v2091_v62  ;;  %v2225_v31 = vrot.slane %v6540_v22, 5  ;;  %v6611_v19 = vsel %vm433_vm9, %v6542_v51, %v2215_v0  ;;  %v2231_v44 = vrot.slane %v6542_v51, 5 }
 0x95f   :  { %8106 = vst [vmem:[#allocation47_spill] sm:$0xff] %v6594_v49  ;;  %8107 = vst [vmem:[#allocation34_spill] sm:$0xff] %v6603_v12  ;;  %v6615_v40 = vsel %vm433_vm9, %v2228_v58, %v2227_v52  ;;  %v2348_v30 = vrot.slane %v6519_v8, 2  ;;  %v2349_v41 = vrot.slane %v6530_v53, 1  ;;  %v2364_v54 = vrot.slane %v6519_v8, 5 }
 0x960   :  { %8108 = vst [vmem:[#allocation27_spill] sm:$0xff] %v6606_v48  ;;  %8109 = vst [vmem:[#allocation41_spill] sm:$0xff] %v6611_v19  ;;  %v6625_v62 = vsel %vm433_vm9, %v2225_v31, %v2224_v15  ;;  %v6628_v0 = vsel %vm433_vm9, %v2231_v44, %v2230_v43  ;;  %v2365_v52 = vrot.slane %v6530_v53, 4  ;;  %v2354_v15 = vrot.slane %v6521_v47, 2 }
 0x961   :  { %8110 = vst [vmem:[#allocation37_spill] sm:$0xff] %v6615_v40  ;;  %8111 = vst [vmem:[#allocation40_spill] sm:$0xff] %v6625_v62  ;;  %v6640_v3 = vsel %vm433_vm9, %v2349_v41, %v2348_v30  ;;  %v2355_v31 = vrot.slane %v6532_v24, 1  ;;  %v2370_v44 = vrot.slane %v6521_v47, 5  ;;  %v2371_v27 = vrot.slane %v6532_v24, 4 }
 0x962   :  { %8112 = vst [vmem:[#allocation35_spill] sm:$0xff] %v6628_v0  ;;  %v6644_v43 = vsel %vm433_vm9, %v2365_v52, %v2364_v54  ;;  %v2352_v41 = vrot.slane %v6540_v22, 1  ;;  %v2367_v30 = vrot.slane %v6523_v34, 5  ;;  %v2368_v9 = vrot.slane %v6540_v22, 4 }
 0x963   :  { %v6657_v54 = vsel %vm433_vm9, %v2355_v31, %v2354_v15  ;;  %v6660_v52 = vsel %vm433_vm9, %v2371_v27, %v2370_v44  ;;  %v2357_v6 = vrot.slane %v6525_v17, 2  ;;  %v2358_v10 = vrot.slane %v6542_v51, 1 }
 0x964   :  { %8113 = vst [vmem:[#allocation42_spill] sm:$0xff] %v6657_v54  ;;  %8114 = vst [vmem:[#allocation39_spill] sm:$0xff] %v6660_v52  ;;  %v6669_v46 = vsel %vm433_vm9, %v2352_v41, %v2351_v21  ;;  %v2373_v15 = vrot.slane %v6525_v17, 5  ;;  %v6674_v31 = vsel %vm433_vm9, %v2368_v9, %v2367_v30  ;;  %v2374_v27 = vrot.slane %v6542_v51, 4 }
 0x965   :  { %8115 = vst [vmem:[#allocation29_spill] sm:$0xff] %v6669_v46  ;;  %8116 = vst [vmem:[#allocation28_spill] sm:$0xff] %v6674_v31  ;;  %v2491_v44 = vrot.slane %v6519_v8, 3  ;;  %v2492_v57 = vrot.slane %v6530_v53, 2  ;;  %v6684_v21 = vsel %vm433_vm9, %v2358_v10, %v2357_v6  ;;  %v2507_v41 = vrot.slane %v6519_v8, 4 }
 0x966   :  { %8117 = vst [vmem:[#allocation33_spill] sm:$0xff] %v6684_v21  ;;  %v2508_v1 = vrot.slane %v6530_v53, 3  ;;  %v6689_v9 = vsel %vm433_vm9, %v2374_v27, %v2373_v15  ;;  %v2497_v56 = vrot.slane %v6521_v47, 3  ;;  %v2498_v36 = vrot.slane %v6532_v24, 2 }
 0x967   :  { %8118 = vst [vmem:[#allocation32_spill] sm:$0xff] %v6689_v9  ;;  %v6692_v30 = vsel %vm433_vm9, %v2492_v57, %v2491_v44  ;;  %v2513_v8 = vrot.slane %v6521_v47, 4  ;;  %v2514_v53 = vrot.slane %v6532_v24, 3  ;;  %v2494_v27 = vrot.slane %v6523_v34, 3  ;;  %v8207_v25 = vld [vmem:[#allocation27_spill] sm:$0xff] }
 0x968   :  { %8119 = vst [vmem:[#allocation31_spill] sm:$0xff] %v6692_v30  ;;  %v6701_v6 = vsel %vm433_vm9, %v2508_v1, %v2507_v41  ;;  %v6710_v15 = vsel %vm433_vm9, %v2498_v36, %v2497_v56  ;;  %v2495_v44 = vrot.slane %v6540_v22, 2  ;;  %v2510_v1 = vrot.slane %v6523_v34, 4 }
 0x969   :  { %8120 = vst [vmem:[#allocation30_spill] sm:$0xff] %v6701_v6  ;;  %8121 = vst [vmem:[#allocation38_spill] sm:$0xff] %v6710_v15  ;;  %v6715_v10 = vsel %vm433_vm9, %v2514_v53, %v2513_v8  ;;  %v2511_v47 = vrot.slane %v6540_v22, 3  ;;  %v2500_v24 = vrot.slane %v6525_v17, 3  ;;  %v2501_v56 = vrot.slane %v6542_v51, 2 }
 0x96a   :  { %8122 = vst [vmem:[#allocation36_spill] sm:$0xff] %v6715_v10  ;;  %v6725_v36 = vsel %vm433_vm9, %v2495_v44, %v2494_v27  ;;  %v2516_v57 = vrot.slane %v6525_v17, 4  ;;  %v2517_v34 = vrot.slane %v6542_v51, 3 }
 0x96b   :  { %8123 = vst [vmem:[#allocation5_spill] sm:$0xff] %v6725_v36  ;;  %v6730_v8 = vsel %vm433_vm9, %v2511_v47, %v2510_v1  ;;  %v6746_v27 = vsel %vm433_vm9, %v2501_v56, %v2500_v24  ;;  %v8127_v24 = vsel %vm5565_vm8, %v6555_v29, %v6558_v45  ;;  %v8147_v36 = vsel %vm5586_vm11, %v6603_v12, %v6625_v62 }
 0x96c   :  { %8124 = vst [vmem:[#allocation12_spill] sm:$0xff] %v6730_v8  ;;  %8125 = vst [vmem:[#allocation11_spill] sm:$0xff] %v6746_v27  ;;  %v6757_v1 = vsel %vm433_vm9, %v2517_v34, %v2516_v57  ;;  %v2099_v34 = vsel %vm5586_vm11, %v6580_v39, %v6583_v14  ;;  %v8146_v14 = vsel %vm5565_vm8, %v6550_v11, %v6586_v63 }
 0x96d   :  { %8126 = vst [vmem:[#allocation57_spill] sm:$0xff] %v6757_v1  ;;  %v8149_v12 = vsel %vm5590_vm12, %v6611_v19, %v6628_v0  ;;  %v8156_v19 = vld [vmem:[#allocation33_spill] sm:$0xff] }
 0x96e   :  { %v8157_v0 = vld [vmem:[#allocation32_spill] sm:$0xff] }
 0x971   :  { %v2136_v53 = vpop.f32.mrf.mxu0  ;;  %v2177_v44 = vpop.f32.mrf.mxu1 }
 0x972   :  { %v2137_v51 = vadd.f32 %v2136_v53, %v8127_v24  ;;  %v2100_v24 = vsel %vm5576_vm10, %v6572_v4, %v6575_v33 }
 0x973   :  { %v2138_v22 = vpop.f32.mrf.mxu0  ;;  %v2179_v57 = vpop.f32.mrf.mxu1  ;;  %v2178_v47 = vadd.f32 %v2177_v44, %v2100_v24 }
 0x974   :  { %v4639_v41 = vmul.f32 -1.442695, %v2137_v51  ;;  %v2139_v17 = vadd.f32 %v2138_v22, %v2099_v34  ;;  %v2101_v51 = vsel %vm5590_vm12, %v6594_v49, %v6606_v48  ;;  %v8144_v49 = vld [vmem:[#allocation13_spill] sm:$0xff]  ;;  %v8145_v48 = vld [vmem:[#allocation14_spill] sm:$0xff] }
 0x975   :  { %v2140_v58 = vpop.f32.mrf.mxu0  ;;  %v2181_v1 = vpop.f32.mrf.mxu1  ;;  %v4641_v39 = vmul.f32 -1.442695, %v2178_v47 }
 0x976   :  { %5130 = vpow2.f32 %v4639_v41  ;;  %v4640_v53 = vmul.f32 -1.442695, %v2139_v17  ;;  %v2180_v58 = vadd.f32 %v2179_v57, %v2101_v51 }
 0x977   :  { %v2141_v29 = vpop.f32.mrf.mxu0  ;;  %v2182_v45 = vpop.f32.mrf.mxu1 }
 0x978   :  { %5132 = vpow2.f32 %v4640_v53 }
 0x979   :  { %5134 = vpow2.f32 %v4641_v39 }
 0x983   :  { %v5131_v22 = vpop.eup %5130 }
 0x984   :  { %v2193_v1 = vadd.f32 1.0, %v5131_v22 }
 0x985   :  { %v5133_v41 = vpop.eup %5132 }
 0x986   :  { %5136 = vrcp.f32 %v2193_v1  ;;  %v2194_v29 = vadd.f32 1.0, %v5133_v41  ;;  %v5135_v45 = vpop.eup %5134  ;;  %v8130_v1 = vld [vmem:[#allocation17_spill] sm:$0xff]  ;;  %v8131_v41 = vld [vmem:[#allocation18_spill] sm:$0xff] }
 0x987   :  { %5138 = vtanh.f32 %v2180_v58  ;;  %v2195_v44 = vadd.f32 1.0, %v5135_v45  ;;  %v8129_v58 = vld [vmem:[#allocation16_spill] sm:$0xff] }
 0x988   :  { %5140 = vrcp.f32 %v2194_v29  ;;  %v8132_v29 = vld [vmem:[#allocation19_spill] sm:$0xff]  ;;  %v8133_v45 = vld [vmem:[#allocation20_spill] sm:$0xff] }
 0x989   :  { %5142 = vrcp.f32 %v2195_v44  ;;  %v8137_v44 = vld [vmem:[#allocation24_spill] sm:$0xff] }
 0x993   :  { %v5137_v17 = vpop.eup %5136 }
 0x994   :  { %v5139_v34 = vpop.eup %5138 }
 0x995   :  { %v5141_v53 = vpop.eup %5140  ;;  %v2204_v24 = vmul.f32 %v5139_v34, %v5137_v17  ;;  %v8134_v17 = vld [vmem:[#allocation21_spill] sm:$0xff]  ;;  %v8135_v34 = vld [vmem:[#allocation22_spill] sm:$0xff] }
 0x996   :  { %v2203_v47 = vmul.f32 0.0, %v5141_v53  ;;  %v5143_v57 = vpop.eup %5142  ;;  %v8136_v53 = vld [vmem:[#allocation23_spill] sm:$0xff] }
 0x998   :  { %v6828_v56 = vadd.f32 %v2204_v24, %v2203_v47  ;;  %v8138_v47 = vld [vmem:[#allocation8_spill] sm:$0xff]  ;;  %v8139_v24 = vld [vmem:[#allocation9_spill] sm:$0xff] }
 0x99a   :  { %5144 = vtanh.f32 %v6828_v56 }
 0x9a7   :  { %v5145_v51 = vpop.eup %5144 }
 0x9a8   :  { %v6831_v22 = vmul.f32 %v5145_v51, %v5143_v57  ;;  %v8140_v57 = vld [vmem:[#allocation49_spill] sm:$0xff]  ;;  %v8141_v51 = vld [vmem:[#allocation50_spill] sm:$0xff] }
 0x9aa   :  { %8128 = vst [vmem:[#allocation25_spill] sm:$0xff] %v6831_v22  ;;  %v2208_v39 = vpack.c.bf16 %v6831_v22, %v6831_v22  ;;  %v8143_v22 = vld [vmem:[#allocation54_spill] sm:$0xff] }
 0x9ac   :  { %2274 = vmatmul.mubr.bf16.vlgmr.msra.gmra.mxu0 %v2208_v39  ;;  %2315 = vmatmul.mubr.bf16.vlgmr.msra.gmra.mxu1 %v2208_v39  ;;  %v8142_v39 = vld [vmem:[#allocation53_spill] sm:$0xff] }
 0x9ad   :  { %2385 = vmatpush1.bf16.msra.mxu0 %v6371_v32  ;;  %2426 = vmatpush1.bf16.msra.mxu1 %v6376_v50 }
 0x9ae   :  { %2386 = vmatprep.subr.bf16.mxu0 %v6380_v7  ;;  %2427 = vmatprep.subr.bf16.mxu1 %v6385_v18 }
 0x9af   :  { %2416 = vmatprep.mubr.bf16.mxu0 %v7989_v42  ;;  %2457 = vmatprep.mubr.bf16.mxu1 %v7989_v42 }
 0x9b1   :  { %2387 = vmatpush1.bf16.msra.mxu0 %v6393_v37  ;;  %2428 = vmatpush1.bf16.msra.mxu1 %v6395_v2 }
 0x9b2   :  { %2388 = vmatprep.subr.bf16.mxu0 %v6399_v13  ;;  %2429 = vmatprep.subr.bf16.mxu1 %v6401_v60 }
 0x9b5   :  { %2389 = vmatpush1.bf16.msra.mxu0 %v6407_v16  ;;  %2430 = vmatpush1.bf16.msra.mxu1 %v6409_v61 }
 0x9b6   :  { %2390 = vmatprep.subr.bf16.mxu0 %v6413_v38  ;;  %2431 = vmatprep.subr.bf16.mxu1 %v6415_v59 }
 0x9b9   :  { %2391 = vmatpush1.bf16.msra.mxu0 %v6421_v20  ;;  %2432 = vmatpush1.bf16.msra.mxu1 %v6423_v23 }
 0x9ba   :  { %2392 = vmatprep.subr.bf16.mxu0 %v6427_v35  ;;  %2433 = vmatprep.subr.bf16.mxu1 %v8129_v58 }
 0x9bd   :  { %2393 = vmatpush1.bf16.msra.mxu0 %v8130_v1  ;;  %2434 = vmatpush1.bf16.msra.mxu1 %v8131_v41 }
 0x9be   :  { %2394 = vmatprep.subr.bf16.mxu0 %v8132_v29  ;;  %2435 = vmatprep.subr.bf16.mxu1 %v8133_v45 }
 0x9c1   :  { %2395 = vmatpush1.bf16.msra.mxu0 %v8134_v17  ;;  %2436 = vmatpush1.bf16.msra.mxu1 %v8135_v34 }
 0x9c2   :  { %2396 = vmatprep.subr.bf16.mxu0 %v8136_v53  ;;  %2437 = vmatprep.subr.bf16.mxu1 %v8137_v44 }
 0x9c5   :  { %2397 = vmatpush1.bf16.msra.mxu0 %v8138_v47  ;;  %2438 = vmatpush1.bf16.msra.mxu1 %v8139_v24 }
 0x9c6   :  { %2398 = vmatprep.subr.bf16.mxu0 %v8140_v57  ;;  %2439 = vmatprep.subr.bf16.mxu1 %v8141_v51 }
 0x9c9   :  { %2399 = vmatpush1.bf16.msra.mxu0 %v8142_v39  ;;  %2440 = vmatpush1.bf16.msra.mxu1 %v8143_v22 }
 0x9ca   :  { %2527 = vmatprep.subr.bf16.mxu0 %v8144_v49  ;;  %2568 = vmatprep.subr.bf16.mxu1 %v8145_v48 }
 0xa6c   :  { %v2275_v4 = vpop.f32.mrf.mxu0  ;;  %v2316_v33 = vpop.f32.mrf.mxu1 }
 0xa6d   :  { %v2276_v27 = vadd.f32 %v2275_v4, %v8146_v14  ;;  %v8148_v14 = vsel %vm5576_vm10, %v6590_v5, %v6615_v40  ;;  %v8158_v40 = vsel %vm5590_vm12, %v8156_v19, %v8157_v0  ;;  %v8166_v19 = vld [vmem:[#allocation38_spill] sm:$0xff] }
 0xa6e   :  { %v2277_v10 = vpop.f32.mrf.mxu0  ;;  %v2318_v15 = vpop.f32.mrf.mxu1  ;;  %v2317_v4 = vadd.f32 %v2316_v33, %v8148_v14 }
 0xa6f   :  { %v4642_v8 = vmul.f32 -1.442695, %v2276_v27  ;;  %v2278_v6 = vadd.f32 %v2277_v10, %v8147_v36  ;;  %v2319_v10 = vadd.f32 %v2318_v15, %v8149_v12 }
 0xa70   :  { %v2279_v30 = vpop.f32.mrf.mxu0  ;;  %v2320_v9 = vpop.f32.mrf.mxu1  ;;  %v4644_v27 = vmul.f32 -1.442695, %v2317_v4 }
 0xa71   :  { %5146 = vpow2.f32 %v4642_v8  ;;  %v4643_v21 = vmul.f32 -1.442695, %v2278_v6 }
 0xa72   :  { %v2280_v52 = vpop.f32.mrf.mxu0  ;;  %v2321_v54 = vpop.f32.mrf.mxu1 }
 0xa73   :  { %5148 = vpow2.f32 %v4643_v21 }
 0xa74   :  { %5150 = vpow2.f32 %v4644_v27 }
 0xa75   :  { %5152 = vtanh.f32 %v2319_v10 }
 0xa7e   :  { %v5147_v30 = vpop.eup %5146 }
 0xa7f   :  { %v2332_v9 = vadd.f32 1.0, %v5147_v30 }
 0xa80   :  { %v5149_v6 = vpop.eup %5148 }
 0xa81   :  { %5154 = vrcp.f32 %v2332_v9  ;;  %v2333_v54 = vadd.f32 1.0, %v5149_v6  ;;  %v5151_v52 = vpop.eup %5150  ;;  %v8151_v9 = vsel %vm5565_vm8, %v6640_v3, %v6644_v43 }
 0xa82   :  { %v5153_v21 = vpop.eup %5152  ;;  %v2334_v14 = vadd.f32 1.0, %v5151_v52 }
 0xa83   :  { %5156 = vrcp.f32 %v2333_v54 }
 0xa84   :  { %5158 = vrcp.f32 %v2334_v14 }
 0xa8e   :  { %v5155_v36 = vpop.eup %5154 }
 0xa8f   :  { %v2343_v8 = vmul.f32 %v5155_v36, %v5153_v21  ;;  %v8152_v36 = vsel %vm5586_vm11, %v6669_v46, %v6674_v31 }
 0xa90   :  { %v5157_v33 = vpop.eup %5156 }
 0xa91   :  { %v2342_v4 = vmul.f32 %v5157_v33, %v6828_v56  ;;  %v5159_v12 = vpop.eup %5158 }
 0xa93   :  { %v6890_v5 = vadd.f32 %v2343_v8, %v2342_v4 }
 0xa95   :  { %5160 = vtanh.f32 %v6890_v5 }
 0xaa2   :  { %v5161_v15 = vpop.eup %5160 }
 0xaa3   :  { %v6893_v27 = vmul.f32 %v5161_v15, %v5159_v12 }
 0xaa5   :  { %8150 = vst [vmem:[#allocation7_spill] sm:$0xff] %v6893_v27  ;;  %v2347_v10 = vpack.c.bf16 %v6893_v27, %v6893_v27 }
 0xaa7   :  { %2417 = vmatmul.mubr.bf16.vlgmr.msra.gmra.mxu0 %v2347_v10  ;;  %2458 = vmatmul.mubr.bf16.vlgmr.msra.gmra.mxu1 %v2347_v10  ;;  %v8153_v10 = vld [vmem:[#allocation42_spill] sm:$0xff] }
 0xaa8   :  { %2528 = vmatpush1.bf16.msra.mxu0 %v6371_v32  ;;  %2569 = vmatpush1.bf16.msra.mxu1 %v6376_v50 }
 0xaa9   :  { %2529 = vmatprep.subr.bf16.mxu0 %v6380_v7  ;;  %2570 = vmatprep.subr.bf16.mxu1 %v6385_v18 }
 0xaaa   :  { %2559 = vmatprep.mubr.bf16.mxu0 %v7989_v42  ;;  %2600 = vmatprep.mubr.bf16.mxu1 %v7989_v42 }
 0xaac   :  { %2530 = vmatpush1.bf16.msra.mxu0 %v6393_v37  ;;  %2571 = vmatpush1.bf16.msra.mxu1 %v6395_v2 }
 0xaad   :  { %2531 = vmatprep.subr.bf16.mxu0 %v6399_v13  ;;  %2572 = vmatprep.subr.bf16.mxu1 %v6401_v60 }
 0xab0   :  { %2532 = vmatpush1.bf16.msra.mxu0 %v6407_v16  ;;  %2573 = vmatpush1.bf16.msra.mxu1 %v6409_v61 }
 0xab1   :  { %2533 = vmatprep.subr.bf16.mxu0 %v6413_v38  ;;  %2574 = vmatprep.subr.bf16.mxu1 %v6415_v59 }
 0xab4   :  { %2534 = vmatpush1.bf16.msra.mxu0 %v6421_v20  ;;  %2575 = vmatpush1.bf16.msra.mxu1 %v6423_v23 }
 0xab5   :  { %2535 = vmatprep.subr.bf16.mxu0 %v6427_v35  ;;  %2576 = vmatprep.subr.bf16.mxu1 %v8129_v58 }
 0xab8   :  { %2536 = vmatpush1.bf16.msra.mxu0 %v8130_v1  ;;  %2577 = vmatpush1.bf16.msra.mxu1 %v8131_v41 }
 0xab9   :  { %2537 = vmatprep.subr.bf16.mxu0 %v8132_v29  ;;  %2578 = vmatprep.subr.bf16.mxu1 %v8133_v45 }
 0xabc   :  { %2538 = vmatpush1.bf16.msra.mxu0 %v8134_v17  ;;  %2579 = vmatpush1.bf16.msra.mxu1 %v8135_v34 }
 0xabd   :  { %2539 = vmatprep.subr.bf16.mxu0 %v8136_v53  ;;  %2580 = vmatprep.subr.bf16.mxu1 %v8137_v44 }
 0xac0   :  { %2540 = vmatpush1.bf16.msra.mxu0 %v8138_v47  ;;  %2581 = vmatpush1.bf16.msra.mxu1 %v8139_v24 }
 0xac1   :  { %2541 = vmatprep.subr.bf16.mxu0 %v8140_v57  ;;  %2582 = vmatprep.subr.bf16.mxu1 %v8141_v51 }
 0xac4   :  { %2542 = vmatpush1.bf16.msra.mxu0 %v8142_v39  ;;  %2583 = vmatpush1.bf16.msra.mxu1 %v8143_v22 }
 0xac5   :  { %2638 = vmatprep.subr.bf16.mxu0 %v8144_v49  ;;  %2679 = vmatprep.subr.bf16.mxu1 %v8145_v48 }
 0xb67   :  { %v2418_v56 = vpop.f32.mrf.mxu0  ;;  %v2459_v30 = vpop.f32.mrf.mxu1 }
 0xb68   :  { %v2419_v6 = vadd.f32 %v2418_v56, %v8151_v9  ;;  %v8154_v56 = vld [vmem:[#allocation39_spill] sm:$0xff] }
 0xb69   :  { %v2420_v54 = vpop.f32.mrf.mxu0  ;;  %v2461_v52 = vpop.f32.mrf.mxu1  ;;  %v8155_v9 = vsel %vm5576_vm10, %v8153_v10, %v8154_v56  ;;  %v8169_v10 = vld [vmem:[#allocation11_spill] sm:$0xff]  ;;  %v8170_v56 = vld [vmem:[#allocation57_spill] sm:$0xff] }
 0xb6a   :  { %v4645_v21 = vmul.f32 -1.442695, %v2419_v6  ;;  %v2421_v8 = vadd.f32 %v2420_v54, %v8152_v36  ;;  %v2460_v27 = vadd.f32 %v2459_v30, %v8155_v9  ;;  %v2462_v54 = vadd.f32 %v2461_v52, %v8158_v40 }
 0xb6b   :  { %v2422_v33 = vpop.f32.mrf.mxu0  ;;  %v2463_v14 = vpop.f32.mrf.mxu1  ;;  %v8171_v46 = vsel %vm5590_vm12, %v8169_v10, %v8170_v56 }
 0xb6c   :  { %5162 = vpow2.f32 %v4645_v21  ;;  %v4646_v4 = vmul.f32 -1.442695, %v2421_v8  ;;  %v4647_v6 = vmul.f32 -1.442695, %v2460_v27 }
 0xb6d   :  { %v2423_v12 = vpop.f32.mrf.mxu0  ;;  %v2464_v15 = vpop.f32.mrf.mxu1 }
 0xb6e   :  { %5164 = vpow2.f32 %v4646_v4 }
 0xb6f   :  { %5166 = vpow2.f32 %v4647_v6 }
 0xb70   :  { %5168 = vtanh.f32 %v2462_v54 }
 0xb79   :  { %v5163_v36 = vpop.eup %5162 }
 0xb7a   :  { %v2475_v33 = vadd.f32 1.0, %v5163_v36 }
 0xb7b   :  { %v5165_v21 = vpop.eup %5164 }
 0xb7c   :  { %5170 = vrcp.f32 %v2475_v33  ;;  %v2476_v8 = vadd.f32 1.0, %v5165_v21  ;;  %v5167_v14 = vpop.eup %5166  ;;  %v8160_v33 = vld [vmem:[#allocation31_spill] sm:$0xff]  ;;  %v8161_v21 = vld [vmem:[#allocation30_spill] sm:$0xff] }
 0xb7d   :  { %v5169_v4 = vpop.eup %5168  ;;  %v2477_v27 = vadd.f32 1.0, %v5167_v14 }
 0xb7e   :  { %5172 = vrcp.f32 %v2476_v8  ;;  %v8162_v8 = vsel %vm5565_vm8, %v8160_v33, %v8161_v21 }
 0xb7f   :  { %5174 = vrcp.f32 %v2477_v27  ;;  %v8164_v27 = vld [vmem:[#allocation12_spill] sm:$0xff] }
 0xb89   :  { %v5171_v12 = vpop.eup %5170 }
 0xb8a   :  { %v2486_v15 = vmul.f32 %v5171_v12, %v5169_v4 }
 0xb8b   :  { %v5173_v30 = vpop.eup %5172 }
 0xb8c   :  { %v2485_v9 = vmul.f32 %v5173_v30, %v6890_v5  ;;  %v5175_v40 = vpop.eup %5174  ;;  %v8163_v30 = vld [vmem:[#allocation5_spill] sm:$0xff] }
 0xb8e   :  { %v6952_v62 = vadd.f32 %v2486_v15, %v2485_v9  ;;  %v8165_v9 = vsel %vm5586_vm11, %v8163_v30, %v8164_v27 }
 0xb90   :  { %5176 = vtanh.f32 %v6952_v62 }
 0xb9d   :  { %v5177_v52 = vpop.eup %5176 }
 0xb9e   :  { %v6955_v6 = vmul.f32 %v5177_v52, %v5175_v40 }
 0xba0   :  { %8159 = vst [vmem:[#allocation26_spill] sm:$0xff] %v6955_v6  ;;  %v2490_v54 = vpack.c.bf16 %v6955_v6, %v6955_v6 }
 0xba2   :  { %2560 = vmatmul.mubr.bf16.vlgmr.msra.gmra.mxu0 %v2490_v54  ;;  %2601 = vmatmul.mubr.bf16.vlgmr.msra.gmra.mxu1 %v2490_v54 }
 0xba3   :  { %2639 = vmatpush1.bf16.msra.mxu0 %v6371_v32  ;;  %2680 = vmatpush1.bf16.msra.mxu1 %v6376_v50 }
 0xba4   :  { %2640 = vmatprep.subr.bf16.mxu0 %v6380_v7  ;;  %2681 = vmatprep.subr.bf16.mxu1 %v6385_v18 }
 0xba5   :  { %2670 = vmatprep.mubr.bf16.mxu0 %v7989_v42  ;;  %2711 = vmatprep.mubr.bf16.mxu1 %v7989_v42 }
 0xba7   :  { %2641 = vmatpush1.bf16.msra.mxu0 %v6393_v37  ;;  %2682 = vmatpush1.bf16.msra.mxu1 %v6395_v2 }
 0xba8   :  { %2642 = vmatprep.subr.bf16.mxu0 %v6399_v13  ;;  %2683 = vmatprep.subr.bf16.mxu1 %v6401_v60 }
 0xbab   :  { %2643 = vmatpush1.bf16.msra.mxu0 %v6407_v16  ;;  %2684 = vmatpush1.bf16.msra.mxu1 %v6409_v61 }
 0xbac   :  { %2644 = vmatprep.subr.bf16.mxu0 %v6413_v38  ;;  %2685 = vmatprep.subr.bf16.mxu1 %v6415_v59 }
 0xbaf   :  { %2645 = vmatpush1.bf16.msra.mxu0 %v6421_v20  ;;  %2686 = vmatpush1.bf16.msra.mxu1 %v6423_v23 }
 0xbb0   :  { %2646 = vmatprep.subr.bf16.mxu0 %v6427_v35  ;;  %2687 = vmatprep.subr.bf16.mxu1 %v8129_v58 }
 0xbb3   :  { %2647 = vmatpush1.bf16.msra.mxu0 %v8130_v1  ;;  %2688 = vmatpush1.bf16.msra.mxu1 %v8131_v41 }
 0xbb4   :  { %2648 = vmatprep.subr.bf16.mxu0 %v8132_v29  ;;  %2689 = vmatprep.subr.bf16.mxu1 %v8133_v45 }
 0xbb7   :  { %2649 = vmatpush1.bf16.msra.mxu0 %v8134_v17  ;;  %2690 = vmatpush1.bf16.msra.mxu1 %v8135_v34 }
 0xbb8   :  { %2650 = vmatprep.subr.bf16.mxu0 %v8136_v53  ;;  %2691 = vmatprep.subr.bf16.mxu1 %v8137_v44 }
 0xbbb   :  { %2651 = vmatpush1.bf16.msra.mxu0 %v8138_v47  ;;  %2692 = vmatpush1.bf16.msra.mxu1 %v8139_v24 }
 0xbbc   :  { %2652 = vmatprep.subr.bf16.mxu0 %v8140_v57  ;;  %2693 = vmatprep.subr.bf16.mxu1 %v8141_v51 }
 0xbbf   :  { %2653 = vmatpush1.bf16.msra.mxu0 %v8142_v39  ;;  %2694 = vmatpush1.bf16.msra.mxu1 %v8143_v22 }
 0xbc0   :  { %2749 = vmatprep.subr.bf16.mxu0 %v8144_v49  ;;  %2790 = vmatprep.subr.bf16.mxu1 %v8145_v48 }
 0xc62   :  { %v2561_v5 = vpop.f32.mrf.mxu0  ;;  %v2602_v36 = vpop.f32.mrf.mxu1 }
 0xc63   :  { %v2562_v14 = vadd.f32 %v2561_v5, %v8162_v8  ;;  %v8167_v5 = vld [vmem:[#allocation36_spill] sm:$0xff] }
 0xc64   :  { %v2563_v4 = vpop.f32.mrf.mxu0  ;;  %v2604_v12 = vpop.f32.mrf.mxu1  ;;  %v8168_v8 = vsel %vm5576_vm10, %v8166_v19, %v8167_v5 }
 0xc65   :  { %v4648_v15 = vmul.f32 -1.442695, %v2562_v14  ;;  %v2564_v40 = vadd.f32 %v2563_v4, %v8165_v9  ;;  %v2603_v0 = vadd.f32 %v2602_v36, %v8168_v8  ;;  %v2605_v4 = vadd.f32 %v2604_v12, %v8171_v46 }
 0xc66   :  { %v2565_v52 = vpop.f32.mrf.mxu0  ;;  %v2606_v54 = vpop.f32.mrf.mxu1 }
 0xc67   :  { %5178 = vpow2.f32 %v4648_v15  ;;  %v4649_v6 = vmul.f32 -1.442695, %v2564_v40  ;;  %v4650_v14 = vmul.f32 -1.442695, %v2603_v0 }
 0xc68   :  { %v2566_v11 = vpop.f32.mrf.mxu0  ;;  %v2607_v63 = vpop.f32.mrf.mxu1 }
 0xc69   :  { %5180 = vpow2.f32 %v4649_v6 }
 0xc6a   :  { %5182 = vpow2.f32 %v4650_v14 }
 0xc6b   :  { %5184 = vtanh.f32 %v2605_v4 }
 0xc74   :  { %v5179_v9 = vpop.eup %5178 }
 0xc75   :  { %v2618_v52 = vadd.f32 1.0, %v5179_v9 }
 0xc76   :  { %v5181_v15 = vpop.eup %5180 }
 0xc77   :  { %5186 = vrcp.f32 %v2618_v52  ;;  %v2619_v11 = vadd.f32 1.0, %v5181_v15  ;;  %v5183_v63 = vpop.eup %5182  ;;  %v8172_v52 = vsel %vm5565_vm8, %v8161_v21, %v8160_v33  ;;  %v8174_v33 = vsel %vm5576_vm10, %v8167_v5, %v8166_v19 }
 0xc78   :  { %v5185_v6 = vpop.eup %5184  ;;  %v2620_v0 = vadd.f32 1.0, %v5183_v63 }
 0xc79   :  { %5188 = vrcp.f32 %v2619_v11 }
 0xc7a   :  { %5190 = vrcp.f32 %v2620_v0 }
 0xc84   :  { %v5187_v40 = vpop.eup %5186 }
 0xc85   :  { %v2629_v54 = vmul.f32 %v5187_v40, %v5185_v6  ;;  %v8173_v40 = vsel %vm5586_vm11, %v8164_v27, %v8163_v30  ;;  %v8175_v30 = vsel %vm5590_vm12, %v8170_v56, %v8169_v10 }
 0xc86   :  { %v5189_v36 = vpop.eup %5188 }
 0xc87   :  { %v2628_v8 = vmul.f32 %v5189_v36, %v6952_v62  ;;  %v5191_v46 = vpop.eup %5190 }
 0xc89   :  { %v7014_v31 = vadd.f32 %v2629_v54, %v2628_v8 }
 0xc8b   :  { %5192 = vtanh.f32 %v7014_v31 }
 0xc98   :  { %v5193_v12 = vpop.eup %5192 }
 0xc99   :  { %v7017_v14 = vmul.f32 %v5193_v12, %v5191_v46 }
 0xc9b   :  { %v2633_v4 = vpack.c.bf16 %v7017_v14, %v7017_v14 }
 0xc9d   :  { %2671 = vmatmul.mubr.bf16.vlgmr.msra.gmra.mxu0 %v2633_v4  ;;  %2712 = vmatmul.mubr.bf16.vlgmr.msra.gmra.mxu1 %v2633_v4 }
 0xc9e   :  { %2750 = vmatpush1.bf16.msra.mxu0 %v6371_v32  ;;  %2791 = vmatpush1.bf16.msra.mxu1 %v6376_v50 }
 0xc9f   :  { %2751 = vmatprep.subr.bf16.mxu0 %v6380_v7  ;;  %2792 = vmatprep.subr.bf16.mxu1 %v6385_v18 }
 0xca0   :  { %2781 = vmatprep.mubr.bf16.mxu0 %v7989_v42  ;;  %2822 = vmatprep.mubr.bf16.mxu1 %v7989_v42 }
 0xca2   :  { %2752 = vmatpush1.bf16.msra.mxu0 %v6393_v37  ;;  %2793 = vmatpush1.bf16.msra.mxu1 %v6395_v2 }
 0xca3   :  { %2753 = vmatprep.subr.bf16.mxu0 %v6399_v13  ;;  %2794 = vmatprep.subr.bf16.mxu1 %v6401_v60 }
 0xca6   :  { %2754 = vmatpush1.bf16.msra.mxu0 %v6407_v16  ;;  %2795 = vmatpush1.bf16.msra.mxu1 %v6409_v61 }
 0xca7   :  { %2755 = vmatprep.subr.bf16.mxu0 %v6413_v38  ;;  %2796 = vmatprep.subr.bf16.mxu1 %v6415_v59 }
 0xcaa   :  { %2756 = vmatpush1.bf16.msra.mxu0 %v6421_v20  ;;  %2797 = vmatpush1.bf16.msra.mxu1 %v6423_v23 }
 0xcab   :  { %2757 = vmatprep.subr.bf16.mxu0 %v6427_v35  ;;  %2798 = vmatprep.subr.bf16.mxu1 %v8129_v58 }
 0xcae   :  { %2758 = vmatpush1.bf16.msra.mxu0 %v8130_v1  ;;  %2799 = vmatpush1.bf16.msra.mxu1 %v8131_v41 }
 0xcaf   :  { %2759 = vmatprep.subr.bf16.mxu0 %v8132_v29  ;;  %2800 = vmatprep.subr.bf16.mxu1 %v8133_v45 }
 0xcb2   :  { %2760 = vmatpush1.bf16.msra.mxu0 %v8134_v17  ;;  %2801 = vmatpush1.bf16.msra.mxu1 %v8135_v34 }
 0xcb3   :  { %2761 = vmatprep.subr.bf16.mxu0 %v8136_v53  ;;  %2802 = vmatprep.subr.bf16.mxu1 %v8137_v44 }
 0xcb6   :  { %2762 = vmatpush1.bf16.msra.mxu0 %v8138_v47  ;;  %2803 = vmatpush1.bf16.msra.mxu1 %v8139_v24 }
 0xcb7   :  { %2763 = vmatprep.subr.bf16.mxu0 %v8140_v57  ;;  %2804 = vmatprep.subr.bf16.mxu1 %v8141_v51 }
 0xcba   :  { %2764 = vmatpush1.bf16.msra.mxu0 %v8142_v39  ;;  %2805 = vmatpush1.bf16.msra.mxu1 %v8143_v22 }
 0xcbb   :  { %2860 = vmatprep.subr.bf16.mxu0 %v8144_v49  ;;  %2901 = vmatprep.subr.bf16.mxu1 %v8145_v48 }
 0xd5d   :  { %v2672_v62 = vpop.f32.mrf.mxu0  ;;  %v2713_v9 = vpop.f32.mrf.mxu1 }
 0xd5e   :  { %v2673_v15 = vadd.f32 %v2672_v62, %v8172_v52  ;;  %v2714_v21 = vadd.f32 %v2713_v9, %v8174_v33 }
 0xd5f   :  { %v2674_v11 = vpop.f32.mrf.mxu0  ;;  %v2715_v63 = vpop.f32.mrf.mxu1 }
 0xd60   :  { %v4651_v6 = vmul.f32 -1.442695, %v2673_v15  ;;  %v2675_v54 = vadd.f32 %v2674_v11, %v8173_v40  ;;  %v4653_v4 = vmul.f32 -1.442695, %v2714_v21  ;;  %v2716_v27 = vadd.f32 %v2715_v63, %v8175_v30 }
 0xd61   :  { %v2676_v36 = vpop.f32.mrf.mxu0  ;;  %v2717_v0 = vpop.f32.mrf.mxu1 }
 0xd62   :  { %5194 = vpow2.f32 %v4651_v6  ;;  %v4652_v8 = vmul.f32 -1.442695, %v2675_v54 }
 0xd63   :  { %v2677_v46 = vpop.f32.mrf.mxu0  ;;  %v2718_v12 = vpop.f32.mrf.mxu1 }
 0xd64   :  { %5196 = vpow2.f32 %v4652_v8  ;;  %v8176_v12 = vsel %vm5565_vm8, %v6644_v43, %v6640_v3  ;;  %v8180_v3 = vld [vmem:[#allocation39_spill] sm:$0xff]  ;;  %v8181_v43 = vld [vmem:[#allocation42_spill] sm:$0xff] }
 0xd65   :  { %5198 = vpow2.f32 %v4653_v4 }
 0xd66   :  { %5200 = vtanh.f32 %v2716_v27  ;;  %v8177_v27 = vld [vmem:[#allocation28_spill] sm:$0xff] }
 0xd6f   :  { %v5195_v62 = vpop.eup %5194 }
 0xd70   :  { %v2729_v52 = vadd.f32 1.0, %v5195_v62  ;;  %v8178_v62 = vld [vmem:[#allocation29_spill] sm:$0xff] }
 0xd71   :  { %v5197_v15 = vpop.eup %5196 }
 0xd72   :  { %5202 = vrcp.f32 %v2729_v52  ;;  %v2730_v11 = vadd.f32 1.0, %v5197_v15  ;;  %v5199_v6 = vpop.eup %5198  ;;  %v8179_v52 = vsel %vm5586_vm11, %v8177_v27, %v8178_v62 }
 0xd73   :  { %v5201_v40 = vpop.eup %5200  ;;  %v2731_v9 = vadd.f32 1.0, %v5199_v6 }
 0xd74   :  { %5204 = vrcp.f32 %v2730_v11 }
 0xd75   :  { %5206 = vrcp.f32 %v2731_v9  ;;  %v8183_v9 = vld [vmem:[#allocation32_spill] sm:$0xff] }
 0xd7f   :  { %v5203_v54 = vpop.eup %5202 }
 0xd80   :  { %v2740_v19 = vmul.f32 %v5203_v54, %v5201_v40  ;;  %v8182_v54 = vsel %vm5576_vm10, %v8180_v3, %v8181_v43 }
 0xd81   :  { %v5205_v5 = vpop.eup %5204 }
 0xd82   :  { %v2739_v36 = vmul.f32 %v5205_v5, %v7014_v31  ;;  %v5207_v10 = vpop.eup %5206 }
 0xd84   :  { %v7076_v0 = vadd.f32 %v2740_v19, %v2739_v36  ;;  %v8184_v36 = vld [vmem:[#allocation33_spill] sm:$0xff] }
 0xd86   :  { %5208 = vtanh.f32 %v7076_v0 }
 0xd93   :  { %v5209_v56 = vpop.eup %5208 }
 0xd94   :  { %v7079_v63 = vmul.f32 %v5209_v56, %v5207_v10  ;;  %v8185_v10 = vsel %vm5590_vm12, %v8183_v9, %v8184_v36 }
 0xd96   :  { %v2744_v8 = vpack.c.bf16 %v7079_v63, %v7079_v63 }
 0xd98   :  { %2782 = vmatmul.mubr.bf16.vlgmr.msra.gmra.mxu0 %v2744_v8  ;;  %2823 = vmatmul.mubr.bf16.vlgmr.msra.gmra.mxu1 %v2744_v8 }
 0xd99   :  { %2861 = vmatpush1.bf16.msra.mxu0 %v6371_v32  ;;  %2902 = vmatpush1.bf16.msra.mxu1 %v6376_v50 }
 0xd9a   :  { %2862 = vmatprep.subr.bf16.mxu0 %v6380_v7  ;;  %2903 = vmatprep.subr.bf16.mxu1 %v6385_v18 }
 0xd9b   :  { %2892 = vmatprep.mubr.bf16.mxu0 %v7989_v42  ;;  %2933 = vmatprep.mubr.bf16.mxu1 %v7989_v42 }
 0xd9d   :  { %2863 = vmatpush1.bf16.msra.mxu0 %v6393_v37  ;;  %2904 = vmatpush1.bf16.msra.mxu1 %v6395_v2 }
 0xd9e   :  { %2864 = vmatprep.subr.bf16.mxu0 %v6399_v13  ;;  %2905 = vmatprep.subr.bf16.mxu1 %v6401_v60 }
 0xda1   :  { %2865 = vmatpush1.bf16.msra.mxu0 %v6407_v16  ;;  %2906 = vmatpush1.bf16.msra.mxu1 %v6409_v61 }
 0xda2   :  { %2866 = vmatprep.subr.bf16.mxu0 %v6413_v38  ;;  %2907 = vmatprep.subr.bf16.mxu1 %v6415_v59 }
 0xda5   :  { %2867 = vmatpush1.bf16.msra.mxu0 %v6421_v20  ;;  %2908 = vmatpush1.bf16.msra.mxu1 %v6423_v23 }
 0xda6   :  { %2868 = vmatprep.subr.bf16.mxu0 %v6427_v35  ;;  %2909 = vmatprep.subr.bf16.mxu1 %v8129_v58 }
 0xda9   :  { %2869 = vmatpush1.bf16.msra.mxu0 %v8130_v1  ;;  %2910 = vmatpush1.bf16.msra.mxu1 %v8131_v41 }
 0xdaa   :  { %2870 = vmatprep.subr.bf16.mxu0 %v8132_v29  ;;  %2911 = vmatprep.subr.bf16.mxu1 %v8133_v45 }
 0xdad   :  { %2871 = vmatpush1.bf16.msra.mxu0 %v8134_v17  ;;  %2912 = vmatpush1.bf16.msra.mxu1 %v8135_v34 }
 0xdae   :  { %2872 = vmatprep.subr.bf16.mxu0 %v8136_v53  ;;  %2913 = vmatprep.subr.bf16.mxu1 %v8137_v44 }
 0xdb1   :  { %2873 = vmatpush1.bf16.msra.mxu0 %v8138_v47  ;;  %2914 = vmatpush1.bf16.msra.mxu1 %v8139_v24 }
 0xdb2   :  { %2874 = vmatprep.subr.bf16.mxu0 %v8140_v57  ;;  %2915 = vmatprep.subr.bf16.mxu1 %v8141_v51 }
 0xdb5   :  { %2875 = vmatpush1.bf16.msra.mxu0 %v8142_v39  ;;  %2916 = vmatpush1.bf16.msra.mxu1 %v8143_v22 }
 0xdb6   :  { %2971 = vmatprep.subr.bf16.mxu0 %v8144_v49  ;;  %3012 = vmatprep.subr.bf16.mxu1 %v8145_v48 }
 0xe58   :  { %v2783_v31 = vpop.f32.mrf.mxu0  ;;  %v2824_v46 = vpop.f32.mrf.mxu1 }
 0xe59   :  { %v2784_v33 = vadd.f32 %v2783_v31, %v8176_v12  ;;  %v2825_v19 = vadd.f32 %v2824_v46, %v8182_v54 }
 0xe5a   :  { %v2785_v21 = vpop.f32.mrf.mxu0  ;;  %v2826_v4 = vpop.f32.mrf.mxu1 }
 0xe5b   :  { %v4654_v30 = vmul.f32 -1.442695, %v2784_v33  ;;  %v2786_v15 = vadd.f32 %v2785_v21, %v8179_v52  ;;  %v4656_v5 = vmul.f32 -1.442695, %v2825_v19  ;;  %v2827_v56 = vadd.f32 %v2826_v4, %v8185_v10 }
 0xe5c   :  { %v2787_v49 = vpop.f32.mrf.mxu0  ;;  %v2828_v11 = vpop.f32.mrf.mxu1 }
 0xe5d   :  { %5210 = vpow2.f32 %v4654_v30  ;;  %v4655_v48 = vmul.f32 -1.442695, %v2786_v15 }
 0xe5e   :  { %v2788_v6 = vpop.f32.mrf.mxu0  ;;  %v2829_v40 = vpop.f32.mrf.mxu1 }
 0xe5f   :  { %5212 = vpow2.f32 %v4655_v48 }
 0xe60   :  { %5214 = vpow2.f32 %v4656_v5 }
 0xe61   :  { %5216 = vtanh.f32 %v2827_v56 }
 0xe6a   :  { %v5211_v8 = vpop.eup %5210 }
 0xe6b   :  { %v2840_v31 = vadd.f32 1.0, %v5211_v8 }
 0xe6c   :  { %v5213_v12 = vpop.eup %5212 }
 0xe6d   :  { %5218 = vrcp.f32 %v2840_v31  ;;  %v2841_v33 = vadd.f32 1.0, %v5213_v12  ;;  %v5215_v21 = vpop.eup %5214 }
 0xe6e   :  { %v5217_v30 = vpop.eup %5216  ;;  %v2842_v52 = vadd.f32 1.0, %v5215_v21  ;;  %v8199_v21 = vld [vmem:[#allocation52_spill] sm:$0xff] }
 0xe6f   :  { %5220 = vrcp.f32 %v2841_v33  ;;  %v8198_v33 = vld [vmem:[#allocation55_spill] sm:$0xff] }
 0xe70   :  { %5222 = vrcp.f32 %v2842_v52 }
 0xe7a   :  { %v5219_v27 = vpop.eup %5218 }
 0xe7b   :  { %v2851_v62 = vmul.f32 %v5219_v27, %v5217_v30  ;;  %v8200_v30 = vsel %vm5565_vm8, %v8198_v33, %v8199_v21  ;;  %v8213_v33 = vld [vmem:[#allocation6_spill] sm:$0xff] }
 0xe7c   :  { %v5221_v46 = vpop.eup %5220 }
 0xe7d   :  { %v2850_v15 = vmul.f32 %v5221_v46, %v7076_v0  ;;  %v5223_v4 = vpop.eup %5222 }
 0xe7f   :  { %v7138_v49 = vadd.f32 %v2851_v62, %v2850_v15  ;;  %v8201_v15 = vld [vmem:[#allocation44_spill] sm:$0xff] }
 0xe81   :  { %5224 = vtanh.f32 %v7138_v49 }
 0xe8e   :  { %v5225_v11 = vpop.eup %5224 }
 0xe8f   :  { %v7141_v48 = vmul.f32 %v5225_v11, %v5223_v4 }
 0xe91   :  { %v2855_v6 = vpack.c.bf16 %v7141_v48, %v7141_v48 }
 0xe93   :  { %2893 = vmatmul.mubr.bf16.vlgmr.msra.gmra.mxu0 %v2855_v6  ;;  %2934 = vmatmul.mubr.bf16.vlgmr.msra.gmra.mxu1 %v2855_v6 }
 0xe94   :  { %2972 = vmatpush1.bf16.msra.mxu0 %v6371_v32  ;;  %3013 = vmatpush1.bf16.msra.mxu1 %v6376_v50  ;;  %v8186_v50 = vld [vmem:[#allocation43_spill] sm:$0xff] }
 0xe95   :  { %2973 = vmatprep.subr.bf16.mxu0 %v6380_v7  ;;  %3014 = vmatprep.subr.bf16.mxu1 %v6385_v18  ;;  %v8187_v7 = vld [vmem:[#allocation51_spill] sm:$0xff] }
 0xe96   :  { %3003 = vmatprep.mubr.bf16.mxu0 %v7989_v42  ;;  %3044 = vmatprep.mubr.bf16.mxu1 %v7989_v42  ;;  %v8188_v18 = vsel %vm5565_vm8, %v8186_v50, %v8187_v7 }
 0xe98   :  { %2974 = vmatpush1.bf16.msra.mxu0 %v6393_v37  ;;  %3015 = vmatpush1.bf16.msra.mxu1 %v6395_v2 }
 0xe99   :  { %2975 = vmatprep.subr.bf16.mxu0 %v6399_v13  ;;  %3016 = vmatprep.subr.bf16.mxu1 %v6401_v60 }
 0xe9c   :  { %2976 = vmatpush1.bf16.msra.mxu0 %v6407_v16  ;;  %3017 = vmatpush1.bf16.msra.mxu1 %v6409_v61  ;;  %v8189_v16 = vld [vmem:[#allocation40_spill] sm:$0xff]  ;;  %v8190_v61 = vld [vmem:[#allocation34_spill] sm:$0xff] }
 0xe9d   :  { %2977 = vmatprep.subr.bf16.mxu0 %v6413_v38  ;;  %3018 = vmatprep.subr.bf16.mxu1 %v6415_v59  ;;  %v8191_v38 = vsel %vm5586_vm11, %v8189_v16, %v8190_v61  ;;  %v8208_v16 = vld [vmem:[#allocation47_spill] sm:$0xff] }
 0xe9e   :  { %v8209_v61 = vsel %vm5590_vm12, %v8207_v25, %v8208_v16 }
 0xea0   :  { %2978 = vmatpush1.bf16.msra.mxu0 %v6421_v20  ;;  %3019 = vmatpush1.bf16.msra.mxu1 %v6423_v23 }
 0xea1   :  { %2979 = vmatprep.subr.bf16.mxu0 %v6427_v35  ;;  %3020 = vmatprep.subr.bf16.mxu1 %v8129_v58 }
 0xea4   :  { %2980 = vmatpush1.bf16.msra.mxu0 %v8130_v1  ;;  %3021 = vmatpush1.bf16.msra.mxu1 %v8131_v41  ;;  %v8192_v1 = vld [vmem:[#allocation37_spill] sm:$0xff]  ;;  %v8193_v41 = vld [vmem:[#allocation48_spill] sm:$0xff] }
 0xea5   :  { %2981 = vmatprep.subr.bf16.mxu0 %v8132_v29  ;;  %3022 = vmatprep.subr.bf16.mxu1 %v8133_v45  ;;  %v8194_v29 = vsel %vm5576_vm10, %v8192_v1, %v8193_v41 }
 0xea8   :  { %2982 = vmatpush1.bf16.msra.mxu0 %v8134_v17  ;;  %3023 = vmatpush1.bf16.msra.mxu1 %v8135_v34  ;;  %v8195_v34 = vld [vmem:[#allocation35_spill] sm:$0xff] }
 0xea9   :  { %2983 = vmatprep.subr.bf16.mxu0 %v8136_v53  ;;  %3024 = vmatprep.subr.bf16.mxu1 %v8137_v44  ;;  %v8196_v53 = vld [vmem:[#allocation41_spill] sm:$0xff] }
 0xeaa   :  { %v8197_v44 = vsel %vm5590_vm12, %v8195_v34, %v8196_v53  ;;  %v8210_v34 = vld [vmem:[#allocation7_spill] sm:$0xff] }
 0xeac   :  { %2984 = vmatpush1.bf16.msra.mxu0 %v8138_v47  ;;  %3025 = vmatpush1.bf16.msra.mxu1 %v8139_v24 }
 0xead   :  { %2985 = vmatprep.subr.bf16.mxu0 %v8140_v57  ;;  %3026 = vmatprep.subr.bf16.mxu1 %v8141_v51 }
 0xeb0   :  { %2986 = vmatpush1.bf16.msra.mxu0 %v8142_v39  ;;  %3027 = vmatpush1.bf16.msra.mxu1 %v8143_v22 }
 0xf53   :  { %v2894_v42 = vpop.f32.mrf.mxu0  ;;  %v2935_v32 = vpop.f32.mrf.mxu1 }
 0xf54   :  { %v2895_v37 = vadd.f32 %v2894_v42, %v8188_v18  ;;  %v2936_v45 = vadd.f32 %v2935_v32, %v8194_v29  ;;  %v8204_v18 = vld [vmem:[#allocation46_spill] sm:$0xff] }
 0xf55   :  { %v2896_v2 = vpop.f32.mrf.mxu0  ;;  %v2937_v13 = vpop.f32.mrf.mxu1 }
 0xf56   :  { %v4657_v60 = vmul.f32 -1.442695, %v2895_v37  ;;  %v2897_v59 = vadd.f32 %v2896_v2, %v8191_v38  ;;  %v4659_v17 = vmul.f32 -1.442695, %v2936_v45  ;;  %v2938_v47 = vadd.f32 %v2937_v13, %v8197_v44  ;;  %v8205_v37 = vld [vmem:[#allocation56_spill] sm:$0xff] }
 0xf57   :  { %v2898_v20 = vpop.f32.mrf.mxu0  ;;  %v2939_v23 = vpop.f32.mrf.mxu1  ;;  %v8206_v2 = vsel %vm5576_vm10, %v8204_v18, %v8205_v37  ;;  %v3081_v44 = vsel %vm5565_vm8, %v7079_v63, %v7017_v14 }
 0xf58   :  { %5226 = vpow2.f32 %v4657_v60  ;;  %v4658_v35 = vmul.f32 -1.442695, %v2897_v59 }
 0xf59   :  { %v2899_v22 = vpop.f32.mrf.mxu0  ;;  %v2940_v58 = vpop.f32.mrf.mxu1 }
 0xf5a   :  { %5228 = vpow2.f32 %v4658_v35 }
 0xf5b   :  { %5230 = vpow2.f32 %v4659_v17  ;;  %v3080_v17 = vsel %vm5565_vm8, %v7017_v14, %v7079_v63 }
 0xf5c   :  { %5232 = vtanh.f32 %v2938_v47  ;;  %v8211_v47 = vld [vmem:[#allocation15_spill] sm:$0xff] }
 0xf65   :  { %v5227_v24 = vpop.eup %5226 }
 0xf66   :  { %v2951_v57 = vadd.f32 1.0, %v5227_v24  ;;  %v3163_v24 = vrot.slane %v3080_v17, %v8211_v47 }
 0xf67   :  { %v5229_v51 = vpop.eup %5228 }
 0xf68   :  { %5234 = vrcp.f32 %v2951_v57  ;;  %v2952_v39 = vadd.f32 1.0, %v5229_v51  ;;  %v5231_v0 = vpop.eup %5230  ;;  %v8212_v57 = vld [vmem:[#allocation26_spill] sm:$0xff]  ;;  %v3171_v14 = vrot.slane %v3163_v24, %v8211_v47 }
 0xf69   :  { %v5233_v40 = vpop.eup %5232  ;;  %v2953_v19 = vadd.f32 1.0, %v5231_v0  ;;  %v3079_v51 = vsel %vm5565_vm8, %v8212_v57, %v7141_v48 }
 0xf6a   :  { %5236 = vrcp.f32 %v2952_v39  ;;  %v3082_v39 = vsel %vm5565_vm8, %v7141_v48, %v8212_v57  ;;  %v3294_v21 = vrot.slane %v3171_v14, %v8213_v33 }
 0xf6b   :  { %5238 = vrcp.f32 %v2953_v19 }
 0xf75   :  { %v5235_v3 = vpop.eup %5234 }
 0xf76   :  { %v2962_v43 = vmul.f32 %v5235_v3, %v5233_v40  ;;  %v3186_v40 = vrot.slane %v3081_v44, %v8211_v47  ;;  %v3140_v3 = vrot.slane %v3079_v51, %v8211_v47 }
 0xf77   :  { %v5237_v54 = vpop.eup %5236 }
 0xf78   :  { %v2961_v5 = vmul.f32 %v5237_v54, %v7138_v49  ;;  %v5239_v36 = vpop.eup %5238  ;;  %v8202_v49 = vld [vmem:[#allocation45_spill] sm:$0xff]  ;;  %v3209_v54 = vrot.slane %v3082_v39, %v8211_v47  ;;  %v3141_v48 = vcombine.high %v3140_v3, %v3140_v3 }
 0xf79   :  { %v8203_v4 = vsel %vm5586_vm11, %v8201_v15, %v8202_v49 }
 0xf7a   :  { %v2963_v9 = vadd.f32 %v2962_v43, %v2961_v5  ;;  %v3164_v5 = vcombine.high %v3163_v24, %v3163_v24 }
 0xf7c   :  { %5240 = vtanh.f32 %v2963_v9 }
 0xf89   :  { %v5241_v10 = vpop.eup %5240 }
 0xf8a   :  { %v2965_v56 = vmul.f32 %v5241_v10, %v5239_v36  ;;  %v3187_v36 = vcombine.high %v3186_v40, %v3186_v40 }
 0xf8c   :  { %v2966_v8 = vpack.c.bf16 %v2965_v56, %v2965_v56  ;;  %v3078_v53 = vsel %vm5565_vm8, %v8210_v34, %v2965_v56  ;;  %v3083_v63 = vsel %vm5565_vm8, %v2965_v56, %v8210_v34  ;;  %v8214_v56 = vld [vmem:[#allocation25_spill] sm:$0xff] }
 0xf8d   :  { %v3117_v0 = vrot.slane %v3078_v53, %v8211_v47 }
 0xf8e   :  { %3004 = vmatmul.mubr.bf16.vlgmr.msra.gmra.mxu0 %v2966_v8  ;;  %3045 = vmatmul.mubr.bf16.vlgmr.msra.gmra.mxu1 %v2966_v8  ;;  %v3232_v8 = vrot.slane %v3083_v63, %v8211_v47 }
 0xf90   :  { %v3240_v37 = vrot.slane %v3232_v8, %v8211_v47 }
0x104e   :  { %v3005_v31 = vpop.f32.mrf.mxu0  ;;  %v3046_v12 = vpop.f32.mrf.mxu1 }
0x104f   :  { %v3006_v27 = vadd.f32 %v3005_v31, %v8200_v30  ;;  %v3047_v13 = vadd.f32 %v3046_v12, %v8206_v2  ;;  %v3125_v31 = vrot.slane %v3117_v0, %v8211_v47  ;;  %v3194_v12 = vrot.slane %v3186_v40, %v8211_v47 }
0x1050   :  { %v3007_v62 = vpop.f32.mrf.mxu0  ;;  %v3048_v46 = vpop.f32.mrf.mxu1  ;;  %v3148_v30 = vrot.slane %v3140_v3, %v8211_v47 }
0x1051   :  { %v4660_v52 = vmul.f32 -1.442695, %v3006_v27  ;;  %v3008_v11 = vadd.f32 %v3007_v62, %v8203_v4  ;;  %v4662_v60 = vmul.f32 -1.442695, %v3047_v13  ;;  %v3049_v38 = vadd.f32 %v3048_v46, %v8209_v61 }
0x1052   :  { %v3009_v6 = vpop.f32.mrf.mxu0  ;;  %v3050_v42 = vpop.f32.mrf.mxu1  ;;  %v3210_v46 = vcombine.high %v3209_v54, %v3209_v54  ;;  %v3178_v4 = vrot.slane %v3164_v5, %v8211_v47  ;;  %v3284_v2 = vrot.slane %v3148_v30, %v8213_v33  ;;  %v3304_v13 = vrot.slane %v3194_v12, %v8213_v33  ;;  %v3371_v30 = vld [vmem:[%s7746_s6 + $0x80] sm:$0xff] }
0x1053   :  { %5242 = vpow2.f32 %v4660_v52  ;;  %v4661_v32 = vmul.f32 -1.442695, %v3008_v11  ;;  %v3155_v11 = vrot.slane %v3141_v48, %v8211_v47  ;;  %v3217_v6 = vrot.slane %v3209_v54, %v8211_v47 }
0x1054   :  { %v3010_v50 = vpop.f32.mrf.mxu0  ;;  %v3051_v7 = vpop.f32.mrf.mxu1  ;;  %v3201_v42 = vrot.slane %v3187_v36, %v8211_v47 }
0x1055   :  { %5244 = vpow2.f32 %v4661_v32  ;;  %v3233_v32 = vcombine.high %v3232_v8, %v3232_v8  ;;  %v3274_v50 = vrot.slane %v3125_v31, %v8213_v33 }
0x1056   :  { %5246 = vpow2.f32 %v4662_v60  ;;  %v3224_v60 = vrot.slane %v3210_v46, %v8211_v47  ;;  %v3367_v46 = vld [vmem:[%s7746_s6 + $0x60] sm:$0xff] }
0x1057   :  { %5248 = vtanh.f32 %v3049_v38 }
0x1058   :  { %v3318_v53 = vrot.slane %v3224_v60, %v8213_v33  ;;  %v4663_v60 = vld [vmem:[%s7746_s6] ss:$0 sm:$0xff] }
0x1060   :  { %v5243_v59 = vpop.eup %5242 }
0x1061   :  { %v3062_v20 = vadd.f32 1.0, %v5243_v59 }
0x1062   :  { %v5245_v23 = vpop.eup %5244 }
0x1063   :  { %5250 = vrcp.f32 %v3062_v20  ;;  %v3063_v35 = vadd.f32 1.0, %v5245_v23  ;;  %v5247_v55 = vpop.eup %5246  ;;  %v3247_v20 = vrot.slane %v3233_v32, %v8211_v47  ;;  %v3288_v23 = vrot.slane %v3155_v11, %v8213_v33 }
0x1064   :  { %v5249_v22 = vpop.eup %5248  ;;  %v3064_v29 = vadd.f32 1.0, %v5247_v55  ;;  %v3314_v55 = vrot.slane %v3217_v6, %v8213_v33 }
0x1065   :  { %5252 = vrcp.f32 %v3063_v35  ;;  %v3298_v35 = vrot.slane %v3178_v4, %v8213_v33  ;;  %v3328_v24 = vrot.slane %v3247_v20, %v8213_v33 }
0x1066   :  { %5254 = vrcp.f32 %v3064_v29 }
0x1070   :  { %v5251_v58 = vpop.eup %5250 }
0x1071   :  { %v3073_v1 = vmul.f32 %v5251_v58, %v5249_v22 }
0x1072   :  { %v5253_v41 = vpop.eup %5252 }
0x1073   :  { %v3072_v45 = vmul.f32 %v5253_v41, %v2963_v9  ;;  %v5255_v43 = vpop.eup %5254  ;;  %v3118_v9 = vcombine.high %v3117_v0, %v3117_v0  ;;  %v3324_v41 = vrot.slane %v3240_v37, %v8213_v33 }
0x1075   :  { %v3074_v26 = vadd.f32 %v3073_v1, %v3072_v45  ;;  %v3132_v52 = vrot.slane %v3118_v9, %v8211_v47  ;;  %v3308_v45 = vrot.slane %v3201_v42, %v8213_v33 }
0x1077   :  { %5256 = vtanh.f32 %v3074_v26  ;;  %v3278_v38 = vrot.slane %v3132_v52, %v8213_v33  ;;  %v3366_v52 = vld [vmem:[%s7746_s6 + $0x58] sm:$0xff] }
0x1084   :  { %v5257_v19 = vpop.eup %5256 }
0x1085   :  { %v3076_v10 = vmul.f32 %v5257_v19, %v5255_v43 }
0x1087   :  { %v3077_v27 = vsel %vm5565_vm8, %v8214_v56, %v3076_v10  ;;  %v3084_v62 = vsel %vm5565_vm8, %v3076_v10, %v8214_v56  ;;  %v3370_v56 = vld [vmem:[%s7746_s6 + $0x78] sm:$0xff] }
0x1088   :  { %v3092_v15 = vrot.slane %v3077_v27, %v8211_v47  ;;  %v3255_v49 = vrot.slane %v3084_v62, %v8211_v47  ;;  %v3369_v27 = vld [vmem:[%s7746_s6 + $0x70] sm:$0xff]  ;;  %v3368_v62 = vld [vmem:[%s7746_s6 + $0x68] sm:$0xff] }
0x108a   :  { %v3100_v28 = vrot.slane %v3092_v15, %v8211_v47  ;;  %v3093_v7 = vcombine.high %v3092_v15, %v3092_v15  ;;  %v3256_v18 = vcombine.high %v3255_v49, %v3255_v49  ;;  %v3263_v25 = vrot.slane %v3255_v49, %v8211_v47  ;;  %v3365_v15 = vld [vmem:[%s7746_s6 + $0x50] sm:$0xff] }
0x108c   :  { %v3341_v16 = vsel %vm1704_vm13, %v3100_v28, %v3274_v50  ;;  %v3107_v61 = vrot.slane %v3093_v7, %v8211_v47  ;;  %v3270_v58 = vrot.slane %v3256_v18, %v8211_v47  ;;  %v3334_v17 = vrot.slane %v3263_v25, %v8213_v33 }
0x108d   :  { %v3343_v59 = vsel %vm1707_vm14, %v3341_v16, %v3284_v2  ;;  %v4664_v16 = vld [vmem:[%s7746_s6 + $0x8] ss:$0 sm:$0xff] }
0x108e   :  { %v3345_v22 = vsel %vm1710_vm15, %v3343_v59, %v3294_v21  ;;  %v3342_v1 = vsel %vm1704_vm13, %v3107_v61, %v3278_v38  ;;  %v3338_v39 = vrot.slane %v3270_v58, %v8213_v33  ;;  %v3372_v21 = vld [vmem:[%s7746_s6 + $0x88] sm:$0xff]  ;;  %v3379_v58 = vld [vmem:[%s7746_s6 + $0xc0] sm:$0xff] }
0x108f   :  { %v3347_v29 = vsel %vm1713_vm0, %v3345_v22, %v3304_v13  ;;  %v3344_v26 = vsel %vm1707_vm14, %v3342_v1, %v3288_v23  ;;  %4791 = vmatprep.subr.mxu0 %v3372_v21  ;;  %v3380_v22 = vld [vmem:[%s7746_s6 + $0xc8] sm:$0xff]  ;;  %v3378_v1 = vld [vmem:[%s7746_s6 + $0xb8] sm:$0xff] }
0x1090   :  { %v3349_v34 = vsel %vm1716_vm2, %v3347_v29, %v3314_v55  ;;  %v3346_v44 = vsel %vm1710_vm15, %v3344_v26, %v3298_v35  ;;  %4792 = vmatpush3.msra.mxu0 %v3372_v21  ;;  %v3381_v55 = vld [vmem:[%s7746_s6 + $0xd0] sm:$0xff]  ;;  %v3376_v29 = vld [vmem:[%s7746_s6 + $0xa8] sm:$0xff]  ;;  %v3374_v26 = vld [vmem:[%s7746_s6 + $0x98] sm:$0xff] }
0x1091   :  { %v3351_v47 = vsel %vm1719_vm3, %v3349_v34, %v3324_v41  ;;  %v3348_v57 = vsel %vm1713_vm0, %v3346_v44, %v3308_v45  ;;  %4793 = vmatprep.subr.mxu0 %v3371_v30  ;;  %4810 = vmatprep.subr.mxu1 %v3381_v55  ;;  %v3377_v41 = vld [vmem:[%s7746_s6 + $0xb0] sm:$0xff]  ;;  %v3375_v45 = vld [vmem:[%s7746_s6 + $0xa0] sm:$0xff]  ;;  %v3736_v21 = vld [vmem:[%s7746_s6 + $0x118] sm:$0xff] }
0x1092   :  { %v3353_v51 = vsel %vm1722_vm4, %v3351_v47, %v3334_v17  ;;  %v3350_v0 = vsel %vm1716_vm2, %v3348_v57, %v3318_v53  ;;  %4794 = vmatpush3.msra.mxu0 %v3371_v30  ;;  %4811 = vmatpush3.msra.mxu1 %v3381_v55  ;;  %v4665_v57 = vld [vmem:[%s7746_s6 + $0x90] ss:$0 sm:$0xff]  ;;  %vm4330_vm2 = vcmask 785408  }
0x1093   :  { %v3383_v40 = vsel %vm146_vm1, %v3353_v51, 0.0  ;;  %v3352_v3 = vsel %vm1719_vm3, %v3350_v0, %v3328_v24  ;;  %4795 = vmatprep.subr.mxu0 %v3370_v56  ;;  %4812 = vmatprep.subr.mxu1 %v3380_v22  ;;  %v3735_v30 = vld [vmem:[%s7746_s6 + $0x110] sm:$0xff]  ;;  %vm4501_vm3 = vcmask 261120  }
0x1094   :  { %3384 = vadd.xlane.f32.xlu0 %v3383_v40  ;;  %v7299_v14 = vsel %vm1722_vm4, %v3352_v3, %v3338_v39  ;;  %4796 = vmatpush3.msra.mxu0 %v3370_v56  ;;  %vm4582_vm4 = vcmask 254976  }
0x1095   :  { %v3386_v63 = vsel %vm146_vm1, %v7299_v14, 0.0  ;;  %4797 = vmatprep.subr.mxu0 %v3369_v27  ;;  %4813 = vmatpush3.msra.mxu1 %v3380_v22 }
0x1096   :  { %3387 = vadd.xlane.f32.xlu1 %v3386_v63  ;;  %4798 = vmatpush3.msra.mxu0 %v3369_v27  ;;  %v3734_v27 = vld [vmem:[%s7746_s6 + $0x108] sm:$0xff] }
0x1097   :  { %4799 = vmatprep.subr.mxu0 %v3368_v62  ;;  %4814 = vmatprep.subr.mxu1 %v3379_v58 }
0x1098   :  { %4800 = vmatpush3.msra.mxu0 %v3368_v62  ;;  %4815 = vmatpush3.msra.mxu1 %v3379_v58  ;;  %v3733_v62 = vld [vmem:[%s7746_s6 + $0x100] sm:$0xff] }
0x1099   :  { %4801 = vmatprep.subr.mxu0 %v3367_v46  ;;  %4816 = vmatprep.subr.mxu1 %v3378_v1 }
0x109a   :  { %4802 = vmatpush3.msra.mxu0 %v3367_v46  ;;  %4817 = vmatpush3.msra.mxu1 %v3378_v1 }
0x109b   :  { %4803 = vmatprep.subr.mxu0 %v3366_v52  ;;  %4818 = vmatprep.subr.mxu1 %v3377_v41 }
0x109c   :  { %4804 = vmatpush3.msra.mxu0 %v3366_v52  ;;  %4819 = vmatpush3.msra.mxu1 %v3377_v41 }
0x109d   :  { %4805 = vmatprep.subr.mxu0 %v3365_v15  ;;  %4820 = vmatprep.subr.mxu1 %v3376_v29 }
0x109e   :  { %4806 = vmatpush3.msra.mxu0 %v3365_v15  ;;  %4821 = vmatpush3.msra.mxu1 %v3376_v29 }
0x109f   :  { %4822 = vmatprep.subr.mxu1 %v3375_v45 }
0x10a0   :  { %4823 = vmatpush3.msra.mxu1 %v3375_v45 }
0x10a1   :  { %4824 = vmatprep.subr.mxu1 %v3374_v26 }
0x10a2   :  { %4825 = vmatpush3.msra.mxu1 %v3374_v26 }
0x10a3   :  { %4848 = vmatprep.subr.mxu1 %v3736_v21 }
0x10a7   :  { %3749 = vrot.lane.b32.xlu1 %v3353_v51, %s5318_s0 }
0x111d   :  { %v3385_v43 = vpop.xlane.xlu0 %3384 }
0x111e   :  { %v3390_v54 = vmul.f32 0.015625, %v3385_v43 }
0x111f   :  { %v3388_v19 = vpop.xlane.xlu1 %3387 }
0x1120   :  { %v3392_v5 = vsub.f32 %v3353_v51, %v3390_v54  ;;  %v3391_v9 = vmul.f32 0.015625, %v3388_v19  ;;  %v7396_v54 = vld [vmem:[%s7746_s6 + $0x48] sm:$0xff]  ;;  %v7401_v19 = vld [vmem:[%s7746_s6 + $0x40] sm:$0xff] }
0x1121   :  { %4829 = vmatprep.subr.mxu0 %v7396_v54 }
0x1122   :  { %v3393_v36 = vsub.f32 %v7299_v14, %v3391_v9  ;;  %v3394_v48 = vmul.f32 %v3392_v5, %v3392_v5  ;;  %v7415_v9 = vld [vmem:[%s7746_s6 + $0x30] sm:$0xff] }
0x1123   :  { %v3750_v10 = vpop.permute.xlu1 %3749 }
0x1124   :  { %v3396_v8 = vsel %vm146_vm1, %v3394_v48, 0.0  ;;  %v3755_v31 = vsel %vm146_vm1, %v3750_v10, 0.0  ;;  %v3395_v12 = vmul.f32 %v3393_v36, %v3393_v36  ;;  %v7429_v48 = vld [vmem:[%s7746_s6 + $0x20] sm:$0xff]  ;;  %v7436_v10 = vld [vmem:[%s7746_s6 + $0x18] sm:$0xff] }
0x1125   :  { %3397 = vadd.xlane.f32.xlu0 %v3396_v8  ;;  %3756 = vadd.xlane.f32.xlu1 %v3755_v31  ;;  %v7443_v8 = vld [vmem:[%s7746_s6 + $0x10] sm:$0xff] }
0x1126   :  { %v3399_v33 = vsel %vm146_vm1, %v3395_v12, 0.0 }
0x1129   :  { %3400 = vadd.xlane.f32.xlu0 %v3399_v33 }
0x113f   :  { %3751 = vrot.lane.b32.xlu0 %v7299_v14, %s5318_s0 }
0x11ae   :  { %v3398_v49 = vpop.xlane.xlu0 %3397  ;;  %v3757_v4 = vpop.xlane.xlu1 %3756 }
0x11af   :  { %v3402_v11 = vmul.f32 0.015625, %v3398_v49  ;;  %v3761_v6 = vmul.f32 0.015625, %v3757_v4  ;;  %v3732_v49 = vld [vmem:[%s7746_s6 + $0xf8] sm:$0xff] }
0x11b1   :  { %v3404_v42 = vadd.f32 1e-05, %v3402_v11  ;;  %v7334_v32 = vsub.f32 %v3353_v51, %v3761_v6  ;;  %v3731_v11 = vld [vmem:[%s7746_s6 + $0xf0] sm:$0xff] }
0x11b2   :  { %v3401_v50 = vpop.xlane.xlu0 %3400 }
0x11b3   :  { %5258 = vrsqrt.f32 %v3404_v42  ;;  %v3403_v28 = vmul.f32 0.015625, %v3401_v50  ;;  %v3765_v7 = vmul.f32 %v7334_v32, %v7334_v32 }
0x11b5   :  { %v3405_v18 = vadd.f32 1e-05, %v3403_v28  ;;  %3769 = vrot.lane.b32.xlu1 %v3765_v7, %s5318_s0  ;;  %v3729_v7 = vld [vmem:[%s7746_s6 + $0xe0] sm:$0xff] }
0x11b6   :  { %v3752_v37 = vpop.permute.xlu0 %3751 }
0x11b7   :  { %5260 = vrsqrt.f32 %v3405_v18  ;;  %v3758_v2 = vsel %vm146_vm1, %v3752_v37, 0.0 }
0x11b8   :  { %3759 = vadd.xlane.f32.xlu0 %v3758_v2 }
0x11c0   :  { %v5259_v13 = vpop.eup %5258 }
0x11c1   :  { %v3408_v25 = vmul.f32 %v5259_v13, %v3392_v5  ;;  %v7408_v5 = vld [vmem:[%s7746_s6 + $0x38] sm:$0xff] }
0x11c3   :  { %v3414_v61 = vmul.f32 %v4663_v60, %v3408_v25 }
0x11c4   :  { %v5261_v38 = vpop.eup %5260 }
0x11c5   :  { %v3409_v59 = vmul.f32 %v5261_v38, %v3393_v36  ;;  %v7346_v20 = vadd.f32 %v4664_v16, %v3414_v61  ;;  %v7422_v36 = vld [vmem:[%s7746_s6 + $0x28] sm:$0xff] }
0x11c7   :  { %4807 = vmatprep.mubr.msk.f32.mxu0 %vm146_vm1, %v7346_v20  ;;  %v3415_v23 = vmul.f32 %v4663_v60, %v3409_v59 }
0x11c9   :  { %v7350_v35 = vadd.f32 %v4664_v16, %v3415_v23 }
0x11cb   :  { %4808 = vmatmul.mubr.msk.f32.vlgmr.msra.gmra.mxu0 %vm146_vm1, %v7350_v35 }
0x11cc   :  { %4830 = vmatpush3.msra.mxu0 %v7396_v54 }
0x11cd   :  { %4831 = vmatprep.subr.mxu0 %v7401_v19 }
0x11ce   :  { %4832 = vmatpush3.msra.mxu0 %v7401_v19 }
0x11cf   :  { %4833 = vmatprep.subr.mxu0 %v7408_v5 }
0x11d0   :  { %4834 = vmatpush3.msra.mxu0 %v7408_v5 }
0x11d1   :  { %4835 = vmatprep.subr.mxu0 %v7415_v9 }
0x11d2   :  { %4836 = vmatpush3.msra.mxu0 %v7415_v9 }
0x11d3   :  { %4837 = vmatprep.subr.mxu0 %v7422_v36 }
0x11d4   :  { %4838 = vmatpush3.msra.mxu0 %v7422_v36 }
0x11d5   :  { %4839 = vmatprep.subr.mxu0 %v7429_v48 }
0x11d6   :  { %4840 = vmatpush3.msra.mxu0 %v7429_v48 }
0x11d7   :  { %4841 = vmatprep.subr.mxu0 %v7436_v10 }
0x11d8   :  { %4842 = vmatpush3.msra.mxu0 %v7436_v10 }
0x11d9   :  { %4843 = vmatprep.subr.mxu0 %v7443_v8 }
0x11da   :  { %4844 = vmatpush3.msra.mxu0 %v7443_v8 }
0x1227   :  { %v3770_v17 = vpop.permute.xlu1 %3769 }
0x1228   :  { %v3775_v34 = vsel %vm146_vm1, %v3770_v17, 0.0 }
0x1229   :  { %3776 = vadd.xlane.f32.xlu1 %v3775_v34 }
0x123a   :  { %3790 = vrot.lane.b32.xlu1 %v4663_v60, %s5318_s0  ;;  %v4668_v60 = vld [vmem:[%s7746_s6 + $0xd8] ss:$0 sm:$0xff] }
0x1241   :  { %v3760_v53 = vpop.xlane.xlu0 %3759 }
0x1242   :  { %v3762_v44 = vmul.f32 0.015625, %v3760_v53 }
0x1244   :  { %v7381_v47 = vsub.f32 %v7299_v14, %v3762_v44 }
0x1246   :  { %v3766_v24 = vmul.f32 %v7381_v47, %v7381_v47 }
0x1248   :  { %3771 = vrot.lane.b32.xlu0 %v3766_v24, %s5318_s0 }
0x128b   :  { %v4809_v51 = vpop.f32.mrf.mxu0 }
0x128c   :  { %v3504_v39 = vadd.f32 %v4809_v51, %v4665_v57 }
0x128d   :  { %v3498_v0 = vpop.f32.mrf.mxu0 }
0x128e   :  { %v3499_v40 = vadd.f32 %v4665_v57, %v3498_v0 }
0x1290   :  { %5262 = vtanh.f32 %v3499_v40 }
0x1291   :  { %5264 = vtanh.f32 %v3504_v39 }
0x129d   :  { %v5263_v3 = vpop.eup %5262 }
0x129e   :  { %v5265_v63 = vpop.eup %5264  ;;  %4826 = vmatprep.mubr.msk.f32.mxu1 %vm146_vm1, %v5263_v3 }
0x129f   :  { %4827 = vmatmul.mubr.msk.f32.vlgmr.msra.gmra.mxu1 %vm146_vm1, %v5265_v63 }
0x12a0   :  { %4849 = vmatpush3.msra.mxu1 %v3736_v21 }
0x12a1   :  { %4850 = vmatprep.subr.mxu1 %v3735_v30 }
0x12a2   :  { %4851 = vmatpush3.msra.mxu1 %v3735_v30 }
0x12a3   :  { %4852 = vmatprep.subr.mxu1 %v3734_v27 }
0x12a4   :  { %4853 = vmatpush3.msra.mxu1 %v3734_v27 }
0x12a5   :  { %4854 = vmatprep.subr.mxu1 %v3733_v62 }
0x12a6   :  { %4855 = vmatpush3.msra.mxu1 %v3733_v62 }
0x12a7   :  { %4856 = vmatprep.subr.mxu1 %v3732_v49 }
0x12a8   :  { %4857 = vmatpush3.msra.mxu1 %v3732_v49 }
0x12a9   :  { %4858 = vmatprep.subr.mxu1 %v3731_v11 }
0x12aa   :  { %4859 = vmatpush3.msra.mxu1 %v3731_v11 }
0x12b2   :  { %v3777_v31 = vpop.xlane.xlu1 %3776 }
0x12b3   :  { %v3781_v12 = vmul.f32 0.015625, %v3777_v31 }
0x12b5   :  { %v3783_v33 = vadd.f32 1e-05, %v3781_v12 }
0x12b6   :  { %v3791_v52 = vpop.permute.xlu1 %3790 }
0x12b7   :  { %5266 = vrsqrt.f32 %v3783_v33 }
0x12ba   :  { %v3772_v14 = vpop.permute.xlu0 %3771 }
0x12bb   :  { %v3778_v43 = vsel %vm146_vm1, %v3772_v14, 0.0 }
0x12bc   :  { %3779 = vadd.xlane.f32.xlu0 %v3778_v43 }
0x12c4   :  { %v5267_v56 = vpop.eup %5266 }
0x12c5   :  { %v3787_v46 = vmul.f32 %v5267_v56, %v7334_v32  ;;  %v3730_v32 = vld [vmem:[%s7746_s6 + $0xe8] sm:$0xff] }
0x12c6   :  { %4860 = vmatprep.subr.mxu1 %v3730_v32 }
0x12c7   :  { %v3793_v6 = vmul.f32 %v3791_v52, %v3787_v46  ;;  %4861 = vmatpush3.msra.mxu1 %v3730_v32 }
0x12c8   :  { %4862 = vmatprep.subr.mxu1 %v3729_v7 }
0x12c9   :  { %4863 = vmatpush3.msra.mxu1 %v3729_v7 }
0x12ca   :  { %4886 = vmatprep.subr.mxu1 %v7396_v54 }
0x12d2   :  { %3796 = vrot.lane.b32.xlu0 %v4664_v16, %s5318_s0 }
0x1345   :  { %v3780_v15 = vpop.xlane.xlu0 %3779 }
0x1346   :  { %v3782_v4 = vmul.f32 0.015625, %v3780_v15 }
0x1348   :  { %v3784_v42 = vadd.f32 1e-05, %v3782_v4 }
0x1349   :  { %v3797_v50 = vpop.permute.xlu0 %3796 }
0x134a   :  { %5268 = vrsqrt.f32 %v3784_v42  ;;  %v3799_v28 = vadd.f32 %v3797_v50, %v3793_v6  ;;  %v3738_v42 = vld [vmem:[%s7746_s6 + $0x128] sm:$0xff] }
0x134c   :  { %3807 = vrot.lane.b32.xlu1 %v3799_v28, %s5318_s0 }
0x1357   :  { %v5269_v18 = vpop.eup %5268 }
0x1358   :  { %v3788_v37 = vmul.f32 %v5269_v18, %v7381_v47 }
0x135a   :  { %v3794_v2 = vmul.f32 %v3791_v52, %v3788_v37 }
0x135c   :  { %v3800_v13 = vadd.f32 %v3797_v50, %v3794_v2  ;;  %v4673_v50 = vld [vmem:[%s7746_s6 + $0x120] ss:$0 sm:$0xff] }
0x135e   :  { %3809 = vrot.lane.b32.xlu1 %v3800_v13, %s5318_s0  ;;  %v4115_v13 = vld [vmem:[%s7743_s3] sm:$0x3] }
0x135f   :  { %v4828_v25 = vpop.f32.mrf.mxu1 }
0x1360   :  { %v3591_v16 = vadd.f32 %v4828_v25, %v4668_v60  ;;  %v4120_v25 = vadd.s32 48, %v4115_v13 }
0x1361   :  { %v3585_v61 = vpop.f32.mrf.mxu1 }
0x1362   :  { %v3601_v38 = vsel %vm146_vm1, %v3591_v16, -inf  ;;  %v3586_v59 = vadd.f32 %v4668_v60, %v3585_v61  ;;  %v4114_v60 = vld [vmem:[%s7742_s2] sm:$0x3]  ;;  %4122 = vperm.xlu1 %4997, %v4120_v25  }
0x1363   :  { %v3602_v23 = vrot.slane %v3601_v38, 4  ;;  %4117 = vperm.xlu0 %4996, %v4114_v60   ;;  %v4126_v61 = vadd.s32 16, %v4114_v60 }
0x1364   :  { %v3594_v55 = vsel %vm146_vm1, %v3586_v59, -inf }
0x1365   :  { %v3603_v22 = vmax.f32 %v3601_v38, %v3602_v23  ;;  %v3595_v58 = vrot.slane %v3594_v55, 4  ;;  %v5320_v38 = vmov 1   ;;  %v5321_v23 = vmov 2  }
0x1366   :  { %4998 = vset.pattern.permute.xlu1 %v5320_v38 }
0x1367   :  { %v3604_v1 = vrot.slane %v3603_v22, 2  ;;  %v3596_v41 = vmax.f32 %v3594_v55, %v3595_v58  ;;  %4999 = vset.pattern.permute.xlu0 %v5320_v38  ;;  %4128 = vperm.xlu1 %4998, %v4126_v61   ;;  %v4144_v55 = vadd.s32 80, %v4115_v13  ;;  %v4157_v38 = vld [vmem:[%s7747_s7 + $0x28] sm:$0xff] }
0x1369   :  { %v3605_v29 = vmax.f32 %v3603_v22, %v3604_v1  ;;  %v3597_v45 = vrot.slane %v3596_v41, 2  ;;  %v4676_v1 = vld [vmem:[%s7746_s6 + $0x168] ss:$0 sm:$0xff] }
0x136b   :  { %v3606_v26 = vrot.slane %v3605_v29, 1  ;;  %v3598_v17 = vmax.f32 %v3596_v41, %v3597_v45  ;;  %5000 = vset.pattern.permute.xlu1 %v5321_v23 }
0x136d   :  { %v3607_v34 = vmax.f32 %v3605_v29, %v3606_v26  ;;  %v3599_v53 = vrot.slane %v3598_v17, 1 }
0x136f   :  { %v3609_v44 = vsub.f32 %v3591_v16, %v3607_v34  ;;  %v3600_v47 = vmax.f32 %v3598_v17, %v3599_v53  ;;  %v4132_v16 = vadd.s32 64, %v4115_v13 }
0x1371   :  { %v3612_v24 = vmul.f32 1.442695, %v3609_v44  ;;  %v3608_v57 = vsub.f32 %v3586_v59, %v3600_v47  ;;  %4134 = vperm.xlu0 %4999, %v4132_v16   ;;  %v4138_v59 = vadd.s32 32, %v4114_v60  ;;  %v4159_v16 = vld [vmem:[%s7747_s7 + $0x38] sm:$0xff] }
0x1373   :  { %5270 = vpow2.f32 %v3612_v24  ;;  %v3610_v51 = vmul.f32 1.442695, %v3608_v57  ;;  %4140 = vperm.xlu1 %5000, %v4138_v59  }
0x1375   :  { %5272 = vpow2.f32 %v3610_v51  ;;  %5001 = vset.pattern.permute.xlu0 %v5321_v23  ;;  %v4156_v23 = vld [vmem:[%s7747_s7 + $0x20] sm:$0xff] }
0x1377   :  { %4146 = vperm.xlu1 %5000, %v4144_v55  }
0x1380   :  { %v5271_v39 = vpop.eup %5270 }
0x1381   :  { %v3621_v0 = vsel %vm146_vm1, %v5271_v39, 0.0 }
0x1382   :  { %v5273_v40 = vpop.eup %5272  ;;  %v3622_v3 = vrot.slane %v3621_v0, 4 }
0x1383   :  { %v3614_v63 = vsel %vm146_vm1, %v5273_v40, 0.0 }
0x1384   :  { %v3623_v14 = vadd.f32 %v3622_v3, %v3621_v0  ;;  %v3615_v43 = vrot.slane %v3614_v63, 4 }
0x1386   :  { %v3624_v31 = vrot.slane %v3623_v14, 2  ;;  %v3616_v12 = vadd.f32 %v3615_v43, %v3614_v63 }
0x1388   :  { %v3625_v33 = vadd.f32 %v3624_v31, %v3623_v14  ;;  %v3617_v21 = vrot.slane %v3616_v12, 2 }
0x138a   :  { %v3626_v30 = vrot.slane %v3625_v33, 1  ;;  %v3618_v56 = vadd.f32 %v3617_v21, %v3616_v12 }
0x138c   :  { %v3627_v27 = vadd.f32 %v3626_v30, %v3625_v33  ;;  %v3619_v62 = vrot.slane %v3618_v56, 1 }
0x138e   :  { %v3620_v46 = vadd.f32 %v3619_v62, %v3618_v56  ;;  %5274 = vrcp.f32 %v3627_v27 }
0x1390   :  { %5276 = vrcp.f32 %v3620_v46 }
0x139b   :  { %v5275_v52 = vpop.eup %5274 }
0x139c   :  { %v3631_v4 = vmul.f32 %v5275_v52, %v5271_v39 }
0x139d   :  { %v5277_v15 = vpop.eup %5276 }
0x139e   :  { %v3630_v49 = vmul.f32 %v5277_v15, %v5273_v40 }
0x13a0   :  { %4845 = vmatprep.mubr.msk.f32.mxu0 %vm146_vm1, %v3630_v49 }
0x13a1   :  { %4846 = vmatmul.mubr.msk.f32.vlgmr.msra.gmra.mxu0 %vm146_vm1, %v3631_v4 }
0x13be   :  { %v7487_v11 = vpop.permute.xlu1 %3807 }
0x13bf   :  { %4864 = vmatprep.mubr.msk.f32.mxu1 %vm146_vm1, %v7487_v11 }
0x13d0   :  { %v7491_v6 = vpop.permute.xlu1 %3809 }
0x13d1   :  { %4865 = vmatmul.mubr.msk.f32.vlgmr.msra.gmra.mxu1 %vm146_vm1, %v7491_v6 }
0x13d2   :  { %4887 = vmatpush3.msra.mxu1 %v7396_v54  ;;  %v8215_v54 = vmov 0.0  }
0x13d3   :  { %4888 = vmatprep.subr.mxu1 %v7401_v19 }
0x13d4   :  { %4889 = vmatpush3.msra.mxu1 %v7401_v19  ;;  %v3745_v19 = vld [vmem:[%s7746_s6 + $0x160] sm:$0xff] }
0x13d5   :  { %4890 = vmatprep.subr.mxu1 %v7408_v5  ;;  %4867 = vmatprep.subr.mxu0 %v3745_v19 }
0x13d6   :  { %4891 = vmatpush3.msra.mxu1 %v7408_v5  ;;  %v3744_v5 = vld [vmem:[%s7746_s6 + $0x158] sm:$0xff]  ;;  %4868 = vmatpush3.msra.mxu0 %v3745_v19 }
0x13d7   :  { %4892 = vmatprep.subr.mxu1 %v7415_v9  ;;  %4869 = vmatprep.subr.mxu0 %v3744_v5 }
0x13d8   :  { %4893 = vmatpush3.msra.mxu1 %v7415_v9  ;;  %v3743_v9 = vld [vmem:[%s7746_s6 + $0x150] sm:$0xff]  ;;  %4870 = vmatpush3.msra.mxu0 %v3744_v5 }
0x13d9   :  { %4894 = vmatprep.subr.mxu1 %v7422_v36  ;;  %4871 = vmatprep.subr.mxu0 %v3743_v9 }
0x13da   :  { %4895 = vmatpush3.msra.mxu1 %v7422_v36  ;;  %v3742_v36 = vld [vmem:[%s7746_s6 + $0x148] sm:$0xff]  ;;  %4872 = vmatpush3.msra.mxu0 %v3743_v9 }
0x13db   :  { %4896 = vmatprep.subr.mxu1 %v7429_v48  ;;  %4873 = vmatprep.subr.mxu0 %v3742_v36 }
0x13dc   :  { %4897 = vmatpush3.msra.mxu1 %v7429_v48  ;;  %v3741_v48 = vld [vmem:[%s7746_s6 + $0x140] sm:$0xff]  ;;  %4874 = vmatpush3.msra.mxu0 %v3742_v36 }
0x13dd   :  { %4898 = vmatprep.subr.mxu1 %v7436_v10  ;;  %4875 = vmatprep.subr.mxu0 %v3741_v48 }
0x13de   :  { %4899 = vmatpush3.msra.mxu1 %v7436_v10  ;;  %v3740_v10 = vld [vmem:[%s7746_s6 + $0x138] sm:$0xff]  ;;  %4876 = vmatpush3.msra.mxu0 %v3741_v48 }
0x13df   :  { %4900 = vmatprep.subr.mxu1 %v7443_v8  ;;  %4877 = vmatprep.subr.mxu0 %v3740_v10 }
0x13e0   :  { %4901 = vmatpush3.msra.mxu1 %v7443_v8  ;;  %v3739_v8 = vld [vmem:[%s7746_s6 + $0x130] sm:$0xff]  ;;  %4878 = vmatpush3.msra.mxu0 %v3740_v10 }
0x13e1   :  { %4924 = vmatprep.subr.mxu1 %v8215_v54  ;;  %4879 = vmatprep.subr.mxu0 %v3739_v8 }
0x13e2   :  { %4880 = vmatpush3.msra.mxu0 %v3739_v8 }
0x13e3   :  { %4881 = vmatprep.subr.mxu0 %v3738_v42 }
0x13e4   :  { %4882 = vmatpush3.msra.mxu0 %v3738_v42 }
0x13e5   :  { %4905 = vmatprep.subr.mxu0 %v8215_v54 }
0x1461   :  { %v4847_v22 = vpop.f32.mrf.mxu0 }
0x1462   :  { %v3714_v42 = vmul.f32 %v4847_v22, %v7350_v35  ;;  %v4155_v22 = vld [vmem:[%s7747_s7 + $0x18] sm:$0xff] }
0x1463   :  { %v3704_v58 = vpop.f32.mrf.mxu0 }
0x1464   :  { %v3713_v8 = vmul.f32 %v3704_v58, %v7346_v20  ;;  %v4158_v20 = vld [vmem:[%s7747_s7 + $0x30] sm:$0xff] }
0x1491   :  { %v4866_v32 = vpop.f32.mrf.mxu1 }
0x1492   :  { %v3887_v28 = vadd.f32 %v4866_v32, %v4673_v50  ;;  %v3722_v32 = vsel %vm146_vm1, %v3714_v42, 0.0  ;;  %v4118_v42 = vpop.permute.xlu0 %4117 }
0x1493   :  { %v3881_v7 = vpop.f32.mrf.mxu1 }
0x1494   :  { %v3882_v18 = vadd.f32 %v4673_v50, %v3881_v7  ;;  %v3715_v50 = vsel %vm146_vm1, %v3713_v8, 0.0  ;;  %v3723_v7 = vrot.slane %v3722_v32, 4 }
0x1496   :  { %5278 = vtanh.f32 %v3882_v18  ;;  %v3724_v13 = vadd.f32 %v3723_v7, %v3722_v32  ;;  %v4326_v32 = vld [vmem:[%s7747_s7 + $0xc0] sm:$0xff]  ;;  %v4325_v7 = vld [vmem:[%s7747_s7 + $0xb8] sm:$0xff] }
0x1497   :  { %5280 = vtanh.f32 %v3887_v28  ;;  %v3716_v28 = vrot.slane %v3715_v50, 4 }
0x1498   :  { %v3725_v35 = vrot.slane %v3724_v13, 2 }
0x149a   :  { %v3726_v55 = vadd.f32 %v3725_v35, %v3724_v13  ;;  %v4323_v13 = vld [vmem:[%s7747_s7 + $0xa8] sm:$0xff]  ;;  %v4318_v35 = vld [vmem:[%s7747_s7 + $0x80] sm:$0xff] }
0x14a3   :  { %v5279_v37 = vpop.eup %5278 }
0x14a4   :  { %v5281_v2 = vpop.eup %5280  ;;  %4883 = vmatprep.mubr.msk.f32.mxu0 %vm146_vm1, %v5279_v37  ;;  %v3717_v37 = vadd.f32 %v3716_v28, %v3715_v50  ;;  %v4327_v50 = vld [vmem:[%s7747_s7 + $0xc8] sm:$0xff] }
0x14a5   :  { %4884 = vmatmul.mubr.msk.f32.vlgmr.msra.gmra.mxu0 %vm146_vm1, %v5281_v2  ;;  %v8216_v28 = vld [vmem:[#allocation10_spill] sm:$0xff] }
0x14a6   :  { %4921 = vmatprep.mubr.msk.f32.mxu0 %vm5319_vm5, %v8215_v54  ;;  %v3718_v61 = vrot.slane %v3717_v37, 2  ;;  %vm4119_vm7 = vcmp.eq.s32.totalorder %v8216_v28, %v4118_v42 }
0x14a8   :  { %v3719_v59 = vadd.f32 %v3718_v61, %v3717_v37  ;;  %v4135_v37 = vpop.permute.xlu0 %4134  ;;  %v4320_v61 = vld [vmem:[%s7747_s7 + $0x90] sm:$0xff] }
0x14a9   :  { %vm4136_vm11 = vcmp.eq.s32.totalorder %v8216_v28, %v4135_v37 }
0x14aa   :  { %v3720_v58 = vrot.slane %v3719_v59, 1 }
0x1565   :  { %v4885_v41 = vpop.f32.mrf.mxu0 }
0x1566   :  { %v3974_v29 = vadd.f32 %v4885_v41, %v4676_v1  ;;  %v3727_v41 = vrot.slane %v3726_v55, 1 }
0x1567   :  { %v3968_v45 = vpop.f32.mrf.mxu0 }
0x1568   :  { %v3984_v26 = vsel %vm146_vm1, %v3974_v29, -inf  ;;  %v3969_v17 = vadd.f32 %v4676_v1, %v3968_v45  ;;  %v4154_v1 = vld [vmem:[%s7747_s7 + $0x10] sm:$0xff]  ;;  %v3721_v45 = vadd.f32 %v3720_v58, %v3719_v59  ;;  %v4493_v58 = vld [vmem:[%s7747_s7 + $0xf8] sm:$0xff] }
0x1569   :  { %v3985_v34 = vrot.slane %v3984_v26, 4 }
0x156a   :  { %v3977_v53 = vsel %vm146_vm1, %v3969_v17, -inf }
0x156b   :  { %v3986_v44 = vmax.f32 %v3984_v26, %v3985_v34  ;;  %v3978_v47 = vrot.slane %v3977_v53, 4  ;;  %v4152_v26 = vld [vmem:[%s7747_s7] sm:$0xff] }
0x156d   :  { %v3987_v24 = vrot.slane %v3986_v44, 2  ;;  %v3979_v57 = vmax.f32 %v3977_v53, %v3978_v47  ;;  %v4167_v53 = vld [vmem:[%s7747_s7 + $0x78] sm:$0xff]  ;;  %v4165_v47 = vld [vmem:[%s7747_s7 + $0x68] sm:$0xff] }
0x156e   :  { %4906 = vmatpush3.msra.mxu0 %v4167_v53 }
0x156f   :  { %v3988_v51 = vmax.f32 %v3986_v44, %v3987_v24  ;;  %v3980_v39 = vrot.slane %v3979_v57, 2  ;;  %v4166_v44 = vld [vmem:[%s7747_s7 + $0x70] sm:$0xff]  ;;  %4907 = vmatprep.subr.mxu0 %v8215_v54  ;;  %v4164_v24 = vld [vmem:[%s7747_s7 + $0x60] sm:$0xff] }
0x1570   :  { %4908 = vmatpush3.msra.mxu0 %v4166_v44 }
0x1571   :  { %v3989_v0 = vrot.slane %v3988_v51, 1  ;;  %v3981_v40 = vmax.f32 %v3979_v57, %v3980_v39  ;;  %4909 = vmatprep.subr.mxu0 %v8215_v54  ;;  %v4163_v57 = vld [vmem:[%s7747_s7 + $0x58] sm:$0xff]  ;;  %v4161_v39 = vld [vmem:[%s7747_s7 + $0x48] sm:$0xff] }
0x1572   :  { %4910 = vmatpush3.msra.mxu0 %v4165_v47 }
0x1573   :  { %v3990_v3 = vmax.f32 %v3988_v51, %v3989_v0  ;;  %v3982_v63 = vrot.slane %v3981_v40, 1  ;;  %4911 = vmatprep.subr.mxu0 %v8215_v54  ;;  %v4162_v51 = vld [vmem:[%s7747_s7 + $0x50] sm:$0xff]  ;;  %v4160_v0 = vld [vmem:[%s7747_s7 + $0x40] sm:$0xff] }
0x1574   :  { %4912 = vmatpush3.msra.mxu0 %v4164_v24  ;;  %v4690_v24 = vld [vmem:[%s7747_s7 + $0x118] ss:$0 sm:$0xff] }
0x1575   :  { %v3992_v14 = vsub.f32 %v3974_v29, %v3990_v3  ;;  %v3983_v43 = vmax.f32 %v3981_v40, %v3982_v63  ;;  %v4153_v29 = vld [vmem:[%s7747_s7 + $0x8] sm:$0xff]  ;;  %4913 = vmatprep.subr.mxu0 %v8215_v54  ;;  %v4406_v40 = vld [vmem:[%s7747_s7 + $0xe0] sm:$0xf] }
0x1576   :  { %4914 = vmatpush3.msra.mxu0 %v4163_v57  ;;  %v4405_v3 = vld [vmem:[%s7744_s4] sm:$0x3] }
0x1577   :  { %v3995_v31 = vmul.f32 1.442695, %v3992_v14  ;;  %v3991_v12 = vsub.f32 %v3969_v17, %v3983_v43  ;;  %v3728_v17 = vadd.f32 %v3727_v41, %v3726_v55  ;;  %4915 = vmatprep.subr.mxu0 %v8215_v54  ;;  %v4495_v55 = vld [vmem:[%s7747_s7 + $0x108] sm:$0xff] }
0x1578   :  { %4916 = vmatpush3.msra.mxu0 %v4162_v51 }
0x1579   :  { %5282 = vpow2.f32 %v3995_v31  ;;  %v3993_v33 = vmul.f32 1.442695, %v3991_v12  ;;  %v4245_v34 = vsel %vm433_vm9, %v3728_v17, %v3721_v45  ;;  %4917 = vmatprep.subr.mxu0 %v8215_v54 }
0x157a   :  { %4918 = vmatpush3.msra.mxu0 %v4161_v39  ;;  %v4688_v39 = vld [vmem:[%s7747_s7 + $0x110] ss:$0 sm:$0xff] }
0x157b   :  { %5284 = vpow2.f32 %v3993_v33  ;;  %4919 = vmatprep.subr.mxu0 %v8215_v54 }
0x157c   :  { %4920 = vmatpush3.msra.mxu0 %v4160_v0 }
0x157d   :  { %4943 = vmatprep.subr.mxu0 %v8215_v54 }
0x1586   :  { %v5283_v21 = vpop.eup %5282 }
0x1587   :  { %v4004_v30 = vsel %vm146_vm1, %v5283_v21, 0.0 }
0x1588   :  { %v5285_v56 = vpop.eup %5284  ;;  %v4005_v27 = vrot.slane %v4004_v30, 4 }
0x1589   :  { %v3997_v62 = vsel %vm146_vm1, %v5285_v56, 0.0 }
0x158a   :  { %v4006_v46 = vadd.f32 %v4005_v27, %v4004_v30  ;;  %v3998_v52 = vrot.slane %v3997_v62, 4 }
0x158c   :  { %v4007_v15 = vrot.slane %v4006_v46, 2  ;;  %v3999_v49 = vadd.f32 %v3998_v52, %v3997_v62 }
0x158e   :  { %v4008_v4 = vadd.f32 %v4007_v15, %v4006_v46  ;;  %v4000_v19 = vrot.slane %v3999_v49, 2 }
0x1590   :  { %v4009_v5 = vrot.slane %v4008_v4, 1  ;;  %v4001_v9 = vadd.f32 %v4000_v19, %v3999_v49  ;;  %v4123_v19 = vpop.permute.xlu1 %4122 }
0x1592   :  { %v4010_v36 = vadd.f32 %v4009_v5, %v4008_v4  ;;  %v4002_v48 = vrot.slane %v4001_v9, 1 }
0x1594   :  { %v4003_v10 = vadd.f32 %v4002_v48, %v4001_v9  ;;  %5286 = vrcp.f32 %v4010_v36  ;;  %v4129_v8 = vpop.permute.xlu1 %4128 }
0x1595   :  { %vm4130_vm8 = vcmp.eq.s32.totalorder %v8216_v28, %v4129_v8 }
0x1596   :  { %5288 = vrcp.f32 %v4003_v10  ;;  %v4328_v10 = vld [vmem:[%s7747_s7 + $0xd0] sm:$0xff] }
0x15a1   :  { %v5287_v18 = vpop.eup %5286 }
0x15a2   :  { %v4014_v25 = vmul.f32 %v5287_v18, %v5283_v21  ;;  %v4141_v18 = vpop.permute.xlu1 %4140 }
0x15a3   :  { %v5289_v2 = vpop.eup %5288  ;;  %vm4142_vm12 = vcmp.eq.s32.totalorder %v8216_v28, %v4141_v18 }
0x15a4   :  { %v4013_v60 = vmul.f32 %v5289_v2, %v5285_v56  ;;  %v4324_v2 = vld [vmem:[%s7747_s7 + $0xb0] sm:$0xff] }
0x15a6   :  { %4902 = vmatprep.mubr.msk.f32.mxu1 %vm146_vm1, %v4013_v60  ;;  %v4322_v60 = vld [vmem:[%s7747_s7 + $0xa0] sm:$0xff] }
0x15a7   :  { %4903 = vmatmul.mubr.msk.f32.vlgmr.msra.gmra.mxu1 %vm146_vm1, %v4014_v25  ;;  %v4147_v25 = vpop.permute.xlu1 %4146 }
0x15a8   :  { %4925 = vmatpush3.msra.mxu1 %v4159_v16  ;;  %4940 = vmatprep.mubr.msk.f32.mxu1 %vm5319_vm5, %v8215_v54  ;;  %v4321_v16 = vld [vmem:[%s7747_s7 + $0x98] sm:$0xff]  ;;  %vm4148_vm15 = vcmp.eq.s32.totalorder %v8216_v28, %v4147_v25 }
0x15a9   :  { %4926 = vmatprep.subr.mxu1 %v8215_v54 }
0x15aa   :  { %4927 = vmatpush3.msra.mxu1 %v4158_v20  ;;  %v4319_v20 = vld [vmem:[%s7747_s7 + $0x88] sm:$0xff] }
0x15ab   :  { %4928 = vmatprep.subr.mxu1 %v8215_v54 }
0x15ac   :  { %4929 = vmatpush3.msra.mxu1 %v4157_v38 }
0x15ad   :  { %4930 = vmatprep.subr.mxu1 %v8215_v54 }
0x15ae   :  { %4931 = vmatpush3.msra.mxu1 %v4156_v23 }
0x15af   :  { %4932 = vmatprep.subr.mxu1 %v8215_v54 }
0x15b0   :  { %4933 = vmatpush3.msra.mxu1 %v4155_v22  ;;  %v4494_v22 = vld [vmem:[%s7747_s7 + $0x100] sm:$0xff] }
0x15b1   :  { %4934 = vmatprep.subr.mxu1 %v8215_v54 }
0x15b2   :  { %4935 = vmatpush3.msra.mxu1 %v4154_v1  ;;  %v4492_v1 = vld [vmem:[%s7747_s7 + $0xf0] sm:$0xff] }
0x15b3   :  { %4936 = vmatprep.subr.mxu1 %v8215_v54 }
0x15b4   :  { %4937 = vmatpush3.msra.mxu1 %v4153_v29 }
0x15b5   :  { %4938 = vmatprep.subr.mxu1 %v8215_v54 }
0x15b6   :  { %4939 = vmatpush3.msra.mxu1 %v4152_v26 }
0x15b7   :  { %4941 = vmatmul.mubr.msk.f32.vlgmr.msra.gmra.mxu1 %vm146_vm1, %v4245_v34  ;;  %4970 = vmatprep.subr.mxu1 %v8215_v54  ;;  %v4687_v34 = vld [vmem:[%s7747_s7 + $0xe8] ss:$0 sm:$0xff] }
0x15b8   :  { %4972 = vmatprep.mubr.msk.f32.mxu1 %vm5319_vm5, %v8215_v54  ;;  %4971 = vmatpush3.msk.msra.mxu1 %vm1713_vm0, %v4406_v40 }
0x15b9   :  { %4975 = vmatprep.subr.mxu1 %v8215_v54 }
0x15bb   :  { %4973 = vmatmul.mubr.msk.f32.vlgmr.msra.gmra.mxu1 %vm4407_vm6, %v4405_v3 }
0x15bc   :  { %4983 = vmatprep.mubr.msk.f32.mxu1 %vm5319_vm5, %v8215_v54  ;;  %4976 = vmatpush3.msra.mxu1 %v4495_v55 }
0x15bd   :  { %4977 = vmatprep.subr.mxu1 %v8215_v54 }
0x15be   :  { %4978 = vmatpush3.msra.mxu1 %v4494_v22 }
0x15bf   :  { %4979 = vmatprep.subr.mxu1 %v8215_v54 }
0x15c0   :  { %4980 = vmatpush3.msra.mxu1 %v4493_v58 }
0x15c1   :  { %4981 = vmatprep.subr.mxu1 %v8215_v54 }
0x15c2   :  { %4982 = vmatpush3.msra.mxu1 %v4492_v1 }
0x1667   :  { %v4904_v63 = vpop.f32.mrf.mxu1 }
0x1668   :  { %v4099_v14 = vmul.f32 %v4904_v63, %v7491_v6  ;;  %v4691_v63 = vld [vmem:[%s7747_s7 + $0x120] ss:$0 sm:$0xff] }
0x1669   :  { %v4087_v43 = vpop.f32.mrf.mxu1 }
0x166a   :  { %v4107_v31 = vsel %vm146_vm1, %v4099_v14, 0.0  ;;  %v4098_v12 = vmul.f32 %v4087_v43, %v7487_v11  ;;  %v4329_v11 = vld [vmem:[%s7747_s7 + $0xd8] sm:$0xff] }
0x166b   :  { %v4108_v33 = vrot.slane %v4107_v31, 4 }
0x166c   :  { %v4100_v21 = vsel %vm146_vm1, %v4098_v12, 0.0 }
0x166d   :  { %v4109_v30 = vadd.f32 %v4108_v33, %v4107_v31  ;;  %v4101_v56 = vrot.slane %v4100_v21, 4  ;;  %v4692_v33 = vld [vmem:[%s7747_s7 + $0x128] ss:$0 sm:$0xff] }
0x166f   :  { %v4110_v27 = vrot.slane %v4109_v30, 2  ;;  %v4102_v62 = vadd.f32 %v4101_v56, %v4100_v21 }
0x1671   :  { %v4111_v46 = vadd.f32 %v4110_v27, %v4109_v30  ;;  %v4103_v52 = vrot.slane %v4102_v62, 2 }
0x1673   :  { %v4112_v15 = vrot.slane %v4111_v46, 1  ;;  %v4104_v49 = vadd.f32 %v4103_v52, %v4102_v62 }
0x1675   :  { %v4105_v4 = vrot.slane %v4104_v49, 1  ;;  %v4113_v5 = vadd.f32 %v4112_v15, %v4111_v46 }
0x1677   :  { %v4106_v6 = vadd.f32 %v4105_v4, %v4104_v49  ;;  %v7646_v9 = vpop.f32.mrf.mxu1 }
0x1679   :  { %v4942_v36 = vpop.f32.mrf.mxu1  ;;  %v4170_v48 = vsel %vm433_vm9, %v4113_v5, %v4106_v6 }
0x167a   :  { %4922 = vmatmul.mubr.msk.f32.vlgmr.msra.gmra.mxu0 %vm146_vm1, %v4170_v48  ;;  %vm4124_vm1 = vcmp.eq.s32.totalorder %v8216_v28, %v4123_v19 }
0x167b   :  { %4944 = vmatpush3.msra.mxu0 %v4329_v11  ;;  %4967 = vmatprep.mubr.msk.f32.mxu0 %vm5319_vm5, %v8215_v54  ;;  %vm4125_vm9 = vmor %vm4119_vm7, %vm4124_vm1  ;;  %v4480_v59 = vpop.f32.mrf.mxu1  ;;  %vm4602_vm5 = vcmask 1024  }
0x167c   :  { %4945 = vmatprep.subr.mxu0 %v8215_v54  ;;  %vm4131_vm10 = vmor %vm4125_vm9, %vm4130_vm8 }
0x167d   :  { %4946 = vmatpush3.msra.mxu0 %v4328_v10  ;;  %vm4137_vm13 = vmor %vm4131_vm10, %vm4136_vm11  ;;  %v4974_v23 = vpop.f32.mrf.mxu1 }
0x167e   :  { %4947 = vmatprep.subr.mxu0 %v8215_v54  ;;  %vm4143_vm14 = vmor %vm4137_vm13, %vm4142_vm12 }
0x167f   :  { %4948 = vmatpush3.msra.mxu0 %v4327_v50  ;;  %vm4149_vm0 = vmor %vm4143_vm14, %vm4148_vm15 }
0x1680   :  { %4949 = vmatprep.subr.mxu0 %v8215_v54  ;;  %v4681_v38 = vsel %vm4149_vm0, 1.0, %v8215_v54 }
0x1681   :  { %4950 = vmatpush3.msra.mxu0 %v4326_v32 }
0x1682   :  { %4951 = vmatprep.subr.mxu0 %v8215_v54 }
0x1683   :  { %4952 = vmatpush3.msra.mxu0 %v4325_v7 }
0x1684   :  { %4953 = vmatprep.subr.mxu0 %v8215_v54 }
0x1685   :  { %4954 = vmatpush3.msra.mxu0 %v4324_v2 }
0x1686   :  { %4955 = vmatprep.subr.mxu0 %v8215_v54 }
0x1687   :  { %4956 = vmatpush3.msra.mxu0 %v4323_v13 }
0x1688   :  { %4957 = vmatprep.subr.mxu0 %v8215_v54 }
0x1689   :  { %4958 = vmatpush3.msra.mxu0 %v4322_v60 }
0x168a   :  { %4959 = vmatprep.subr.mxu0 %v8215_v54 }
0x168b   :  { %4960 = vmatpush3.msra.mxu0 %v4321_v16 }
0x168c   :  { %4961 = vmatprep.subr.mxu0 %v8215_v54 }
0x168d   :  { %4962 = vmatpush3.msra.mxu0 %v4320_v61 }
0x168e   :  { %4963 = vmatprep.subr.mxu0 %v8215_v54 }
0x168f   :  { %4964 = vmatpush3.msra.mxu0 %v4319_v20 }
0x1690   :  { %4965 = vmatprep.subr.mxu0 %v8215_v54 }
0x1691   :  { %4966 = vmatpush3.msra.mxu0 %v4318_v35 }
0x1692   :  { %4968 = vmatmul.mubr.msk.f32.vlgmr.msra.gmra.mxu0 %vm4330_vm2, %v4681_v38 }
0x173a   :  { %v4239_v41 = vpop.f32.mrf.mxu0 }
0x173b   :  { %v4315_v45 = vadd.f32 %v7646_v9, %v4239_v41 }
0x173c   :  { %v4923_v29 = vpop.f32.mrf.mxu0 }
0x1752   :  { %v4400_v26 = vpop.f32.mrf.mxu0 }
0x1753   :  { %v4404_v17 = vadd.f32 %v4400_v26, %v4315_v45 }
0x1754   :  { %v4969_v53 = vpop.f32.mrf.mxu0 }
0x1755   :  { %v4484_v44 = vadd.f32 %v4480_v59, %v4404_v17 }
0x1757   :  { %v4490_v47 = vadd.f32 %v4687_v34, %v4484_v44 }
0x1759   :  { %v4491_v54 = vmax.f32 %v4490_v47, 0.0 }
0x175b   :  { %4984 = vmatmul.mubr.msk.f32.vlgmr.msra.gmra.mxu1 %vm4501_vm3, %v4491_v54  ;;  %v4581_v57 = vmul.f32 %v4690_v24, %v4491_v54 }
0x175d   :  { %v4583_v51 = vsel %vm4582_vm4, %v4581_v57, 0.0 }
0x175e   :  { %4584 = vadd.xlane.f32.xlu0 %v4583_v51 }
0x17e7   :  { %v4585_v12 = vpop.xlane.xlu0 %4584 }
0x181b   :  { %v4571_v0 = vpop.f32.mrf.mxu1 }
0x181c   :  { %v4572_v40 = vadd.f32 %v4688_v39, %v4571_v0 }
0x181d   :  { %v4985_v3 = vpop.f32.mrf.mxu1 }
0x181e   :  { %v4575_v14 = vmax.f32 %v4572_v40, 0.0 }
0x1820   :  { %v4591_v43 = vmul.f32 %v4691_v63, %v4575_v14 }
0x1822   :  { %v4592_v31 = vsel %vm4582_vm4, %v4591_v43, 0.0 }
0x1823   :  { %4593 = vadd.xlane.f32.xlu1 %v4592_v31 }
0x18ac   :  { %v4594_v21 = vpop.xlane.xlu1 %4593 }
0x18ad   :  { %v4595_v30 = vadd.f32 %v4594_v21, %v4585_v12 }
0x18af   :  { %v4601_v56 = vadd.f32 %v4692_v33, %v4595_v30 }
0x18b1   :  { %4603 = vst.msk [vmem:[%s7748_s8] sm:$0x3] %vm4602_vm5, %v4601_v56 }
0x18b2   :  { %4608 = vsyncpa [#allocation3], 1 }

</bundles_post_ra>
